<compile_context>
chip_gen: v6e
topology: v6e:2x2x1
jax: 0.10.0
libtpu: 0.0.40
codegen_flags: <defaults>
</compile_context>

<pallas_src>
import math

import jax
import jax.numpy as jnp
from jax.experimental import pallas as pl
from jax.experimental.pallas import tpu as pltpu

# ---- problem sizes (small, consistent with the module) ----------------------
B = 2            # batch
L = 16           # sequence length fed to each ConvAttentionBranch
DP = 8           # pos_input_dim
DV = 6           # vel_input_dim
DT = 10          # trunk_input_dim
E = 64           # embed_size
H = 4            # num_heads
HD = E // H      # head dim = 16
KW = 5           # local_window
PAD = KW // 2
SCALE = 1.0 / math.sqrt(HD)


# -----------------------------------------------------------------------------
# In-kernel helpers (operate on loaded VMEM values, all shapes static).
# -----------------------------------------------------------------------------
def _softmax_attend_last(q_row, kb, vb):
    """Attention for the LAST query token of one batch element.

    q_row: (1, E) pre-scaled query.  kb, vb: (L, E).
    Pure VPU/XLU (broadcast-mul + reductions); no tiny MXU pushes/transposes.
    """
    heads = []
    for h in range(H):
        lo, hi = h * HD, (h + 1) * HD
        qh, kh, vh = q_row[:, lo:hi], kb[:, lo:hi], vb[:, lo:hi]
        s = jnp.sum(qh * kh, axis=-1, keepdims=True)                  # (L, 1)
        s = s - jnp.max(s, axis=0, keepdims=True)
        p = jnp.exp(s)
        p = p * pl.reciprocal(jnp.sum(p, axis=0, keepdims=True), approx=True)
        heads.append(jnp.sum(p * vh, axis=0, keepdims=True))          # (1, HD)
    return jnp.concatenate(heads, axis=1)                             # (1, E)


def _fusion_attend_mean(qb, kb, vb):
    """2-token self-attention for one batch element, mean over tokens.

    qb (pre-scaled), kb, vb: (2, E).  Returns (1, E) = mean_t concat_h(o_h).
    """
    heads = []
    for h in range(H):
        lo, hi = h * HD, (h + 1) * HD
        qh, kh, vh = qb[:, lo:hi], kb[:, lo:hi], vb[:, lo:hi]
        s0 = jnp.sum(qh * kh[0:1, :], axis=-1, keepdims=True)         # (2, 1)
        s1 = jnp.sum(qh * kh[1:2, :], axis=-1, keepdims=True)         # (2, 1)
        s = jnp.concatenate([s0, s1], axis=1)                         # (2, 2)
        s = s - jnp.max(s, axis=-1, keepdims=True)
        p = jnp.exp(s)
        p = p * pl.reciprocal(jnp.sum(p, axis=-1, keepdims=True), approx=True)
        o = p[:, 0:1] * vh[0:1, :] + p[:, 1:2] * vh[1:2, :]           # (2, HD)
        heads.append(0.5 * (o[0:1, :] + o[1:2, :]))                   # (1, HD)
    return jnp.concatenate(heads, axis=1)                             # (1, E)


def _branch_forward(xcol, wconv, bconv, wq, bq, wkv, bkv, wo, bo, wfc, bfc):
    """ConvAttentionBranch on (B*L, KW*D) im2col input.  Returns (B, E)."""
    y = jnp.dot(xcol, wconv, preferred_element_type=jnp.float32) + bconv    # (B*L, E)
    kv = jnp.dot(y, wkv, preferred_element_type=jnp.float32) + bkv          # (B*L, 2E)
    rows = []
    for b in range(B):
        y_last = y[b * L + L - 1:b * L + L, :]                              # (1, E)
        q = jnp.dot(y_last, wq, preferred_element_type=jnp.float32) + bq    # (1, E) scaled
        kb = kv[b * L:(b + 1) * L, 0:E]
        vb = kv[b * L:(b + 1) * L, E:2 * E]
        rows.append(_softmax_attend_last(q, kb, vb))                        # (1, E)
    attn = jnp.concatenate(rows, axis=0)                                    # (B, E)
    attn = jnp.dot(attn, wo, preferred_element_type=jnp.float32) + bo       # out_proj
    return jnp.dot(attn, wfc, preferred_element_type=jnp.float32) + bfc     # fc


# -----------------------------------------------------------------------------
# The fused kernel: whole ImprovedDeepONet forward in one grid step.
# -----------------------------------------------------------------------------
def deeponet_kernel(
        xpos_ref, xvel_ref, trunk_ref,
        p_wconv, p_bconv, p_wq, p_bq, p_wkv, p_bkv, p_wo, p_bo, p_wfc, p_bfc,
        v_wconv, v_bconv, v_wq, v_bq, v_wkv, v_bkv, v_wo, v_bo, v_wfc, v_bfc,
        f_wqkv, f_bqkv, f_wo, f_bo, f_wfc, f_bfc,
        t_w, t_b, o_w, o_b,
        out_ref):
    pos_out = _branch_forward(
        xpos_ref[...], p_wconv[...], p_bconv[...], p_wq[...], p_bq[...],
        p_wkv[...], p_bkv[...], p_wo[...], p_bo[...], p_wfc[...], p_bfc[...])
    vel_out = _branch_forward(
        xvel_ref[...], v_wconv[...], v_bconv[...], v_wq[...], v_bq[...],
        v_wkv[...], v_bkv[...], v_wo[...], v_bo[...], v_wfc[...], v_bfc[...])

    # ---- MultiHeadAttentionFusion over the 2 branch tokens per batch --------
    tok_rows = []
    for b in range(B):
        tok_rows.append(pos_out[b:b + 1, :])
        tok_rows.append(vel_out[b:b + 1, :])
    toks = jnp.concatenate(tok_rows, axis=0)                                # (2B, E)
    qkv = (jnp.dot(toks, f_wqkv[...], preferred_element_type=jnp.float32)
           + f_bqkv[...])                                                   # (2B, 3E)

    fused_rows = []
    for b in range(B):
        blk = qkv[2 * b:2 * b + 2, :]                                       # (2, 3E)
        fused_rows.append(_fusion_attend_mean(
            blk[:, 0:E], blk[:, E:2 * E], blk[:, 2 * E:3 * E]))
    fused = jnp.concatenate(fused_rows, axis=0)                             # (B, E)
    fused = jnp.dot(fused, f_wo[...], preferred_element_type=jnp.float32) + f_bo[...]
    fused = jnp.dot(fused, f_wfc[...], preferred_element_type=jnp.float32) + f_bfc[...]

    # ---- trunk (Linear + ReLU), elementwise combine, output layer -----------
    trunk = (jnp.dot(trunk_ref[...], t_w[...], preferred_element_type=jnp.float32)
             + t_b[...])
    trunk = jnp.maximum(trunk, 0.0)
    combined = fused * trunk                                                # (B, E)
    out_ref[...] = (jnp.sum(combined * o_w[...], axis=-1, keepdims=True)
                    + o_b[...])                                             # (B, 1)


# -----------------------------------------------------------------------------
# Wrapper: im2col in plain JAX (tiny), single pallas_call with full-array blocks.
# -----------------------------------------------------------------------------
def _full_spec(shape):
    nd = len(shape)
    return pl.BlockSpec(shape, lambda i, _nd=nd: (0,) * _nd)


def _im2col(x):
    b, l, d = x.shape
    xp = jnp.pad(x, ((0, 0), (PAD, PAD), (0, 0)))
    cols = jnp.concatenate([xp[:, k:k + l, :] for k in range(KW)], axis=-1)
    return cols.reshape(b * l, KW * d)                                      # (B*L, KW*D)


def improved_deeponet(xpos, xvel, trunk_in, kparams):
    """xpos: (B,L,DP), xvel: (B,L,DV), trunk_in: (B,DT). Returns (B, 1)."""
    operands = [_im2col(xpos), _im2col(xvel), trunk_in] + list(kparams)
    return pl.pallas_call(
        deeponet_kernel,
        out_shape=jax.ShapeDtypeStruct((B, 1), jnp.float32),
        grid=(1,),
        in_specs=[_full_spec(op.shape) for op in operands],
        out_specs=pl.BlockSpec((B, 1), lambda i: (0, 0)),
        compiler_params=pltpu.CompilerParams(
            dimension_semantics=("arbitrary",)),
    )(*operands)


# -----------------------------------------------------------------------------
# Deterministic parameters (PyTorch layouts) + kernel-layout rearrangement.
# -----------------------------------------------------------------------------
def _make_branch_raw(key, din):
    ks = jax.random.split(key, 8)
    s = 0.1
    return (s * jax.random.normal(ks[0], (E, din, KW), jnp.float32),   # Conv1d.weight
            s * jax.random.normal(ks[1], (E,), jnp.float32),           # Conv1d.bias
            s * jax.random.normal(ks[2], (3 * E, E), jnp.float32),     # in_proj_weight
            s * jax.random.normal(ks[3], (3 * E,), jnp.float32),       # in_proj_bias
            s * jax.random.normal(ks[4], (E, E), jnp.float32),         # out_proj.weight
            s * jax.random.normal(ks[5], (E,), jnp.float32),           # out_proj.bias
            s * jax.random.normal(ks[6], (E, E), jnp.float32),         # fc.weight
            s * jax.random.normal(ks[7], (E,), jnp.float32))           # fc.bias


def _make_fusion_raw(key):
    ks = jax.random.split(key, 6)
    s = 0.1
    return (s * jax.random.normal(ks[0], (3 * E, E), jnp.float32),
            s * jax.random.normal(ks[1], (3 * E,), jnp.float32),
            s * jax.random.normal(ks[2], (E, E), jnp.float32),
            s * jax.random.normal(ks[3], (E,), jnp.float32),
            s * jax.random.normal(ks[4], (E, E), jnp.float32),
            s * jax.random.normal(ks[5], (E,), jnp.float32))


def make_raw_params(key):
    kpos, kvel, kfus, kt, ko = jax.random.split(key, 5)
    kt1, kt2 = jax.random.split(kt)
    ko1, ko2 = jax.random.split(ko)
    s = 0.1
    return (_make_branch_raw(kpos, DP),
            _make_branch_raw(kvel, DV),
            _make_fusion_raw(kfus),
            (s * jax.random.normal(kt1, (E, DT), jnp.float32),         # trunk Linear
             s * jax.random.normal(kt2, (E,), jnp.float32)),
            (s * jax.random.normal(ko1, (1, E), jnp.float32),          # output Linear
             s * jax.random.normal(ko2, (1,), jnp.float32)))


def _branch_to_kernel(raw):
    W_conv, b_conv, W_in, b_in, W_out, b_out, W_fc, b_fc = raw
    din = W_conv.shape[1]
    wconv = jnp.transpose(W_conv, (2, 1, 0)).reshape(KW * din, E)      # im2col weight
    Wq, Wk, Wv = W_in[:E], W_in[E:2 * E], W_in[2 * E:]
    bq, bk, bv = b_in[:E], b_in[E:2 * E], b_in[2 * E:]
    return [wconv, b_conv[None, :],
            Wq.T * SCALE, (bq * SCALE)[None, :],                       # scale folded
            jnp.concatenate([Wk.T, Wv.T], axis=1),                     # (E, 2E) lane-dense
            jnp.concatenate([bk, bv])[None, :],
            W_out.T, b_out[None, :],
            W_fc.T, b_fc[None, :]]


def _fusion_to_kernel(raw):
    W_in, b_in, W_out, b_out, W_fc, b_fc = raw
    Wq, Wk, Wv = W_in[:E], W_in[E:2 * E], W_in[2 * E:]
    bq, bk, bv = b_in[:E], b_in[E:2 * E], b_in[2 * E:]
    return [jnp.concatenate([Wq.T * SCALE, Wk.T, Wv.T], axis=1),       # (E, 3E)
            jnp.concatenate([bq * SCALE, bk, bv])[None, :],
            W_out.T, b_out[None, :],
            W_fc.T, b_fc[None, :]]


def to_kernel_params(raw):
    pos, vel, fus, (W_t, b_t), (W_o, b_o) = raw
    return (_branch_to_kernel(pos) + _branch_to_kernel(vel) +
            _fusion_to_kernel(fus) +
            [W_t.T, b_t[None, :], W_o, b_o[None, :]])


# -----------------------------------------------------------------------------
# Pure-JAX reference (mirrors the PyTorch forward exactly).
# -----------------------------------------------------------------------------
def _mha_ref(x, W_in, b_in, W_out, b_out):
    Bq, S, _ = x.shape
    qkv = jnp.einsum('bse,fe->bsf', x, W_in) + b_in
    q, k, v = qkv[..., :E], qkv[..., E:2 * E], qkv[..., 2 * E:]

    def split(t):
        return t.reshape(Bq, S, H, HD).transpose(0, 2, 1, 3)

    qh, kh, vh = split(q), split(k), split(v)
    s = jnp.einsum('bhqd,bhkd->bhqk', qh, kh) / math.sqrt(HD)
    p = jax.nn.softmax(s, axis=-1)
    o = jnp.einsum('bhqk,bhkd->bhqd', p, vh)
    o = o.transpose(0, 2, 1, 3).reshape(Bq, S, E)
    return jnp.einsum('bse,fe->bsf', o, W_out) + b_out


def _branch_ref(x, raw):
    W_conv, b_conv, W_in, b_in, W_out, b_out, W_fc, b_fc = raw
    Bq, Lq, _ = x.shape
    xp = jnp.pad(x, ((0, 0), (PAD, PAD), (0, 0)))
    y = jnp.zeros((Bq, Lq, E), jnp.float32) + b_conv
    for k in range(KW):
        y = y + jnp.einsum('bld,ed->ble', xp[:, k:k + Lq, :], W_conv[:, :, k])
    attn = _mha_ref(y, W_in, b_in, W_out, b_out)
    return jnp.einsum('be,fe->bf', attn[:, -1, :], W_fc) + b_fc


def model_ref(xpos, xvel, trunk_in, raw):
    pos, vel, fus, (W_t, b_t), (W_o, b_o) = raw
    po = _branch_ref(xpos, pos)
    vo = _branch_ref(xvel, vel)
    trunk = jax.nn.relu(jnp.einsum('bd,ed->be', trunk_in, W_t) + b_t)
    comb = jnp.stack([po, vo], axis=1)                                 # (B, 2, E)
    Wf_in, bf_in, Wf_out, bf_out, Wf_fc, bf_fc = fus
    a = _mha_ref(comb, Wf_in, bf_in, Wf_out, bf_out)
    fused = jnp.einsum('be,fe->bf', a.mean(axis=1), Wf_fc) + bf_fc
    combined = fused * trunk
    return jnp.einsum('be,oe->bo', combined, W_o) + b_o


if __name__ == "__main__":
    key = jax.random.PRNGKey(0)
    kx1, kx2, kx3, kp = jax.random.split(key, 4)
    xpos = jax.random.normal(kx1, (B, L, DP), jnp.float32)
    xvel = jax.random.normal(kx2, (B, L, DV), jnp.float32)
    trunk_in = jax.random.normal(kx3, (B, DT), jnp.float32)

    raw = make_raw_params(kp)
    kparams = to_kernel_params(raw)

    out = improved_deeponet(xpos, xvel, trunk_in, kparams)
    out = jax.block_until_ready(out)

    ref = model_ref(xpos, xvel, trunk_in, raw)
    assert out.shape == (B, 1)
    err = float(jnp.max(jnp.abs(out - ref)))
    # tolerance loosened slightly vs 1e-4 because the in-kernel softmax uses
    # pl.reciprocal(approx=True) (EUP approximate reciprocal)
    assert jnp.allclose(out, ref, atol=2e-3, rtol=2e-3), f"max abs err {err}"
    print("KERNEL_OK")
</pallas_src>

<mosaic_0001>
module attributes {stable_mosaic.version = 11 : i64} {
  func.func @deeponet_kernel(%arg0: i32, %arg1: memref<32x40xf32, #tpu.memory_space<vmem>>, %arg2: memref<32x30xf32, #tpu.memory_space<vmem>>, %arg3: memref<2x10xf32, #tpu.memory_space<vmem>>, %arg4: memref<40x64xf32, #tpu.memory_space<vmem>>, %arg5: memref<1x64xf32, #tpu.memory_space<vmem>>, %arg6: memref<64x64xf32, #tpu.memory_space<vmem>>, %arg7: memref<1x64xf32, #tpu.memory_space<vmem>>, %arg8: memref<64x128xf32, #tpu.memory_space<vmem>>, %arg9: memref<1x128xf32, #tpu.memory_space<vmem>>, %arg10: memref<64x64xf32, #tpu.memory_space<vmem>>, %arg11: memref<1x64xf32, #tpu.memory_space<vmem>>, %arg12: memref<64x64xf32, #tpu.memory_space<vmem>>, %arg13: memref<1x64xf32, #tpu.memory_space<vmem>>, %arg14: memref<30x64xf32, #tpu.memory_space<vmem>>, %arg15: memref<1x64xf32, #tpu.memory_space<vmem>>, %arg16: memref<64x64xf32, #tpu.memory_space<vmem>>, %arg17: memref<1x64xf32, #tpu.memory_space<vmem>>, %arg18: memref<64x128xf32, #tpu.memory_space<vmem>>, %arg19: memref<1x128xf32, #tpu.memory_space<vmem>>, %arg20: memref<64x64xf32, #tpu.memory_space<vmem>>, %arg21: memref<1x64xf32, #tpu.memory_space<vmem>>, %arg22: memref<64x64xf32, #tpu.memory_space<vmem>>, %arg23: memref<1x64xf32, #tpu.memory_space<vmem>>, %arg24: memref<64x192xf32, #tpu.memory_space<vmem>>, %arg25: memref<1x192xf32, #tpu.memory_space<vmem>>, %arg26: memref<64x64xf32, #tpu.memory_space<vmem>>, %arg27: memref<1x64xf32, #tpu.memory_space<vmem>>, %arg28: memref<64x64xf32, #tpu.memory_space<vmem>>, %arg29: memref<1x64xf32, #tpu.memory_space<vmem>>, %arg30: memref<10x64xf32, #tpu.memory_space<vmem>>, %arg31: memref<1x64xf32, #tpu.memory_space<vmem>>, %arg32: memref<1x64xf32, #tpu.memory_space<vmem>>, %arg33: memref<1x1xf32, #tpu.memory_space<vmem>>, %arg34: memref<2x1xf32, #tpu.memory_space<vmem>>) attributes {dimension_semantics = [#tpu.dimension_semantics<arbitrary>], iteration_bounds = array<i64: 1>, scalar_prefetch = 0 : i64, scratch_operands = 0 : i64, tpu.core_type = #tpu.core_type<tc>, window_params = [{pipeline_mode = #tpu.pipeline_mode<synchronous>, transform_indices = @transform_0, window_bounds = array<i64: 32, 40>}, {pipeline_mode = #tpu.pipeline_mode<synchronous>, transform_indices = @transform_1, window_bounds = array<i64: 32, 30>}, {pipeline_mode = #tpu.pipeline_mode<synchronous>, transform_indices = @transform_2, window_bounds = array<i64: 2, 10>}, {pipeline_mode = #tpu.pipeline_mode<synchronous>, transform_indices = @transform_3, window_bounds = array<i64: 40, 64>}, {pipeline_mode = #tpu.pipeline_mode<synchronous>, transform_indices = @transform_4, window_bounds = array<i64: 1, 64>}, {pipeline_mode = #tpu.pipeline_mode<synchronous>, transform_indices = @transform_5, window_bounds = array<i64: 64, 64>}, {pipeline_mode = #tpu.pipeline_mode<synchronous>, transform_indices = @transform_6, window_bounds = array<i64: 1, 64>}, {pipeline_mode = #tpu.pipeline_mode<synchronous>, transform_indices = @transform_7, window_bounds = array<i64: 64, 128>}, {pipeline_mode = #tpu.pipeline_mode<synchronous>, transform_indices = @transform_8, window_bounds = array<i64: 1, 128>}, {pipeline_mode = #tpu.pipeline_mode<synchronous>, transform_indices = @transform_9, window_bounds = array<i64: 64, 64>}, {pipeline_mode = #tpu.pipeline_mode<synchronous>, transform_indices = @transform_10, window_bounds = array<i64: 1, 64>}, {pipeline_mode = #tpu.pipeline_mode<synchronous>, transform_indices = @transform_11, window_bounds = array<i64: 64, 64>}, {pipeline_mode = #tpu.pipeline_mode<synchronous>, transform_indices = @transform_12, window_bounds = array<i64: 1, 64>}, {pipeline_mode = #tpu.pipeline_mode<synchronous>, transform_indices = @transform_13, window_bounds = array<i64: 30, 64>}, {pipeline_mode = #tpu.pipeline_mode<synchronous>, transform_indices = @transform_14, window_bounds = array<i64: 1, 64>}, {pipeline_mode = #tpu.pipeline_mode<synchronous>, transform_indices = @transform_15, window_bounds = array<i64: 64, 64>}, {pipeline_mode = #tpu.pipeline_mode<synchronous>, transform_indices = @transform_16, window_bounds = array<i64: 1, 64>}, {pipeline_mode = #tpu.pipeline_mode<synchronous>, transform_indices = @transform_17, window_bounds = array<i64: 64, 128>}, {pipeline_mode = #tpu.pipeline_mode<synchronous>, transform_indices = @transform_18, window_bounds = array<i64: 1, 128>}, {pipeline_mode = #tpu.pipeline_mode<synchronous>, transform_indices = @transform_19, window_bounds = array<i64: 64, 64>}, {pipeline_mode = #tpu.pipeline_mode<synchronous>, transform_indices = @transform_20, window_bounds = array<i64: 1, 64>}, {pipeline_mode = #tpu.pipeline_mode<synchronous>, transform_indices = @transform_21, window_bounds = array<i64: 64, 64>}, {pipeline_mode = #tpu.pipeline_mode<synchronous>, transform_indices = @transform_22, window_bounds = array<i64: 1, 64>}, {pipeline_mode = #tpu.pipeline_mode<synchronous>, transform_indices = @transform_23, window_bounds = array<i64: 64, 192>}, {pipeline_mode = #tpu.pipeline_mode<synchronous>, transform_indices = @transform_24, window_bounds = array<i64: 1, 192>}, {pipeline_mode = #tpu.pipeline_mode<synchronous>, transform_indices = @transform_25, window_bounds = array<i64: 64, 64>}, {pipeline_mode = #tpu.pipeline_mode<synchronous>, transform_indices = @transform_26, window_bounds = array<i64: 1, 64>}, {pipeline_mode = #tpu.pipeline_mode<synchronous>, transform_indices = @transform_27, window_bounds = array<i64: 64, 64>}, {pipeline_mode = #tpu.pipeline_mode<synchronous>, transform_indices = @transform_28, window_bounds = array<i64: 1, 64>}, {pipeline_mode = #tpu.pipeline_mode<synchronous>, transform_indices = @transform_29, window_bounds = array<i64: 10, 64>}, {pipeline_mode = #tpu.pipeline_mode<synchronous>, transform_indices = @transform_30, window_bounds = array<i64: 1, 64>}, {pipeline_mode = #tpu.pipeline_mode<synchronous>, transform_indices = @transform_31, window_bounds = array<i64: 1, 64>}, {pipeline_mode = #tpu.pipeline_mode<synchronous>, transform_indices = @transform_32, window_bounds = array<i64: 1, 1>}, {pipeline_mode = #tpu.pipeline_mode<synchronous>, transform_indices = @transform_33, window_bounds = array<i64: 2, 1>}]} {
    %c0 = arith.constant 0 : index
    %c0_0 = arith.constant 0 : index
    %0 = vector.load %arg1[%c0, %c0_0] : memref<32x40xf32, #tpu.memory_space<vmem>>, vector<32x40xf32>
    %c0_1 = arith.constant 0 : index
    %c0_2 = arith.constant 0 : index
    %1 = vector.load %arg4[%c0_1, %c0_2] : memref<40x64xf32, #tpu.memory_space<vmem>>, vector<40x64xf32>
    %c0_3 = arith.constant 0 : index
    %c0_4 = arith.constant 0 : index
    %2 = vector.load %arg5[%c0_3, %c0_4] : memref<1x64xf32, #tpu.memory_space<vmem>>, vector<1x64xf32>
    %c0_5 = arith.constant 0 : index
    %c0_6 = arith.constant 0 : index
    %3 = vector.load %arg6[%c0_5, %c0_6] : memref<64x64xf32, #tpu.memory_space<vmem>>, vector<64x64xf32>
    %c0_7 = arith.constant 0 : index
    %c0_8 = arith.constant 0 : index
    %4 = vector.load %arg7[%c0_7, %c0_8] : memref<1x64xf32, #tpu.memory_space<vmem>>, vector<1x64xf32>
    %c0_9 = arith.constant 0 : index
    %c0_10 = arith.constant 0 : index
    %5 = vector.load %arg8[%c0_9, %c0_10] : memref<64x128xf32, #tpu.memory_space<vmem>>, vector<64x128xf32>
    %c0_11 = arith.constant 0 : index
    %c0_12 = arith.constant 0 : index
    %6 = vector.load %arg9[%c0_11, %c0_12] : memref<1x128xf32, #tpu.memory_space<vmem>>, vector<1x128xf32>
    %c0_13 = arith.constant 0 : index
    %c0_14 = arith.constant 0 : index
    %7 = vector.load %arg10[%c0_13, %c0_14] : memref<64x64xf32, #tpu.memory_space<vmem>>, vector<64x64xf32>
    %c0_15 = arith.constant 0 : index
    %c0_16 = arith.constant 0 : index
    %8 = vector.load %arg11[%c0_15, %c0_16] : memref<1x64xf32, #tpu.memory_space<vmem>>, vector<1x64xf32>
    %c0_17 = arith.constant 0 : index
    %c0_18 = arith.constant 0 : index
    %9 = vector.load %arg12[%c0_17, %c0_18] : memref<64x64xf32, #tpu.memory_space<vmem>>, vector<64x64xf32>
    %c0_19 = arith.constant 0 : index
    %c0_20 = arith.constant 0 : index
    %10 = vector.load %arg13[%c0_19, %c0_20] : memref<1x64xf32, #tpu.memory_space<vmem>>, vector<1x64xf32>
    %cst = arith.constant dense<0.000000e+00> : vector<32x64xf32>
    %11 = tpu.matmul %0, %1, %cst {dimension_numbers = #tpu.dot_dimension_numbers<[1], [0], [0], [1], [0, 0, 1, 1], [], []>} : vector<32x40xf32>, vector<40x64xf32>, vector<32x64xf32> -> vector<32x64xf32>
    %12 = vector.broadcast %2 : vector<1x64xf32> to vector<32x64xf32>
    %13 = arith.addf %11, %12 : vector<32x64xf32>
    %cst_21 = arith.constant dense<0.000000e+00> : vector<32x128xf32>
    %14 = tpu.matmul %13, %5, %cst_21 {dimension_numbers = #tpu.dot_dimension_numbers<[1], [0], [0], [1], [0, 0, 1, 1], [], []>} : vector<32x64xf32>, vector<64x128xf32>, vector<32x128xf32> -> vector<32x128xf32>
    %15 = vector.broadcast %6 : vector<1x128xf32> to vector<32x128xf32>
    %16 = arith.addf %14, %15 : vector<32x128xf32>
    %17 = vector.extract_strided_slice %13 {offsets = [15, 0], sizes = [1, 64], strides = [1, 1]} : vector<32x64xf32> to vector<1x64xf32>
    %cst_22 = arith.constant dense<0.000000e+00> : vector<1x64xf32>
    %18 = tpu.matmul %17, %3, %cst_22 {dimension_numbers = #tpu.dot_dimension_numbers<[1], [0], [0], [1], [0, 0, 1, 1], [], []>} : vector<1x64xf32>, vector<64x64xf32>, vector<1x64xf32> -> vector<1x64xf32>
    %19 = arith.addf %18, %4 : vector<1x64xf32>
    %20 = vector.extract_strided_slice %16 {offsets = [0, 0], sizes = [16, 64], strides = [1, 1]} : vector<32x128xf32> to vector<16x64xf32>
    %21 = vector.extract_strided_slice %16 {offsets = [0, 64], sizes = [16, 64], strides = [1, 1]} : vector<32x128xf32> to vector<16x64xf32>
    %22 = vector.extract_strided_slice %19 {offsets = [0, 0], sizes = [1, 16], strides = [1, 1]} : vector<1x64xf32> to vector<1x16xf32>
    %23 = vector.extract_strided_slice %20 {offsets = [0, 0], sizes = [16, 16], strides = [1, 1]} : vector<16x64xf32> to vector<16x16xf32>
    %24 = vector.extract_strided_slice %21 {offsets = [0, 0], sizes = [16, 16], strides = [1, 1]} : vector<16x64xf32> to vector<16x16xf32>
    %25 = vector.broadcast %22 : vector<1x16xf32> to vector<16x16xf32>
    %26 = arith.mulf %25, %23 : vector<16x16xf32>
    %cst_23 = arith.constant dense<0.000000e+00> : vector<16xf32>
    %27 = vector.multi_reduction <add>, %26, %cst_23 [1] : vector<16x16xf32> to vector<16xf32>
    %28 = vector.shape_cast %27 : vector<16xf32> to vector<16x1xf32>
    %cst_24 = arith.constant dense<0xFF800000> : vector<1xf32>
    %29 = vector.multi_reduction <maximumf>, %28, %cst_24 [0] : vector<16x1xf32> to vector<1xf32>
    %30 = vector.shape_cast %29 : vector<1xf32> to vector<1x1xf32>
    %31 = vector.broadcast %30 : vector<1x1xf32> to vector<16x1xf32>
    %32 = arith.subf %28, %31 : vector<16x1xf32>
    %33 = math.exp %32 : vector<16x1xf32>
    %cst_25 = arith.constant dense<0.000000e+00> : vector<1xf32>
    %34 = vector.multi_reduction <add>, %33, %cst_25 [0] : vector<16x1xf32> to vector<1xf32>
    %35 = vector.shape_cast %34 : vector<1xf32> to vector<1x1xf32>
    %36 = tpu.reciprocal %35 {approx = true} : vector<1x1xf32> -> vector<1x1xf32>
    %37 = vector.broadcast %36 : vector<1x1xf32> to vector<16x1xf32>
    %38 = arith.mulf %33, %37 : vector<16x1xf32>
    %39 = vector.broadcast %38 : vector<16x1xf32> to vector<16x16xf32>
    %40 = arith.mulf %39, %24 : vector<16x16xf32>
    %cst_26 = arith.constant dense<0.000000e+00> : vector<16xf32>
    %41 = vector.multi_reduction <add>, %40, %cst_26 [0] : vector<16x16xf32> to vector<16xf32>
    %42 = vector.shape_cast %41 : vector<16xf32> to vector<1x16xf32>
    %43 = vector.extract_strided_slice %19 {offsets = [0, 16], sizes = [1, 16], strides = [1, 1]} : vector<1x64xf32> to vector<1x16xf32>
    %44 = vector.extract_strided_slice %20 {offsets = [0, 16], sizes = [16, 16], strides = [1, 1]} : vector<16x64xf32> to vector<16x16xf32>
    %45 = vector.extract_strided_slice %21 {offsets = [0, 16], sizes = [16, 16], strides = [1, 1]} : vector<16x64xf32> to vector<16x16xf32>
    %46 = vector.broadcast %43 : vector<1x16xf32> to vector<16x16xf32>
    %47 = arith.mulf %46, %44 : vector<16x16xf32>
    %cst_27 = arith.constant dense<0.000000e+00> : vector<16xf32>
    %48 = vector.multi_reduction <add>, %47, %cst_27 [1] : vector<16x16xf32> to vector<16xf32>
    %49 = vector.shape_cast %48 : vector<16xf32> to vector<16x1xf32>
    %cst_28 = arith.constant dense<0xFF800000> : vector<1xf32>
    %50 = vector.multi_reduction <maximumf>, %49, %cst_28 [0] : vector<16x1xf32> to vector<1xf32>
    %51 = vector.shape_cast %50 : vector<1xf32> to vector<1x1xf32>
    %52 = vector.broadcast %51 : vector<1x1xf32> to vector<16x1xf32>
    %53 = arith.subf %49, %52 : vector<16x1xf32>
    %54 = math.exp %53 : vector<16x1xf32>
    %cst_29 = arith.constant dense<0.000000e+00> : vector<1xf32>
    %55 = vector.multi_reduction <add>, %54, %cst_29 [0] : vector<16x1xf32> to vector<1xf32>
    %56 = vector.shape_cast %55 : vector<1xf32> to vector<1x1xf32>
    %57 = tpu.reciprocal %56 {approx = true} : vector<1x1xf32> -> vector<1x1xf32>
    %58 = vector.broadcast %57 : vector<1x1xf32> to vector<16x1xf32>
    %59 = arith.mulf %54, %58 : vector<16x1xf32>
    %60 = vector.broadcast %59 : vector<16x1xf32> to vector<16x16xf32>
    %61 = arith.mulf %60, %45 : vector<16x16xf32>
    %cst_30 = arith.constant dense<0.000000e+00> : vector<16xf32>
    %62 = vector.multi_reduction <add>, %61, %cst_30 [0] : vector<16x16xf32> to vector<16xf32>
    %63 = vector.shape_cast %62 : vector<16xf32> to vector<1x16xf32>
    %64 = vector.extract_strided_slice %19 {offsets = [0, 32], sizes = [1, 16], strides = [1, 1]} : vector<1x64xf32> to vector<1x16xf32>
    %65 = vector.extract_strided_slice %20 {offsets = [0, 32], sizes = [16, 16], strides = [1, 1]} : vector<16x64xf32> to vector<16x16xf32>
    %66 = vector.extract_strided_slice %21 {offsets = [0, 32], sizes = [16, 16], strides = [1, 1]} : vector<16x64xf32> to vector<16x16xf32>
    %67 = vector.broadcast %64 : vector<1x16xf32> to vector<16x16xf32>
    %68 = arith.mulf %67, %65 : vector<16x16xf32>
    %cst_31 = arith.constant dense<0.000000e+00> : vector<16xf32>
    %69 = vector.multi_reduction <add>, %68, %cst_31 [1] : vector<16x16xf32> to vector<16xf32>
    %70 = vector.shape_cast %69 : vector<16xf32> to vector<16x1xf32>
    %cst_32 = arith.constant dense<0xFF800000> : vector<1xf32>
    %71 = vector.multi_reduction <maximumf>, %70, %cst_32 [0] : vector<16x1xf32> to vector<1xf32>
    %72 = vector.shape_cast %71 : vector<1xf32> to vector<1x1xf32>
    %73 = vector.broadcast %72 : vector<1x1xf32> to vector<16x1xf32>
    %74 = arith.subf %70, %73 : vector<16x1xf32>
    %75 = math.exp %74 : vector<16x1xf32>
    %cst_33 = arith.constant dense<0.000000e+00> : vector<1xf32>
    %76 = vector.multi_reduction <add>, %75, %cst_33 [0] : vector<16x1xf32> to vector<1xf32>
    %77 = vector.shape_cast %76 : vector<1xf32> to vector<1x1xf32>
    %78 = tpu.reciprocal %77 {approx = true} : vector<1x1xf32> -> vector<1x1xf32>
    %79 = vector.broadcast %78 : vector<1x1xf32> to vector<16x1xf32>
    %80 = arith.mulf %75, %79 : vector<16x1xf32>
    %81 = vector.broadcast %80 : vector<16x1xf32> to vector<16x16xf32>
    %82 = arith.mulf %81, %66 : vector<16x16xf32>
    %cst_34 = arith.constant dense<0.000000e+00> : vector<16xf32>
    %83 = vector.multi_reduction <add>, %82, %cst_34 [0] : vector<16x16xf32> to vector<16xf32>
    %84 = vector.shape_cast %83 : vector<16xf32> to vector<1x16xf32>
    %85 = vector.extract_strided_slice %19 {offsets = [0, 48], sizes = [1, 16], strides = [1, 1]} : vector<1x64xf32> to vector<1x16xf32>
    %86 = vector.extract_strided_slice %20 {offsets = [0, 48], sizes = [16, 16], strides = [1, 1]} : vector<16x64xf32> to vector<16x16xf32>
    %87 = vector.extract_strided_slice %21 {offsets = [0, 48], sizes = [16, 16], strides = [1, 1]} : vector<16x64xf32> to vector<16x16xf32>
    %88 = vector.broadcast %85 : vector<1x16xf32> to vector<16x16xf32>
    %89 = arith.mulf %88, %86 : vector<16x16xf32>
    %cst_35 = arith.constant dense<0.000000e+00> : vector<16xf32>
    %90 = vector.multi_reduction <add>, %89, %cst_35 [1] : vector<16x16xf32> to vector<16xf32>
    %91 = vector.shape_cast %90 : vector<16xf32> to vector<16x1xf32>
    %cst_36 = arith.constant dense<0xFF800000> : vector<1xf32>
    %92 = vector.multi_reduction <maximumf>, %91, %cst_36 [0] : vector<16x1xf32> to vector<1xf32>
    %93 = vector.shape_cast %92 : vector<1xf32> to vector<1x1xf32>
    %94 = vector.broadcast %93 : vector<1x1xf32> to vector<16x1xf32>
    %95 = arith.subf %91, %94 : vector<16x1xf32>
    %96 = math.exp %95 : vector<16x1xf32>
    %cst_37 = arith.constant dense<0.000000e+00> : vector<1xf32>
    %97 = vector.multi_reduction <add>, %96, %cst_37 [0] : vector<16x1xf32> to vector<1xf32>
    %98 = vector.shape_cast %97 : vector<1xf32> to vector<1x1xf32>
    %99 = tpu.reciprocal %98 {approx = true} : vector<1x1xf32> -> vector<1x1xf32>
    %100 = vector.broadcast %99 : vector<1x1xf32> to vector<16x1xf32>
    %101 = arith.mulf %96, %100 : vector<16x1xf32>
    %102 = vector.broadcast %101 : vector<16x1xf32> to vector<16x16xf32>
    %103 = arith.mulf %102, %87 : vector<16x16xf32>
    %cst_38 = arith.constant dense<0.000000e+00> : vector<16xf32>
    %104 = vector.multi_reduction <add>, %103, %cst_38 [0] : vector<16x16xf32> to vector<16xf32>
    %105 = vector.shape_cast %104 : vector<16xf32> to vector<1x16xf32>
    %106 = tpu.concatenate %42, %63, %84, %105 in 1 : vector<1x16xf32>, vector<1x16xf32>, vector<1x16xf32>, vector<1x16xf32> -> vector<1x64xf32>
    %107 = vector.extract_strided_slice %13 {offsets = [31, 0], sizes = [1, 64], strides = [1, 1]} : vector<32x64xf32> to vector<1x64xf32>
    %cst_39 = arith.constant dense<0.000000e+00> : vector<1x64xf32>
    %108 = tpu.matmul %107, %3, %cst_39 {dimension_numbers = #tpu.dot_dimension_numbers<[1], [0], [0], [1], [0, 0, 1, 1], [], []>} : vector<1x64xf32>, vector<64x64xf32>, vector<1x64xf32> -> vector<1x64xf32>
    %109 = arith.addf %108, %4 : vector<1x64xf32>
    %110 = vector.extract_strided_slice %16 {offsets = [16, 0], sizes = [16, 64], strides = [1, 1]} : vector<32x128xf32> to vector<16x64xf32>
    %111 = vector.extract_strided_slice %16 {offsets = [16, 64], sizes = [16, 64], strides = [1, 1]} : vector<32x128xf32> to vector<16x64xf32>
    %112 = vector.extract_strided_slice %109 {offsets = [0, 0], sizes = [1, 16], strides = [1, 1]} : vector<1x64xf32> to vector<1x16xf32>
    %113 = vector.extract_strided_slice %110 {offsets = [0, 0], sizes = [16, 16], strides = [1, 1]} : vector<16x64xf32> to vector<16x16xf32>
    %114 = vector.extract_strided_slice %111 {offsets = [0, 0], sizes = [16, 16], strides = [1, 1]} : vector<16x64xf32> to vector<16x16xf32>
    %115 = vector.broadcast %112 : vector<1x16xf32> to vector<16x16xf32>
    %116 = arith.mulf %115, %113 : vector<16x16xf32>
    %cst_40 = arith.constant dense<0.000000e+00> : vector<16xf32>
    %117 = vector.multi_reduction <add>, %116, %cst_40 [1] : vector<16x16xf32> to vector<16xf32>
    %118 = vector.shape_cast %117 : vector<16xf32> to vector<16x1xf32>
    %cst_41 = arith.constant dense<0xFF800000> : vector<1xf32>
    %119 = vector.multi_reduction <maximumf>, %118, %cst_41 [0] : vector<16x1xf32> to vector<1xf32>
    %120 = vector.shape_cast %119 : vector<1xf32> to vector<1x1xf32>
    %121 = vector.broadcast %120 : vector<1x1xf32> to vector<16x1xf32>
    %122 = arith.subf %118, %121 : vector<16x1xf32>
    %123 = math.exp %122 : vector<16x1xf32>
    %cst_42 = arith.constant dense<0.000000e+00> : vector<1xf32>
    %124 = vector.multi_reduction <add>, %123, %cst_42 [0] : vector<16x1xf32> to vector<1xf32>
    %125 = vector.shape_cast %124 : vector<1xf32> to vector<1x1xf32>
    %126 = tpu.reciprocal %125 {approx = true} : vector<1x1xf32> -> vector<1x1xf32>
    %127 = vector.broadcast %126 : vector<1x1xf32> to vector<16x1xf32>
    %128 = arith.mulf %123, %127 : vector<16x1xf32>
    %129 = vector.broadcast %128 : vector<16x1xf32> to vector<16x16xf32>
    %130 = arith.mulf %129, %114 : vector<16x16xf32>
    %cst_43 = arith.constant dense<0.000000e+00> : vector<16xf32>
    %131 = vector.multi_reduction <add>, %130, %cst_43 [0] : vector<16x16xf32> to vector<16xf32>
    %132 = vector.shape_cast %131 : vector<16xf32> to vector<1x16xf32>
    %133 = vector.extract_strided_slice %109 {offsets = [0, 16], sizes = [1, 16], strides = [1, 1]} : vector<1x64xf32> to vector<1x16xf32>
    %134 = vector.extract_strided_slice %110 {offsets = [0, 16], sizes = [16, 16], strides = [1, 1]} : vector<16x64xf32> to vector<16x16xf32>
    %135 = vector.extract_strided_slice %111 {offsets = [0, 16], sizes = [16, 16], strides = [1, 1]} : vector<16x64xf32> to vector<16x16xf32>
    %136 = vector.broadcast %133 : vector<1x16xf32> to vector<16x16xf32>
    %137 = arith.mulf %136, %134 : vector<16x16xf32>
    %cst_44 = arith.constant dense<0.000000e+00> : vector<16xf32>
    %138 = vector.multi_reduction <add>, %137, %cst_44 [1] : vector<16x16xf32> to vector<16xf32>
    %139 = vector.shape_cast %138 : vector<16xf32> to vector<16x1xf32>
    %cst_45 = arith.constant dense<0xFF800000> : vector<1xf32>
    %140 = vector.multi_reduction <maximumf>, %139, %cst_45 [0] : vector<16x1xf32> to vector<1xf32>
    %141 = vector.shape_cast %140 : vector<1xf32> to vector<1x1xf32>
    %142 = vector.broadcast %141 : vector<1x1xf32> to vector<16x1xf32>
    %143 = arith.subf %139, %142 : vector<16x1xf32>
    %144 = math.exp %143 : vector<16x1xf32>
    %cst_46 = arith.constant dense<0.000000e+00> : vector<1xf32>
    %145 = vector.multi_reduction <add>, %144, %cst_46 [0] : vector<16x1xf32> to vector<1xf32>
    %146 = vector.shape_cast %145 : vector<1xf32> to vector<1x1xf32>
    %147 = tpu.reciprocal %146 {approx = true} : vector<1x1xf32> -> vector<1x1xf32>
    %148 = vector.broadcast %147 : vector<1x1xf32> to vector<16x1xf32>
    %149 = arith.mulf %144, %148 : vector<16x1xf32>
    %150 = vector.broadcast %149 : vector<16x1xf32> to vector<16x16xf32>
    %151 = arith.mulf %150, %135 : vector<16x16xf32>
    %cst_47 = arith.constant dense<0.000000e+00> : vector<16xf32>
    %152 = vector.multi_reduction <add>, %151, %cst_47 [0] : vector<16x16xf32> to vector<16xf32>
    %153 = vector.shape_cast %152 : vector<16xf32> to vector<1x16xf32>
    %154 = vector.extract_strided_slice %109 {offsets = [0, 32], sizes = [1, 16], strides = [1, 1]} : vector<1x64xf32> to vector<1x16xf32>
    %155 = vector.extract_strided_slice %110 {offsets = [0, 32], sizes = [16, 16], strides = [1, 1]} : vector<16x64xf32> to vector<16x16xf32>
    %156 = vector.extract_strided_slice %111 {offsets = [0, 32], sizes = [16, 16], strides = [1, 1]} : vector<16x64xf32> to vector<16x16xf32>
    %157 = vector.broadcast %154 : vector<1x16xf32> to vector<16x16xf32>
    %158 = arith.mulf %157, %155 : vector<16x16xf32>
    %cst_48 = arith.constant dense<0.000000e+00> : vector<16xf32>
    %159 = vector.multi_reduction <add>, %158, %cst_48 [1] : vector<16x16xf32> to vector<16xf32>
    %160 = vector.shape_cast %159 : vector<16xf32> to vector<16x1xf32>
    %cst_49 = arith.constant dense<0xFF800000> : vector<1xf32>
    %161 = vector.multi_reduction <maximumf>, %160, %cst_49 [0] : vector<16x1xf32> to vector<1xf32>
    %162 = vector.shape_cast %161 : vector<1xf32> to vector<1x1xf32>
    %163 = vector.broadcast %162 : vector<1x1xf32> to vector<16x1xf32>
    %164 = arith.subf %160, %163 : vector<16x1xf32>
    %165 = math.exp %164 : vector<16x1xf32>
    %cst_50 = arith.constant dense<0.000000e+00> : vector<1xf32>
    %166 = vector.multi_reduction <add>, %165, %cst_50 [0] : vector<16x1xf32> to vector<1xf32>
    %167 = vector.shape_cast %166 : vector<1xf32> to vector<1x1xf32>
    %168 = tpu.reciprocal %167 {approx = true} : vector<1x1xf32> -> vector<1x1xf32>
    %169 = vector.broadcast %168 : vector<1x1xf32> to vector<16x1xf32>
    %170 = arith.mulf %165, %169 : vector<16x1xf32>
    %171 = vector.broadcast %170 : vector<16x1xf32> to vector<16x16xf32>
    %172 = arith.mulf %171, %156 : vector<16x16xf32>
    %cst_51 = arith.constant dense<0.000000e+00> : vector<16xf32>
    %173 = vector.multi_reduction <add>, %172, %cst_51 [0] : vector<16x16xf32> to vector<16xf32>
    %174 = vector.shape_cast %173 : vector<16xf32> to vector<1x16xf32>
    %175 = vector.extract_strided_slice %109 {offsets = [0, 48], sizes = [1, 16], strides = [1, 1]} : vector<1x64xf32> to vector<1x16xf32>
    %176 = vector.extract_strided_slice %110 {offsets = [0, 48], sizes = [16, 16], strides = [1, 1]} : vector<16x64xf32> to vector<16x16xf32>
    %177 = vector.extract_strided_slice %111 {offsets = [0, 48], sizes = [16, 16], strides = [1, 1]} : vector<16x64xf32> to vector<16x16xf32>
    %178 = vector.broadcast %175 : vector<1x16xf32> to vector<16x16xf32>
    %179 = arith.mulf %178, %176 : vector<16x16xf32>
    %cst_52 = arith.constant dense<0.000000e+00> : vector<16xf32>
    %180 = vector.multi_reduction <add>, %179, %cst_52 [1] : vector<16x16xf32> to vector<16xf32>
    %181 = vector.shape_cast %180 : vector<16xf32> to vector<16x1xf32>
    %cst_53 = arith.constant dense<0xFF800000> : vector<1xf32>
    %182 = vector.multi_reduction <maximumf>, %181, %cst_53 [0] : vector<16x1xf32> to vector<1xf32>
    %183 = vector.shape_cast %182 : vector<1xf32> to vector<1x1xf32>
    %184 = vector.broadcast %183 : vector<1x1xf32> to vector<16x1xf32>
    %185 = arith.subf %181, %184 : vector<16x1xf32>
    %186 = math.exp %185 : vector<16x1xf32>
    %cst_54 = arith.constant dense<0.000000e+00> : vector<1xf32>
    %187 = vector.multi_reduction <add>, %186, %cst_54 [0] : vector<16x1xf32> to vector<1xf32>
    %188 = vector.shape_cast %187 : vector<1xf32> to vector<1x1xf32>
    %189 = tpu.reciprocal %188 {approx = true} : vector<1x1xf32> -> vector<1x1xf32>
    %190 = vector.broadcast %189 : vector<1x1xf32> to vector<16x1xf32>
    %191 = arith.mulf %186, %190 : vector<16x1xf32>
    %192 = vector.broadcast %191 : vector<16x1xf32> to vector<16x16xf32>
    %193 = arith.mulf %192, %177 : vector<16x16xf32>
    %cst_55 = arith.constant dense<0.000000e+00> : vector<16xf32>
    %194 = vector.multi_reduction <add>, %193, %cst_55 [0] : vector<16x16xf32> to vector<16xf32>
    %195 = vector.shape_cast %194 : vector<16xf32> to vector<1x16xf32>
    %196 = tpu.concatenate %132, %153, %174, %195 in 1 : vector<1x16xf32>, vector<1x16xf32>, vector<1x16xf32>, vector<1x16xf32> -> vector<1x64xf32>
    %197 = tpu.concatenate %106, %196 in 0 : vector<1x64xf32>, vector<1x64xf32> -> vector<2x64xf32>
    %cst_56 = arith.constant dense<0.000000e+00> : vector<2x64xf32>
    %198 = tpu.matmul %197, %7, %cst_56 {dimension_numbers = #tpu.dot_dimension_numbers<[1], [0], [0], [1], [0, 0, 1, 1], [], []>} : vector<2x64xf32>, vector<64x64xf32>, vector<2x64xf32> -> vector<2x64xf32>
    %199 = vector.broadcast %8 : vector<1x64xf32> to vector<2x64xf32>
    %200 = arith.addf %198, %199 : vector<2x64xf32>
    %cst_57 = arith.constant dense<0.000000e+00> : vector<2x64xf32>
    %201 = tpu.matmul %200, %9, %cst_57 {dimension_numbers = #tpu.dot_dimension_numbers<[1], [0], [0], [1], [0, 0, 1, 1], [], []>} : vector<2x64xf32>, vector<64x64xf32>, vector<2x64xf32> -> vector<2x64xf32>
    %202 = vector.broadcast %10 : vector<1x64xf32> to vector<2x64xf32>
    %203 = arith.addf %201, %202 : vector<2x64xf32>
    %c0_58 = arith.constant 0 : index
    %c0_59 = arith.constant 0 : index
    %204 = vector.load %arg2[%c0_58, %c0_59] : memref<32x30xf32, #tpu.memory_space<vmem>>, vector<32x30xf32>
    %c0_60 = arith.constant 0 : index
    %c0_61 = arith.constant 0 : index
    %205 = vector.load %arg14[%c0_60, %c0_61] : memref<30x64xf32, #tpu.memory_space<vmem>>, vector<30x64xf32>
    %c0_62 = arith.constant 0 : index
    %c0_63 = arith.constant 0 : index
    %206 = vector.load %arg15[%c0_62, %c0_63] : memref<1x64xf32, #tpu.memory_space<vmem>>, vector<1x64xf32>
    %c0_64 = arith.constant 0 : index
    %c0_65 = arith.constant 0 : index
    %207 = vector.load %arg16[%c0_64, %c0_65] : memref<64x64xf32, #tpu.memory_space<vmem>>, vector<64x64xf32>
    %c0_66 = arith.constant 0 : index
    %c0_67 = arith.constant 0 : index
    %208 = vector.load %arg17[%c0_66, %c0_67] : memref<1x64xf32, #tpu.memory_space<vmem>>, vector<1x64xf32>
    %c0_68 = arith.constant 0 : index
    %c0_69 = arith.constant 0 : index
    %209 = vector.load %arg18[%c0_68, %c0_69] : memref<64x128xf32, #tpu.memory_space<vmem>>, vector<64x128xf32>
    %c0_70 = arith.constant 0 : index
    %c0_71 = arith.constant 0 : index
    %210 = vector.load %arg19[%c0_70, %c0_71] : memref<1x128xf32, #tpu.memory_space<vmem>>, vector<1x128xf32>
    %c0_72 = arith.constant 0 : index
    %c0_73 = arith.constant 0 : index
    %211 = vector.load %arg20[%c0_72, %c0_73] : memref<64x64xf32, #tpu.memory_space<vmem>>, vector<64x64xf32>
    %c0_74 = arith.constant 0 : index
    %c0_75 = arith.constant 0 : index
    %212 = vector.load %arg21[%c0_74, %c0_75] : memref<1x64xf32, #tpu.memory_space<vmem>>, vector<1x64xf32>
    %c0_76 = arith.constant 0 : index
    %c0_77 = arith.constant 0 : index
    %213 = vector.load %arg22[%c0_76, %c0_77] : memref<64x64xf32, #tpu.memory_space<vmem>>, vector<64x64xf32>
    %c0_78 = arith.constant 0 : index
    %c0_79 = arith.constant 0 : index
    %214 = vector.load %arg23[%c0_78, %c0_79] : memref<1x64xf32, #tpu.memory_space<vmem>>, vector<1x64xf32>
    %cst_80 = arith.constant dense<0.000000e+00> : vector<32x64xf32>
    %215 = tpu.matmul %204, %205, %cst_80 {dimension_numbers = #tpu.dot_dimension_numbers<[1], [0], [0], [1], [0, 0, 1, 1], [], []>} : vector<32x30xf32>, vector<30x64xf32>, vector<32x64xf32> -> vector<32x64xf32>
    %216 = vector.broadcast %206 : vector<1x64xf32> to vector<32x64xf32>
    %217 = arith.addf %215, %216 : vector<32x64xf32>
    %cst_81 = arith.constant dense<0.000000e+00> : vector<32x128xf32>
    %218 = tpu.matmul %217, %209, %cst_81 {dimension_numbers = #tpu.dot_dimension_numbers<[1], [0], [0], [1], [0, 0, 1, 1], [], []>} : vector<32x64xf32>, vector<64x128xf32>, vector<32x128xf32> -> vector<32x128xf32>
    %219 = vector.broadcast %210 : vector<1x128xf32> to vector<32x128xf32>
    %220 = arith.addf %218, %219 : vector<32x128xf32>
    %221 = vector.extract_strided_slice %217 {offsets = [15, 0], sizes = [1, 64], strides = [1, 1]} : vector<32x64xf32> to vector<1x64xf32>
    %cst_82 = arith.constant dense<0.000000e+00> : vector<1x64xf32>
    %222 = tpu.matmul %221, %207, %cst_82 {dimension_numbers = #tpu.dot_dimension_numbers<[1], [0], [0], [1], [0, 0, 1, 1], [], []>} : vector<1x64xf32>, vector<64x64xf32>, vector<1x64xf32> -> vector<1x64xf32>
    %223 = arith.addf %222, %208 : vector<1x64xf32>
    %224 = vector.extract_strided_slice %220 {offsets = [0, 0], sizes = [16, 64], strides = [1, 1]} : vector<32x128xf32> to vector<16x64xf32>
    %225 = vector.extract_strided_slice %220 {offsets = [0, 64], sizes = [16, 64], strides = [1, 1]} : vector<32x128xf32> to vector<16x64xf32>
    %226 = vector.extract_strided_slice %223 {offsets = [0, 0], sizes = [1, 16], strides = [1, 1]} : vector<1x64xf32> to vector<1x16xf32>
    %227 = vector.extract_strided_slice %224 {offsets = [0, 0], sizes = [16, 16], strides = [1, 1]} : vector<16x64xf32> to vector<16x16xf32>
    %228 = vector.extract_strided_slice %225 {offsets = [0, 0], sizes = [16, 16], strides = [1, 1]} : vector<16x64xf32> to vector<16x16xf32>
    %229 = vector.broadcast %226 : vector<1x16xf32> to vector<16x16xf32>
    %230 = arith.mulf %229, %227 : vector<16x16xf32>
    %cst_83 = arith.constant dense<0.000000e+00> : vector<16xf32>
    %231 = vector.multi_reduction <add>, %230, %cst_83 [1] : vector<16x16xf32> to vector<16xf32>
    %232 = vector.shape_cast %231 : vector<16xf32> to vector<16x1xf32>
    %cst_84 = arith.constant dense<0xFF800000> : vector<1xf32>
    %233 = vector.multi_reduction <maximumf>, %232, %cst_84 [0] : vector<16x1xf32> to vector<1xf32>
    %234 = vector.shape_cast %233 : vector<1xf32> to vector<1x1xf32>
    %235 = vector.broadcast %234 : vector<1x1xf32> to vector<16x1xf32>
    %236 = arith.subf %232, %235 : vector<16x1xf32>
    %237 = math.exp %236 : vector<16x1xf32>
    %cst_85 = arith.constant dense<0.000000e+00> : vector<1xf32>
    %238 = vector.multi_reduction <add>, %237, %cst_85 [0] : vector<16x1xf32> to vector<1xf32>
    %239 = vector.shape_cast %238 : vector<1xf32> to vector<1x1xf32>
    %240 = tpu.reciprocal %239 {approx = true} : vector<1x1xf32> -> vector<1x1xf32>
    %241 = vector.broadcast %240 : vector<1x1xf32> to vector<16x1xf32>
    %242 = arith.mulf %237, %241 : vector<16x1xf32>
    %243 = vector.broadcast %242 : vector<16x1xf32> to vector<16x16xf32>
    %244 = arith.mulf %243, %228 : vector<16x16xf32>
    %cst_86 = arith.constant dense<0.000000e+00> : vector<16xf32>
    %245 = vector.multi_reduction <add>, %244, %cst_86 [0] : vector<16x16xf32> to vector<16xf32>
    %246 = vector.shape_cast %245 : vector<16xf32> to vector<1x16xf32>
    %247 = vector.extract_strided_slice %223 {offsets = [0, 16], sizes = [1, 16], strides = [1, 1]} : vector<1x64xf32> to vector<1x16xf32>
    %248 = vector.extract_strided_slice %224 {offsets = [0, 16], sizes = [16, 16], strides = [1, 1]} : vector<16x64xf32> to vector<16x16xf32>
    %249 = vector.extract_strided_slice %225 {offsets = [0, 16], sizes = [16, 16], strides = [1, 1]} : vector<16x64xf32> to vector<16x16xf32>
    %250 = vector.broadcast %247 : vector<1x16xf32> to vector<16x16xf32>
    %251 = arith.mulf %250, %248 : vector<16x16xf32>
    %cst_87 = arith.constant dense<0.000000e+00> : vector<16xf32>
    %252 = vector.multi_reduction <add>, %251, %cst_87 [1] : vector<16x16xf32> to vector<16xf32>
    %253 = vector.shape_cast %252 : vector<16xf32> to vector<16x1xf32>
    %cst_88 = arith.constant dense<0xFF800000> : vector<1xf32>
    %254 = vector.multi_reduction <maximumf>, %253, %cst_88 [0] : vector<16x1xf32> to vector<1xf32>
    %255 = vector.shape_cast %254 : vector<1xf32> to vector<1x1xf32>
    %256 = vector.broadcast %255 : vector<1x1xf32> to vector<16x1xf32>
    %257 = arith.subf %253, %256 : vector<16x1xf32>
    %258 = math.exp %257 : vector<16x1xf32>
    %cst_89 = arith.constant dense<0.000000e+00> : vector<1xf32>
    %259 = vector.multi_reduction <add>, %258, %cst_89 [0] : vector<16x1xf32> to vector<1xf32>
    %260 = vector.shape_cast %259 : vector<1xf32> to vector<1x1xf32>
    %261 = tpu.reciprocal %260 {approx = true} : vector<1x1xf32> -> vector<1x1xf32>
    %262 = vector.broadcast %261 : vector<1x1xf32> to vector<16x1xf32>
    %263 = arith.mulf %258, %262 : vector<16x1xf32>
    %264 = vector.broadcast %263 : vector<16x1xf32> to vector<16x16xf32>
    %265 = arith.mulf %264, %249 : vector<16x16xf32>
    %cst_90 = arith.constant dense<0.000000e+00> : vector<16xf32>
    %266 = vector.multi_reduction <add>, %265, %cst_90 [0] : vector<16x16xf32> to vector<16xf32>
    %267 = vector.shape_cast %266 : vector<16xf32> to vector<1x16xf32>
    %268 = vector.extract_strided_slice %223 {offsets = [0, 32], sizes = [1, 16], strides = [1, 1]} : vector<1x64xf32> to vector<1x16xf32>
    %269 = vector.extract_strided_slice %224 {offsets = [0, 32], sizes = [16, 16], strides = [1, 1]} : vector<16x64xf32> to vector<16x16xf32>
    %270 = vector.extract_strided_slice %225 {offsets = [0, 32], sizes = [16, 16], strides = [1, 1]} : vector<16x64xf32> to vector<16x16xf32>
    %271 = vector.broadcast %268 : vector<1x16xf32> to vector<16x16xf32>
    %272 = arith.mulf %271, %269 : vector<16x16xf32>
    %cst_91 = arith.constant dense<0.000000e+00> : vector<16xf32>
    %273 = vector.multi_reduction <add>, %272, %cst_91 [1] : vector<16x16xf32> to vector<16xf32>
    %274 = vector.shape_cast %273 : vector<16xf32> to vector<16x1xf32>
    %cst_92 = arith.constant dense<0xFF800000> : vector<1xf32>
    %275 = vector.multi_reduction <maximumf>, %274, %cst_92 [0] : vector<16x1xf32> to vector<1xf32>
    %276 = vector.shape_cast %275 : vector<1xf32> to vector<1x1xf32>
    %277 = vector.broadcast %276 : vector<1x1xf32> to vector<16x1xf32>
    %278 = arith.subf %274, %277 : vector<16x1xf32>
    %279 = math.exp %278 : vector<16x1xf32>
    %cst_93 = arith.constant dense<0.000000e+00> : vector<1xf32>
    %280 = vector.multi_reduction <add>, %279, %cst_93 [0] : vector<16x1xf32> to vector<1xf32>
    %281 = vector.shape_cast %280 : vector<1xf32> to vector<1x1xf32>
    %282 = tpu.reciprocal %281 {approx = true} : vector<1x1xf32> -> vector<1x1xf32>
    %283 = vector.broadcast %282 : vector<1x1xf32> to vector<16x1xf32>
    %284 = arith.mulf %279, %283 : vector<16x1xf32>
    %285 = vector.broadcast %284 : vector<16x1xf32> to vector<16x16xf32>
    %286 = arith.mulf %285, %270 : vector<16x16xf32>
    %cst_94 = arith.constant dense<0.000000e+00> : vector<16xf32>
    %287 = vector.multi_reduction <add>, %286, %cst_94 [0] : vector<16x16xf32> to vector<16xf32>
    %288 = vector.shape_cast %287 : vector<16xf32> to vector<1x16xf32>
    %289 = vector.extract_strided_slice %223 {offsets = [0, 48], sizes = [1, 16], strides = [1, 1]} : vector<1x64xf32> to vector<1x16xf32>
    %290 = vector.extract_strided_slice %224 {offsets = [0, 48], sizes = [16, 16], strides = [1, 1]} : vector<16x64xf32> to vector<16x16xf32>
    %291 = vector.extract_strided_slice %225 {offsets = [0, 48], sizes = [16, 16], strides = [1, 1]} : vector<16x64xf32> to vector<16x16xf32>
    %292 = vector.broadcast %289 : vector<1x16xf32> to vector<16x16xf32>
    %293 = arith.mulf %292, %290 : vector<16x16xf32>
    %cst_95 = arith.constant dense<0.000000e+00> : vector<16xf32>
    %294 = vector.multi_reduction <add>, %293, %cst_95 [1] : vector<16x16xf32> to vector<16xf32>
    %295 = vector.shape_cast %294 : vector<16xf32> to vector<16x1xf32>
    %cst_96 = arith.constant dense<0xFF800000> : vector<1xf32>
    %296 = vector.multi_reduction <maximumf>, %295, %cst_96 [0] : vector<16x1xf32> to vector<1xf32>
    %297 = vector.shape_cast %296 : vector<1xf32> to vector<1x1xf32>
    %298 = vector.broadcast %297 : vector<1x1xf32> to vector<16x1xf32>
    %299 = arith.subf %295, %298 : vector<16x1xf32>
    %300 = math.exp %299 : vector<16x1xf32>
    %cst_97 = arith.constant dense<0.000000e+00> : vector<1xf32>
    %301 = vector.multi_reduction <add>, %300, %cst_97 [0] : vector<16x1xf32> to vector<1xf32>
    %302 = vector.shape_cast %301 : vector<1xf32> to vector<1x1xf32>
    %303 = tpu.reciprocal %302 {approx = true} : vector<1x1xf32> -> vector<1x1xf32>
    %304 = vector.broadcast %303 : vector<1x1xf32> to vector<16x1xf32>
    %305 = arith.mulf %300, %304 : vector<16x1xf32>
    %306 = vector.broadcast %305 : vector<16x1xf32> to vector<16x16xf32>
    %307 = arith.mulf %306, %291 : vector<16x16xf32>
    %cst_98 = arith.constant dense<0.000000e+00> : vector<16xf32>
    %308 = vector.multi_reduction <add>, %307, %cst_98 [0] : vector<16x16xf32> to vector<16xf32>
    %309 = vector.shape_cast %308 : vector<16xf32> to vector<1x16xf32>
    %310 = tpu.concatenate %246, %267, %288, %309 in 1 : vector<1x16xf32>, vector<1x16xf32>, vector<1x16xf32>, vector<1x16xf32> -> vector<1x64xf32>
    %311 = vector.extract_strided_slice %217 {offsets = [31, 0], sizes = [1, 64], strides = [1, 1]} : vector<32x64xf32> to vector<1x64xf32>
    %cst_99 = arith.constant dense<0.000000e+00> : vector<1x64xf32>
    %312 = tpu.matmul %311, %207, %cst_99 {dimension_numbers = #tpu.dot_dimension_numbers<[1], [0], [0], [1], [0, 0, 1, 1], [], []>} : vector<1x64xf32>, vector<64x64xf32>, vector<1x64xf32> -> vector<1x64xf32>
    %313 = arith.addf %312, %208 : vector<1x64xf32>
    %314 = vector.extract_strided_slice %220 {offsets = [16, 0], sizes = [16, 64], strides = [1, 1]} : vector<32x128xf32> to vector<16x64xf32>
    %315 = vector.extract_strided_slice %220 {offsets = [16, 64], sizes = [16, 64], strides = [1, 1]} : vector<32x128xf32> to vector<16x64xf32>
    %316 = vector.extract_strided_slice %313 {offsets = [0, 0], sizes = [1, 16], strides = [1, 1]} : vector<1x64xf32> to vector<1x16xf32>
    %317 = vector.extract_strided_slice %314 {offsets = [0, 0], sizes = [16, 16], strides = [1, 1]} : vector<16x64xf32> to vector<16x16xf32>
    %318 = vector.extract_strided_slice %315 {offsets = [0, 0], sizes = [16, 16], strides = [1, 1]} : vector<16x64xf32> to vector<16x16xf32>
    %319 = vector.broadcast %316 : vector<1x16xf32> to vector<16x16xf32>
    %320 = arith.mulf %319, %317 : vector<16x16xf32>
    %cst_100 = arith.constant dense<0.000000e+00> : vector<16xf32>
    %321 = vector.multi_reduction <add>, %320, %cst_100 [1] : vector<16x16xf32> to vector<16xf32>
    %322 = vector.shape_cast %321 : vector<16xf32> to vector<16x1xf32>
    %cst_101 = arith.constant dense<0xFF800000> : vector<1xf32>
    %323 = vector.multi_reduction <maximumf>, %322, %cst_101 [0] : vector<16x1xf32> to vector<1xf32>
    %324 = vector.shape_cast %323 : vector<1xf32> to vector<1x1xf32>
    %325 = vector.broadcast %324 : vector<1x1xf32> to vector<16x1xf32>
    %326 = arith.subf %322, %325 : vector<16x1xf32>
    %327 = math.exp %326 : vector<16x1xf32>
    %cst_102 = arith.constant dense<0.000000e+00> : vector<1xf32>
    %328 = vector.multi_reduction <add>, %327, %cst_102 [0] : vector<16x1xf32> to vector<1xf32>
    %329 = vector.shape_cast %328 : vector<1xf32> to vector<1x1xf32>
    %330 = tpu.reciprocal %329 {approx = true} : vector<1x1xf32> -> vector<1x1xf32>
    %331 = vector.broadcast %330 : vector<1x1xf32> to vector<16x1xf32>
    %332 = arith.mulf %327, %331 : vector<16x1xf32>
    %333 = vector.broadcast %332 : vector<16x1xf32> to vector<16x16xf32>
    %334 = arith.mulf %333, %318 : vector<16x16xf32>
    %cst_103 = arith.constant dense<0.000000e+00> : vector<16xf32>
    %335 = vector.multi_reduction <add>, %334, %cst_103 [0] : vector<16x16xf32> to vector<16xf32>
    %336 = vector.shape_cast %335 : vector<16xf32> to vector<1x16xf32>
    %337 = vector.extract_strided_slice %313 {offsets = [0, 16], sizes = [1, 16], strides = [1, 1]} : vector<1x64xf32> to vector<1x16xf32>
    %338 = vector.extract_strided_slice %314 {offsets = [0, 16], sizes = [16, 16], strides = [1, 1]} : vector<16x64xf32> to vector<16x16xf32>
    %339 = vector.extract_strided_slice %315 {offsets = [0, 16], sizes = [16, 16], strides = [1, 1]} : vector<16x64xf32> to vector<16x16xf32>
    %340 = vector.broadcast %337 : vector<1x16xf32> to vector<16x16xf32>
    %341 = arith.mulf %340, %338 : vector<16x16xf32>
    %cst_104 = arith.constant dense<0.000000e+00> : vector<16xf32>
    %342 = vector.multi_reduction <add>, %341, %cst_104 [1] : vector<16x16xf32> to vector<16xf32>
    %343 = vector.shape_cast %342 : vector<16xf32> to vector<16x1xf32>
    %cst_105 = arith.constant dense<0xFF800000> : vector<1xf32>
    %344 = vector.multi_reduction <maximumf>, %343, %cst_105 [0] : vector<16x1xf32> to vector<1xf32>
    %345 = vector.shape_cast %344 : vector<1xf32> to vector<1x1xf32>
    %346 = vector.broadcast %345 : vector<1x1xf32> to vector<16x1xf32>
    %347 = arith.subf %343, %346 : vector<16x1xf32>
    %348 = math.exp %347 : vector<16x1xf32>
    %cst_106 = arith.constant dense<0.000000e+00> : vector<1xf32>
    %349 = vector.multi_reduction <add>, %348, %cst_106 [0] : vector<16x1xf32> to vector<1xf32>
    %350 = vector.shape_cast %349 : vector<1xf32> to vector<1x1xf32>
    %351 = tpu.reciprocal %350 {approx = true} : vector<1x1xf32> -> vector<1x1xf32>
    %352 = vector.broadcast %351 : vector<1x1xf32> to vector<16x1xf32>
    %353 = arith.mulf %348, %352 : vector<16x1xf32>
    %354 = vector.broadcast %353 : vector<16x1xf32> to vector<16x16xf32>
    %355 = arith.mulf %354, %339 : vector<16x16xf32>
    %cst_107 = arith.constant dense<0.000000e+00> : vector<16xf32>
    %356 = vector.multi_reduction <add>, %355, %cst_107 [0] : vector<16x16xf32> to vector<16xf32>
    %357 = vector.shape_cast %356 : vector<16xf32> to vector<1x16xf32>
    %358 = vector.extract_strided_slice %313 {offsets = [0, 32], sizes = [1, 16], strides = [1, 1]} : vector<1x64xf32> to vector<1x16xf32>
    %359 = vector.extract_strided_slice %314 {offsets = [0, 32], sizes = [16, 16], strides = [1, 1]} : vector<16x64xf32> to vector<16x16xf32>
    %360 = vector.extract_strided_slice %315 {offsets = [0, 32], sizes = [16, 16], strides = [1, 1]} : vector<16x64xf32> to vector<16x16xf32>
    %361 = vector.broadcast %358 : vector<1x16xf32> to vector<16x16xf32>
    %362 = arith.mulf %361, %359 : vector<16x16xf32>
    %cst_108 = arith.constant dense<0.000000e+00> : vector<16xf32>
    %363 = vector.multi_reduction <add>, %362, %cst_108 [1] : vector<16x16xf32> to vector<16xf32>
    %364 = vector.shape_cast %363 : vector<16xf32> to vector<16x1xf32>
    %cst_109 = arith.constant dense<0xFF800000> : vector<1xf32>
    %365 = vector.multi_reduction <maximumf>, %364, %cst_109 [0] : vector<16x1xf32> to vector<1xf32>
    %366 = vector.shape_cast %365 : vector<1xf32> to vector<1x1xf32>
    %367 = vector.broadcast %366 : vector<1x1xf32> to vector<16x1xf32>
    %368 = arith.subf %364, %367 : vector<16x1xf32>
    %369 = math.exp %368 : vector<16x1xf32>
    %cst_110 = arith.constant dense<0.000000e+00> : vector<1xf32>
    %370 = vector.multi_reduction <add>, %369, %cst_110 [0] : vector<16x1xf32> to vector<1xf32>
    %371 = vector.shape_cast %370 : vector<1xf32> to vector<1x1xf32>
    %372 = tpu.reciprocal %371 {approx = true} : vector<1x1xf32> -> vector<1x1xf32>
    %373 = vector.broadcast %372 : vector<1x1xf32> to vector<16x1xf32>
    %374 = arith.mulf %369, %373 : vector<16x1xf32>
    %375 = vector.broadcast %374 : vector<16x1xf32> to vector<16x16xf32>
    %376 = arith.mulf %375, %360 : vector<16x16xf32>
    %cst_111 = arith.constant dense<0.000000e+00> : vector<16xf32>
    %377 = vector.multi_reduction <add>, %376, %cst_111 [0] : vector<16x16xf32> to vector<16xf32>
    %378 = vector.shape_cast %377 : vector<16xf32> to vector<1x16xf32>
    %379 = vector.extract_strided_slice %313 {offsets = [0, 48], sizes = [1, 16], strides = [1, 1]} : vector<1x64xf32> to vector<1x16xf32>
    %380 = vector.extract_strided_slice %314 {offsets = [0, 48], sizes = [16, 16], strides = [1, 1]} : vector<16x64xf32> to vector<16x16xf32>
    %381 = vector.extract_strided_slice %315 {offsets = [0, 48], sizes = [16, 16], strides = [1, 1]} : vector<16x64xf32> to vector<16x16xf32>
    %382 = vector.broadcast %379 : vector<1x16xf32> to vector<16x16xf32>
    %383 = arith.mulf %382, %380 : vector<16x16xf32>
    %cst_112 = arith.constant dense<0.000000e+00> : vector<16xf32>
    %384 = vector.multi_reduction <add>, %383, %cst_112 [1] : vector<16x16xf32> to vector<16xf32>
    %385 = vector.shape_cast %384 : vector<16xf32> to vector<16x1xf32>
    %cst_113 = arith.constant dense<0xFF800000> : vector<1xf32>
    %386 = vector.multi_reduction <maximumf>, %385, %cst_113 [0] : vector<16x1xf32> to vector<1xf32>
    %387 = vector.shape_cast %386 : vector<1xf32> to vector<1x1xf32>
    %388 = vector.broadcast %387 : vector<1x1xf32> to vector<16x1xf32>
    %389 = arith.subf %385, %388 : vector<16x1xf32>
    %390 = math.exp %389 : vector<16x1xf32>
    %cst_114 = arith.constant dense<0.000000e+00> : vector<1xf32>
    %391 = vector.multi_reduction <add>, %390, %cst_114 [0] : vector<16x1xf32> to vector<1xf32>
    %392 = vector.shape_cast %391 : vector<1xf32> to vector<1x1xf32>
    %393 = tpu.reciprocal %392 {approx = true} : vector<1x1xf32> -> vector<1x1xf32>
    %394 = vector.broadcast %393 : vector<1x1xf32> to vector<16x1xf32>
    %395 = arith.mulf %390, %394 : vector<16x1xf32>
    %396 = vector.broadcast %395 : vector<16x1xf32> to vector<16x16xf32>
    %397 = arith.mulf %396, %381 : vector<16x16xf32>
    %cst_115 = arith.constant dense<0.000000e+00> : vector<16xf32>
    %398 = vector.multi_reduction <add>, %397, %cst_115 [0] : vector<16x16xf32> to vector<16xf32>
    %399 = vector.shape_cast %398 : vector<16xf32> to vector<1x16xf32>
    %400 = tpu.concatenate %336, %357, %378, %399 in 1 : vector<1x16xf32>, vector<1x16xf32>, vector<1x16xf32>, vector<1x16xf32> -> vector<1x64xf32>
    %401 = tpu.concatenate %310, %400 in 0 : vector<1x64xf32>, vector<1x64xf32> -> vector<2x64xf32>
    %cst_116 = arith.constant dense<0.000000e+00> : vector<2x64xf32>
    %402 = tpu.matmul %401, %211, %cst_116 {dimension_numbers = #tpu.dot_dimension_numbers<[1], [0], [0], [1], [0, 0, 1, 1], [], []>} : vector<2x64xf32>, vector<64x64xf32>, vector<2x64xf32> -> vector<2x64xf32>
    %403 = vector.broadcast %212 : vector<1x64xf32> to vector<2x64xf32>
    %404 = arith.addf %402, %403 : vector<2x64xf32>
    %cst_117 = arith.constant dense<0.000000e+00> : vector<2x64xf32>
    %405 = tpu.matmul %404, %213, %cst_117 {dimension_numbers = #tpu.dot_dimension_numbers<[1], [0], [0], [1], [0, 0, 1, 1], [], []>} : vector<2x64xf32>, vector<64x64xf32>, vector<2x64xf32> -> vector<2x64xf32>
    %406 = vector.broadcast %214 : vector<1x64xf32> to vector<2x64xf32>
    %407 = arith.addf %405, %406 : vector<2x64xf32>
    %408 = vector.extract_strided_slice %203 {offsets = [0, 0], sizes = [1, 64], strides = [1, 1]} : vector<2x64xf32> to vector<1x64xf32>
    %409 = vector.extract_strided_slice %407 {offsets = [0, 0], sizes = [1, 64], strides = [1, 1]} : vector<2x64xf32> to vector<1x64xf32>
    %410 = vector.extract_strided_slice %203 {offsets = [1, 0], sizes = [1, 64], strides = [1, 1]} : vector<2x64xf32> to vector<1x64xf32>
    %411 = vector.extract_strided_slice %407 {offsets = [1, 0], sizes = [1, 64], strides = [1, 1]} : vector<2x64xf32> to vector<1x64xf32>
    %412 = tpu.concatenate %408, %409, %410, %411 in 0 : vector<1x64xf32>, vector<1x64xf32>, vector<1x64xf32>, vector<1x64xf32> -> vector<4x64xf32>
    %c0_118 = arith.constant 0 : index
    %c0_119 = arith.constant 0 : index
    %413 = vector.load %arg24[%c0_118, %c0_119] : memref<64x192xf32, #tpu.memory_space<vmem>>, vector<64x192xf32>
    %cst_120 = arith.constant dense<0.000000e+00> : vector<4x192xf32>
    %414 = tpu.matmul %412, %413, %cst_120 {dimension_numbers = #tpu.dot_dimension_numbers<[1], [0], [0], [1], [0, 0, 1, 1], [], []>} : vector<4x64xf32>, vector<64x192xf32>, vector<4x192xf32> -> vector<4x192xf32>
    %c0_121 = arith.constant 0 : index
    %c0_122 = arith.constant 0 : index
    %415 = vector.load %arg25[%c0_121, %c0_122] : memref<1x192xf32, #tpu.memory_space<vmem>>, vector<1x192xf32>
    %416 = vector.broadcast %415 : vector<1x192xf32> to vector<4x192xf32>
    %417 = arith.addf %414, %416 : vector<4x192xf32>
    %418 = vector.extract_strided_slice %417 {offsets = [0, 0], sizes = [2, 192], strides = [1, 1]} : vector<4x192xf32> to vector<2x192xf32>
    %419 = vector.extract_strided_slice %418 {offsets = [0, 0], sizes = [2, 64], strides = [1, 1]} : vector<2x192xf32> to vector<2x64xf32>
    %420 = vector.extract_strided_slice %418 {offsets = [0, 64], sizes = [2, 64], strides = [1, 1]} : vector<2x192xf32> to vector<2x64xf32>
    %421 = vector.extract_strided_slice %418 {offsets = [0, 128], sizes = [2, 64], strides = [1, 1]} : vector<2x192xf32> to vector<2x64xf32>
    %422 = vector.extract_strided_slice %419 {offsets = [0, 0], sizes = [2, 16], strides = [1, 1]} : vector<2x64xf32> to vector<2x16xf32>
    %423 = vector.extract_strided_slice %420 {offsets = [0, 0], sizes = [2, 16], strides = [1, 1]} : vector<2x64xf32> to vector<2x16xf32>
    %424 = vector.extract_strided_slice %421 {offsets = [0, 0], sizes = [2, 16], strides = [1, 1]} : vector<2x64xf32> to vector<2x16xf32>
    %425 = vector.extract_strided_slice %423 {offsets = [0, 0], sizes = [1, 16], strides = [1, 1]} : vector<2x16xf32> to vector<1x16xf32>
    %426 = vector.broadcast %425 : vector<1x16xf32> to vector<2x16xf32>
    %427 = arith.mulf %422, %426 : vector<2x16xf32>
    %cst_123 = arith.constant dense<0.000000e+00> : vector<2xf32>
    %428 = vector.multi_reduction <add>, %427, %cst_123 [1] : vector<2x16xf32> to vector<2xf32>
    %429 = vector.shape_cast %428 : vector<2xf32> to vector<2x1xf32>
    %430 = vector.extract_strided_slice %423 {offsets = [1, 0], sizes = [1, 16], strides = [1, 1]} : vector<2x16xf32> to vector<1x16xf32>
    %431 = vector.broadcast %430 : vector<1x16xf32> to vector<2x16xf32>
    %432 = arith.mulf %422, %431 : vector<2x16xf32>
    %cst_124 = arith.constant dense<0.000000e+00> : vector<2xf32>
    %433 = vector.multi_reduction <add>, %432, %cst_124 [1] : vector<2x16xf32> to vector<2xf32>
    %434 = vector.shape_cast %433 : vector<2xf32> to vector<2x1xf32>
    %435 = tpu.concatenate %429, %434 in 1 : vector<2x1xf32>, vector<2x1xf32> -> vector<2x2xf32>
    %cst_125 = arith.constant dense<0xFF800000> : vector<2xf32>
    %436 = vector.multi_reduction <maximumf>, %435, %cst_125 [1] : vector<2x2xf32> to vector<2xf32>
    %437 = vector.shape_cast %436 : vector<2xf32> to vector<2x1xf32>
    %438 = vector.broadcast %437 : vector<2x1xf32> to vector<2x2xf32>
    %439 = arith.subf %435, %438 : vector<2x2xf32>
    %440 = math.exp %439 : vector<2x2xf32>
    %cst_126 = arith.constant dense<0.000000e+00> : vector<2xf32>
    %441 = vector.multi_reduction <add>, %440, %cst_126 [1] : vector<2x2xf32> to vector<2xf32>
    %442 = vector.shape_cast %441 : vector<2xf32> to vector<2x1xf32>
    %443 = tpu.reciprocal %442 {approx = true} : vector<2x1xf32> -> vector<2x1xf32>
    %444 = vector.broadcast %443 : vector<2x1xf32> to vector<2x2xf32>
    %445 = arith.mulf %440, %444 : vector<2x2xf32>
    %446 = vector.extract_strided_slice %445 {offsets = [0, 0], sizes = [2, 1], strides = [1, 1]} : vector<2x2xf32> to vector<2x1xf32>
    %447 = vector.extract_strided_slice %424 {offsets = [0, 0], sizes = [1, 16], strides = [1, 1]} : vector<2x16xf32> to vector<1x16xf32>
    %448 = vector.broadcast %446 : vector<2x1xf32> to vector<2x16xf32>
    %449 = vector.broadcast %447 : vector<1x16xf32> to vector<2x16xf32>
    %450 = arith.mulf %448, %449 : vector<2x16xf32>
    %451 = vector.extract_strided_slice %445 {offsets = [0, 1], sizes = [2, 1], strides = [1, 1]} : vector<2x2xf32> to vector<2x1xf32>
    %452 = vector.extract_strided_slice %424 {offsets = [1, 0], sizes = [1, 16], strides = [1, 1]} : vector<2x16xf32> to vector<1x16xf32>
    %453 = vector.broadcast %451 : vector<2x1xf32> to vector<2x16xf32>
    %454 = vector.broadcast %452 : vector<1x16xf32> to vector<2x16xf32>
    %455 = arith.mulf %453, %454 : vector<2x16xf32>
    %456 = arith.addf %450, %455 : vector<2x16xf32>
    %457 = vector.extract_strided_slice %456 {offsets = [0, 0], sizes = [1, 16], strides = [1, 1]} : vector<2x16xf32> to vector<1x16xf32>
    %458 = vector.extract_strided_slice %456 {offsets = [1, 0], sizes = [1, 16], strides = [1, 1]} : vector<2x16xf32> to vector<1x16xf32>
    %459 = arith.addf %457, %458 : vector<1x16xf32>
    %cst_127 = arith.constant 5.000000e-01 : f32
    %460 = vector.broadcast %cst_127 : f32 to vector<1x16xf32>
    %461 = arith.mulf %460, %459 : vector<1x16xf32>
    %462 = vector.extract_strided_slice %419 {offsets = [0, 16], sizes = [2, 16], strides = [1, 1]} : vector<2x64xf32> to vector<2x16xf32>
    %463 = vector.extract_strided_slice %420 {offsets = [0, 16], sizes = [2, 16], strides = [1, 1]} : vector<2x64xf32> to vector<2x16xf32>
    %464 = vector.extract_strided_slice %421 {offsets = [0, 16], sizes = [2, 16], strides = [1, 1]} : vector<2x64xf32> to vector<2x16xf32>
    %465 = vector.extract_strided_slice %463 {offsets = [0, 0], sizes = [1, 16], strides = [1, 1]} : vector<2x16xf32> to vector<1x16xf32>
    %466 = vector.broadcast %465 : vector<1x16xf32> to vector<2x16xf32>
    %467 = arith.mulf %462, %466 : vector<2x16xf32>
    %cst_128 = arith.constant dense<0.000000e+00> : vector<2xf32>
    %468 = vector.multi_reduction <add>, %467, %cst_128 [1] : vector<2x16xf32> to vector<2xf32>
    %469 = vector.shape_cast %468 : vector<2xf32> to vector<2x1xf32>
    %470 = vector.extract_strided_slice %463 {offsets = [1, 0], sizes = [1, 16], strides = [1, 1]} : vector<2x16xf32> to vector<1x16xf32>
    %471 = vector.broadcast %470 : vector<1x16xf32> to vector<2x16xf32>
    %472 = arith.mulf %462, %471 : vector<2x16xf32>
    %cst_129 = arith.constant dense<0.000000e+00> : vector<2xf32>
    %473 = vector.multi_reduction <add>, %472, %cst_129 [1] : vector<2x16xf32> to vector<2xf32>
    %474 = vector.shape_cast %473 : vector<2xf32> to vector<2x1xf32>
    %475 = tpu.concatenate %469, %474 in 1 : vector<2x1xf32>, vector<2x1xf32> -> vector<2x2xf32>
    %cst_130 = arith.constant dense<0xFF800000> : vector<2xf32>
    %476 = vector.multi_reduction <maximumf>, %475, %cst_130 [1] : vector<2x2xf32> to vector<2xf32>
    %477 = vector.shape_cast %476 : vector<2xf32> to vector<2x1xf32>
    %478 = vector.broadcast %477 : vector<2x1xf32> to vector<2x2xf32>
    %479 = arith.subf %475, %478 : vector<2x2xf32>
    %480 = math.exp %479 : vector<2x2xf32>
    %cst_131 = arith.constant dense<0.000000e+00> : vector<2xf32>
    %481 = vector.multi_reduction <add>, %480, %cst_131 [1] : vector<2x2xf32> to vector<2xf32>
    %482 = vector.shape_cast %481 : vector<2xf32> to vector<2x1xf32>
    %483 = tpu.reciprocal %482 {approx = true} : vector<2x1xf32> -> vector<2x1xf32>
    %484 = vector.broadcast %483 : vector<2x1xf32> to vector<2x2xf32>
    %485 = arith.mulf %480, %484 : vector<2x2xf32>
    %486 = vector.extract_strided_slice %485 {offsets = [0, 0], sizes = [2, 1], strides = [1, 1]} : vector<2x2xf32> to vector<2x1xf32>
    %487 = vector.extract_strided_slice %464 {offsets = [0, 0], sizes = [1, 16], strides = [1, 1]} : vector<2x16xf32> to vector<1x16xf32>
    %488 = vector.broadcast %486 : vector<2x1xf32> to vector<2x16xf32>
    %489 = vector.broadcast %487 : vector<1x16xf32> to vector<2x16xf32>
    %490 = arith.mulf %488, %489 : vector<2x16xf32>
    %491 = vector.extract_strided_slice %485 {offsets = [0, 1], sizes = [2, 1], strides = [1, 1]} : vector<2x2xf32> to vector<2x1xf32>
    %492 = vector.extract_strided_slice %464 {offsets = [1, 0], sizes = [1, 16], strides = [1, 1]} : vector<2x16xf32> to vector<1x16xf32>
    %493 = vector.broadcast %491 : vector<2x1xf32> to vector<2x16xf32>
    %494 = vector.broadcast %492 : vector<1x16xf32> to vector<2x16xf32>
    %495 = arith.mulf %493, %494 : vector<2x16xf32>
    %496 = arith.addf %490, %495 : vector<2x16xf32>
    %497 = vector.extract_strided_slice %496 {offsets = [0, 0], sizes = [1, 16], strides = [1, 1]} : vector<2x16xf32> to vector<1x16xf32>
    %498 = vector.extract_strided_slice %496 {offsets = [1, 0], sizes = [1, 16], strides = [1, 1]} : vector<2x16xf32> to vector<1x16xf32>
    %499 = arith.addf %497, %498 : vector<1x16xf32>
    %cst_132 = arith.constant 5.000000e-01 : f32
    %500 = vector.broadcast %cst_132 : f32 to vector<1x16xf32>
    %501 = arith.mulf %500, %499 : vector<1x16xf32>
    %502 = vector.extract_strided_slice %419 {offsets = [0, 32], sizes = [2, 16], strides = [1, 1]} : vector<2x64xf32> to vector<2x16xf32>
    %503 = vector.extract_strided_slice %420 {offsets = [0, 32], sizes = [2, 16], strides = [1, 1]} : vector<2x64xf32> to vector<2x16xf32>
    %504 = vector.extract_strided_slice %421 {offsets = [0, 32], sizes = [2, 16], strides = [1, 1]} : vector<2x64xf32> to vector<2x16xf32>
    %505 = vector.extract_strided_slice %503 {offsets = [0, 0], sizes = [1, 16], strides = [1, 1]} : vector<2x16xf32> to vector<1x16xf32>
    %506 = vector.broadcast %505 : vector<1x16xf32> to vector<2x16xf32>
    %507 = arith.mulf %502, %506 : vector<2x16xf32>
    %cst_133 = arith.constant dense<0.000000e+00> : vector<2xf32>
    %508 = vector.multi_reduction <add>, %507, %cst_133 [1] : vector<2x16xf32> to vector<2xf32>
    %509 = vector.shape_cast %508 : vector<2xf32> to vector<2x1xf32>
    %510 = vector.extract_strided_slice %503 {offsets = [1, 0], sizes = [1, 16], strides = [1, 1]} : vector<2x16xf32> to vector<1x16xf32>
    %511 = vector.broadcast %510 : vector<1x16xf32> to vector<2x16xf32>
    %512 = arith.mulf %502, %511 : vector<2x16xf32>
    %cst_134 = arith.constant dense<0.000000e+00> : vector<2xf32>
    %513 = vector.multi_reduction <add>, %512, %cst_134 [1] : vector<2x16xf32> to vector<2xf32>
    %514 = vector.shape_cast %513 : vector<2xf32> to vector<2x1xf32>
    %515 = tpu.concatenate %509, %514 in 1 : vector<2x1xf32>, vector<2x1xf32> -> vector<2x2xf32>
    %cst_135 = arith.constant dense<0xFF800000> : vector<2xf32>
    %516 = vector.multi_reduction <maximumf>, %515, %cst_135 [1] : vector<2x2xf32> to vector<2xf32>
    %517 = vector.shape_cast %516 : vector<2xf32> to vector<2x1xf32>
    %518 = vector.broadcast %517 : vector<2x1xf32> to vector<2x2xf32>
    %519 = arith.subf %515, %518 : vector<2x2xf32>
    %520 = math.exp %519 : vector<2x2xf32>
    %cst_136 = arith.constant dense<0.000000e+00> : vector<2xf32>
    %521 = vector.multi_reduction <add>, %520, %cst_136 [1] : vector<2x2xf32> to vector<2xf32>
    %522 = vector.shape_cast %521 : vector<2xf32> to vector<2x1xf32>
    %523 = tpu.reciprocal %522 {approx = true} : vector<2x1xf32> -> vector<2x1xf32>
    %524 = vector.broadcast %523 : vector<2x1xf32> to vector<2x2xf32>
    %525 = arith.mulf %520, %524 : vector<2x2xf32>
    %526 = vector.extract_strided_slice %525 {offsets = [0, 0], sizes = [2, 1], strides = [1, 1]} : vector<2x2xf32> to vector<2x1xf32>
    %527 = vector.extract_strided_slice %504 {offsets = [0, 0], sizes = [1, 16], strides = [1, 1]} : vector<2x16xf32> to vector<1x16xf32>
    %528 = vector.broadcast %526 : vector<2x1xf32> to vector<2x16xf32>
    %529 = vector.broadcast %527 : vector<1x16xf32> to vector<2x16xf32>
    %530 = arith.mulf %528, %529 : vector<2x16xf32>
    %531 = vector.extract_strided_slice %525 {offsets = [0, 1], sizes = [2, 1], strides = [1, 1]} : vector<2x2xf32> to vector<2x1xf32>
    %532 = vector.extract_strided_slice %504 {offsets = [1, 0], sizes = [1, 16], strides = [1, 1]} : vector<2x16xf32> to vector<1x16xf32>
    %533 = vector.broadcast %531 : vector<2x1xf32> to vector<2x16xf32>
    %534 = vector.broadcast %532 : vector<1x16xf32> to vector<2x16xf32>
    %535 = arith.mulf %533, %534 : vector<2x16xf32>
    %536 = arith.addf %530, %535 : vector<2x16xf32>
    %537 = vector.extract_strided_slice %536 {offsets = [0, 0], sizes = [1, 16], strides = [1, 1]} : vector<2x16xf32> to vector<1x16xf32>
    %538 = vector.extract_strided_slice %536 {offsets = [1, 0], sizes = [1, 16], strides = [1, 1]} : vector<2x16xf32> to vector<1x16xf32>
    %539 = arith.addf %537, %538 : vector<1x16xf32>
    %cst_137 = arith.constant 5.000000e-01 : f32
    %540 = vector.broadcast %cst_137 : f32 to vector<1x16xf32>
    %541 = arith.mulf %540, %539 : vector<1x16xf32>
    %542 = vector.extract_strided_slice %419 {offsets = [0, 48], sizes = [2, 16], strides = [1, 1]} : vector<2x64xf32> to vector<2x16xf32>
    %543 = vector.extract_strided_slice %420 {offsets = [0, 48], sizes = [2, 16], strides = [1, 1]} : vector<2x64xf32> to vector<2x16xf32>
    %544 = vector.extract_strided_slice %421 {offsets = [0, 48], sizes = [2, 16], strides = [1, 1]} : vector<2x64xf32> to vector<2x16xf32>
    %545 = vector.extract_strided_slice %543 {offsets = [0, 0], sizes = [1, 16], strides = [1, 1]} : vector<2x16xf32> to vector<1x16xf32>
    %546 = vector.broadcast %545 : vector<1x16xf32> to vector<2x16xf32>
    %547 = arith.mulf %542, %546 : vector<2x16xf32>
    %cst_138 = arith.constant dense<0.000000e+00> : vector<2xf32>
    %548 = vector.multi_reduction <add>, %547, %cst_138 [1] : vector<2x16xf32> to vector<2xf32>
    %549 = vector.shape_cast %548 : vector<2xf32> to vector<2x1xf32>
    %550 = vector.extract_strided_slice %543 {offsets = [1, 0], sizes = [1, 16], strides = [1, 1]} : vector<2x16xf32> to vector<1x16xf32>
    %551 = vector.broadcast %550 : vector<1x16xf32> to vector<2x16xf32>
    %552 = arith.mulf %542, %551 : vector<2x16xf32>
    %cst_139 = arith.constant dense<0.000000e+00> : vector<2xf32>
    %553 = vector.multi_reduction <add>, %552, %cst_139 [1] : vector<2x16xf32> to vector<2xf32>
    %554 = vector.shape_cast %553 : vector<2xf32> to vector<2x1xf32>
    %555 = tpu.concatenate %549, %554 in 1 : vector<2x1xf32>, vector<2x1xf32> -> vector<2x2xf32>
    %cst_140 = arith.constant dense<0xFF800000> : vector<2xf32>
    %556 = vector.multi_reduction <maximumf>, %555, %cst_140 [1] : vector<2x2xf32> to vector<2xf32>
    %557 = vector.shape_cast %556 : vector<2xf32> to vector<2x1xf32>
    %558 = vector.broadcast %557 : vector<2x1xf32> to vector<2x2xf32>
    %559 = arith.subf %555, %558 : vector<2x2xf32>
    %560 = math.exp %559 : vector<2x2xf32>
    %cst_141 = arith.constant dense<0.000000e+00> : vector<2xf32>
    %561 = vector.multi_reduction <add>, %560, %cst_141 [1] : vector<2x2xf32> to vector<2xf32>
    %562 = vector.shape_cast %561 : vector<2xf32> to vector<2x1xf32>
    %563 = tpu.reciprocal %562 {approx = true} : vector<2x1xf32> -> vector<2x1xf32>
    %564 = vector.broadcast %563 : vector<2x1xf32> to vector<2x2xf32>
    %565 = arith.mulf %560, %564 : vector<2x2xf32>
    %566 = vector.extract_strided_slice %565 {offsets = [0, 0], sizes = [2, 1], strides = [1, 1]} : vector<2x2xf32> to vector<2x1xf32>
    %567 = vector.extract_strided_slice %544 {offsets = [0, 0], sizes = [1, 16], strides = [1, 1]} : vector<2x16xf32> to vector<1x16xf32>
    %568 = vector.broadcast %566 : vector<2x1xf32> to vector<2x16xf32>
    %569 = vector.broadcast %567 : vector<1x16xf32> to vector<2x16xf32>
    %570 = arith.mulf %568, %569 : vector<2x16xf32>
    %571 = vector.extract_strided_slice %565 {offsets = [0, 1], sizes = [2, 1], strides = [1, 1]} : vector<2x2xf32> to vector<2x1xf32>
    %572 = vector.extract_strided_slice %544 {offsets = [1, 0], sizes = [1, 16], strides = [1, 1]} : vector<2x16xf32> to vector<1x16xf32>
    %573 = vector.broadcast %571 : vector<2x1xf32> to vector<2x16xf32>
    %574 = vector.broadcast %572 : vector<1x16xf32> to vector<2x16xf32>
    %575 = arith.mulf %573, %574 : vector<2x16xf32>
    %576 = arith.addf %570, %575 : vector<2x16xf32>
    %577 = vector.extract_strided_slice %576 {offsets = [0, 0], sizes = [1, 16], strides = [1, 1]} : vector<2x16xf32> to vector<1x16xf32>
    %578 = vector.extract_strided_slice %576 {offsets = [1, 0], sizes = [1, 16], strides = [1, 1]} : vector<2x16xf32> to vector<1x16xf32>
    %579 = arith.addf %577, %578 : vector<1x16xf32>
    %cst_142 = arith.constant 5.000000e-01 : f32
    %580 = vector.broadcast %cst_142 : f32 to vector<1x16xf32>
    %581 = arith.mulf %580, %579 : vector<1x16xf32>
    %582 = tpu.concatenate %461, %501, %541, %581 in 1 : vector<1x16xf32>, vector<1x16xf32>, vector<1x16xf32>, vector<1x16xf32> -> vector<1x64xf32>
    %583 = vector.extract_strided_slice %417 {offsets = [2, 0], sizes = [2, 192], strides = [1, 1]} : vector<4x192xf32> to vector<2x192xf32>
    %584 = vector.extract_strided_slice %583 {offsets = [0, 0], sizes = [2, 64], strides = [1, 1]} : vector<2x192xf32> to vector<2x64xf32>
    %585 = vector.extract_strided_slice %583 {offsets = [0, 64], sizes = [2, 64], strides = [1, 1]} : vector<2x192xf32> to vector<2x64xf32>
    %586 = vector.extract_strided_slice %583 {offsets = [0, 128], sizes = [2, 64], strides = [1, 1]} : vector<2x192xf32> to vector<2x64xf32>
    %587 = vector.extract_strided_slice %584 {offsets = [0, 0], sizes = [2, 16], strides = [1, 1]} : vector<2x64xf32> to vector<2x16xf32>
    %588 = vector.extract_strided_slice %585 {offsets = [0, 0], sizes = [2, 16], strides = [1, 1]} : vector<2x64xf32> to vector<2x16xf32>
    %589 = vector.extract_strided_slice %586 {offsets = [0, 0], sizes = [2, 16], strides = [1, 1]} : vector<2x64xf32> to vector<2x16xf32>
    %590 = vector.extract_strided_slice %588 {offsets = [0, 0], sizes = [1, 16], strides = [1, 1]} : vector<2x16xf32> to vector<1x16xf32>
    %591 = vector.broadcast %590 : vector<1x16xf32> to vector<2x16xf32>
    %592 = arith.mulf %587, %591 : vector<2x16xf32>
    %cst_143 = arith.constant dense<0.000000e+00> : vector<2xf32>
    %593 = vector.multi_reduction <add>, %592, %cst_143 [1] : vector<2x16xf32> to vector<2xf32>
    %594 = vector.shape_cast %593 : vector<2xf32> to vector<2x1xf32>
    %595 = vector.extract_strided_slice %588 {offsets = [1, 0], sizes = [1, 16], strides = [1, 1]} : vector<2x16xf32> to vector<1x16xf32>
    %596 = vector.broadcast %595 : vector<1x16xf32> to vector<2x16xf32>
    %597 = arith.mulf %587, %596 : vector<2x16xf32>
    %cst_144 = arith.constant dense<0.000000e+00> : vector<2xf32>
    %598 = vector.multi_reduction <add>, %597, %cst_144 [1] : vector<2x16xf32> to vector<2xf32>
    %599 = vector.shape_cast %598 : vector<2xf32> to vector<2x1xf32>
    %600 = tpu.concatenate %594, %599 in 1 : vector<2x1xf32>, vector<2x1xf32> -> vector<2x2xf32>
    %cst_145 = arith.constant dense<0xFF800000> : vector<2xf32>
    %601 = vector.multi_reduction <maximumf>, %600, %cst_145 [1] : vector<2x2xf32> to vector<2xf32>
    %602 = vector.shape_cast %601 : vector<2xf32> to vector<2x1xf32>
    %603 = vector.broadcast %602 : vector<2x1xf32> to vector<2x2xf32>
    %604 = arith.subf %600, %603 : vector<2x2xf32>
    %605 = math.exp %604 : vector<2x2xf32>
    %cst_146 = arith.constant dense<0.000000e+00> : vector<2xf32>
    %606 = vector.multi_reduction <add>, %605, %cst_146 [1] : vector<2x2xf32> to vector<2xf32>
    %607 = vector.shape_cast %606 : vector<2xf32> to vector<2x1xf32>
    %608 = tpu.reciprocal %607 {approx = true} : vector<2x1xf32> -> vector<2x1xf32>
    %609 = vector.broadcast %608 : vector<2x1xf32> to vector<2x2xf32>
    %610 = arith.mulf %605, %609 : vector<2x2xf32>
    %611 = vector.extract_strided_slice %610 {offsets = [0, 0], sizes = [2, 1], strides = [1, 1]} : vector<2x2xf32> to vector<2x1xf32>
    %612 = vector.extract_strided_slice %589 {offsets = [0, 0], sizes = [1, 16], strides = [1, 1]} : vector<2x16xf32> to vector<1x16xf32>
    %613 = vector.broadcast %611 : vector<2x1xf32> to vector<2x16xf32>
    %614 = vector.broadcast %612 : vector<1x16xf32> to vector<2x16xf32>
    %615 = arith.mulf %613, %614 : vector<2x16xf32>
    %616 = vector.extract_strided_slice %610 {offsets = [0, 1], sizes = [2, 1], strides = [1, 1]} : vector<2x2xf32> to vector<2x1xf32>
    %617 = vector.extract_strided_slice %589 {offsets = [1, 0], sizes = [1, 16], strides = [1, 1]} : vector<2x16xf32> to vector<1x16xf32>
    %618 = vector.broadcast %616 : vector<2x1xf32> to vector<2x16xf32>
    %619 = vector.broadcast %617 : vector<1x16xf32> to vector<2x16xf32>
    %620 = arith.mulf %618, %619 : vector<2x16xf32>
    %621 = arith.addf %615, %620 : vector<2x16xf32>
    %622 = vector.extract_strided_slice %621 {offsets = [0, 0], sizes = [1, 16], strides = [1, 1]} : vector<2x16xf32> to vector<1x16xf32>
    %623 = vector.extract_strided_slice %621 {offsets = [1, 0], sizes = [1, 16], strides = [1, 1]} : vector<2x16xf32> to vector<1x16xf32>
    %624 = arith.addf %622, %623 : vector<1x16xf32>
    %cst_147 = arith.constant 5.000000e-01 : f32
    %625 = vector.broadcast %cst_147 : f32 to vector<1x16xf32>
    %626 = arith.mulf %625, %624 : vector<1x16xf32>
    %627 = vector.extract_strided_slice %584 {offsets = [0, 16], sizes = [2, 16], strides = [1, 1]} : vector<2x64xf32> to vector<2x16xf32>
    %628 = vector.extract_strided_slice %585 {offsets = [0, 16], sizes = [2, 16], strides = [1, 1]} : vector<2x64xf32> to vector<2x16xf32>
    %629 = vector.extract_strided_slice %586 {offsets = [0, 16], sizes = [2, 16], strides = [1, 1]} : vector<2x64xf32> to vector<2x16xf32>
    %630 = vector.extract_strided_slice %628 {offsets = [0, 0], sizes = [1, 16], strides = [1, 1]} : vector<2x16xf32> to vector<1x16xf32>
    %631 = vector.broadcast %630 : vector<1x16xf32> to vector<2x16xf32>
    %632 = arith.mulf %627, %631 : vector<2x16xf32>
    %cst_148 = arith.constant dense<0.000000e+00> : vector<2xf32>
    %633 = vector.multi_reduction <add>, %632, %cst_148 [1] : vector<2x16xf32> to vector<2xf32>
    %634 = vector.shape_cast %633 : vector<2xf32> to vector<2x1xf32>
    %635 = vector.extract_strided_slice %628 {offsets = [1, 0], sizes = [1, 16], strides = [1, 1]} : vector<2x16xf32> to vector<1x16xf32>
    %636 = vector.broadcast %635 : vector<1x16xf32> to vector<2x16xf32>
    %637 = arith.mulf %627, %636 : vector<2x16xf32>
    %cst_149 = arith.constant dense<0.000000e+00> : vector<2xf32>
    %638 = vector.multi_reduction <add>, %637, %cst_149 [1] : vector<2x16xf32> to vector<2xf32>
    %639 = vector.shape_cast %638 : vector<2xf32> to vector<2x1xf32>
    %640 = tpu.concatenate %634, %639 in 1 : vector<2x1xf32>, vector<2x1xf32> -> vector<2x2xf32>
    %cst_150 = arith.constant dense<0xFF800000> : vector<2xf32>
    %641 = vector.multi_reduction <maximumf>, %640, %cst_150 [1] : vector<2x2xf32> to vector<2xf32>
    %642 = vector.shape_cast %641 : vector<2xf32> to vector<2x1xf32>
    %643 = vector.broadcast %642 : vector<2x1xf32> to vector<2x2xf32>
    %644 = arith.subf %640, %643 : vector<2x2xf32>
    %645 = math.exp %644 : vector<2x2xf32>
    %cst_151 = arith.constant dense<0.000000e+00> : vector<2xf32>
    %646 = vector.multi_reduction <add>, %645, %cst_151 [1] : vector<2x2xf32> to vector<2xf32>
    %647 = vector.shape_cast %646 : vector<2xf32> to vector<2x1xf32>
    %648 = tpu.reciprocal %647 {approx = true} : vector<2x1xf32> -> vector<2x1xf32>
    %649 = vector.broadcast %648 : vector<2x1xf32> to vector<2x2xf32>
    %650 = arith.mulf %645, %649 : vector<2x2xf32>
    %651 = vector.extract_strided_slice %650 {offsets = [0, 0], sizes = [2, 1], strides = [1, 1]} : vector<2x2xf32> to vector<2x1xf32>
    %652 = vector.extract_strided_slice %629 {offsets = [0, 0], sizes = [1, 16], strides = [1, 1]} : vector<2x16xf32> to vector<1x16xf32>
    %653 = vector.broadcast %651 : vector<2x1xf32> to vector<2x16xf32>
    %654 = vector.broadcast %652 : vector<1x16xf32> to vector<2x16xf32>
    %655 = arith.mulf %653, %654 : vector<2x16xf32>
    %656 = vector.extract_strided_slice %650 {offsets = [0, 1], sizes = [2, 1], strides = [1, 1]} : vector<2x2xf32> to vector<2x1xf32>
    %657 = vector.extract_strided_slice %629 {offsets = [1, 0], sizes = [1, 16], strides = [1, 1]} : vector<2x16xf32> to vector<1x16xf32>
    %658 = vector.broadcast %656 : vector<2x1xf32> to vector<2x16xf32>
    %659 = vector.broadcast %657 : vector<1x16xf32> to vector<2x16xf32>
    %660 = arith.mulf %658, %659 : vector<2x16xf32>
    %661 = arith.addf %655, %660 : vector<2x16xf32>
    %662 = vector.extract_strided_slice %661 {offsets = [0, 0], sizes = [1, 16], strides = [1, 1]} : vector<2x16xf32> to vector<1x16xf32>
    %663 = vector.extract_strided_slice %661 {offsets = [1, 0], sizes = [1, 16], strides = [1, 1]} : vector<2x16xf32> to vector<1x16xf32>
    %664 = arith.addf %662, %663 : vector<1x16xf32>
    %cst_152 = arith.constant 5.000000e-01 : f32
    %665 = vector.broadcast %cst_152 : f32 to vector<1x16xf32>
    %666 = arith.mulf %665, %664 : vector<1x16xf32>
    %667 = vector.extract_strided_slice %584 {offsets = [0, 32], sizes = [2, 16], strides = [1, 1]} : vector<2x64xf32> to vector<2x16xf32>
    %668 = vector.extract_strided_slice %585 {offsets = [0, 32], sizes = [2, 16], strides = [1, 1]} : vector<2x64xf32> to vector<2x16xf32>
    %669 = vector.extract_strided_slice %586 {offsets = [0, 32], sizes = [2, 16], strides = [1, 1]} : vector<2x64xf32> to vector<2x16xf32>
    %670 = vector.extract_strided_slice %668 {offsets = [0, 0], sizes = [1, 16], strides = [1, 1]} : vector<2x16xf32> to vector<1x16xf32>
    %671 = vector.broadcast %670 : vector<1x16xf32> to vector<2x16xf32>
    %672 = arith.mulf %667, %671 : vector<2x16xf32>
    %cst_153 = arith.constant dense<0.000000e+00> : vector<2xf32>
    %673 = vector.multi_reduction <add>, %672, %cst_153 [1] : vector<2x16xf32> to vector<2xf32>
    %674 = vector.shape_cast %673 : vector<2xf32> to vector<2x1xf32>
    %675 = vector.extract_strided_slice %668 {offsets = [1, 0], sizes = [1, 16], strides = [1, 1]} : vector<2x16xf32> to vector<1x16xf32>
    %676 = vector.broadcast %675 : vector<1x16xf32> to vector<2x16xf32>
    %677 = arith.mulf %667, %676 : vector<2x16xf32>
    %cst_154 = arith.constant dense<0.000000e+00> : vector<2xf32>
    %678 = vector.multi_reduction <add>, %677, %cst_154 [1] : vector<2x16xf32> to vector<2xf32>
    %679 = vector.shape_cast %678 : vector<2xf32> to vector<2x1xf32>
    %680 = tpu.concatenate %674, %679 in 1 : vector<2x1xf32>, vector<2x1xf32> -> vector<2x2xf32>
    %cst_155 = arith.constant dense<0xFF800000> : vector<2xf32>
    %681 = vector.multi_reduction <maximumf>, %680, %cst_155 [1] : vector<2x2xf32> to vector<2xf32>
    %682 = vector.shape_cast %681 : vector<2xf32> to vector<2x1xf32>
    %683 = vector.broadcast %682 : vector<2x1xf32> to vector<2x2xf32>
    %684 = arith.subf %680, %683 : vector<2x2xf32>
    %685 = math.exp %684 : vector<2x2xf32>
    %cst_156 = arith.constant dense<0.000000e+00> : vector<2xf32>
    %686 = vector.multi_reduction <add>, %685, %cst_156 [1] : vector<2x2xf32> to vector<2xf32>
    %687 = vector.shape_cast %686 : vector<2xf32> to vector<2x1xf32>
    %688 = tpu.reciprocal %687 {approx = true} : vector<2x1xf32> -> vector<2x1xf32>
    %689 = vector.broadcast %688 : vector<2x1xf32> to vector<2x2xf32>
    %690 = arith.mulf %685, %689 : vector<2x2xf32>
    %691 = vector.extract_strided_slice %690 {offsets = [0, 0], sizes = [2, 1], strides = [1, 1]} : vector<2x2xf32> to vector<2x1xf32>
    %692 = vector.extract_strided_slice %669 {offsets = [0, 0], sizes = [1, 16], strides = [1, 1]} : vector<2x16xf32> to vector<1x16xf32>
    %693 = vector.broadcast %691 : vector<2x1xf32> to vector<2x16xf32>
    %694 = vector.broadcast %692 : vector<1x16xf32> to vector<2x16xf32>
    %695 = arith.mulf %693, %694 : vector<2x16xf32>
    %696 = vector.extract_strided_slice %690 {offsets = [0, 1], sizes = [2, 1], strides = [1, 1]} : vector<2x2xf32> to vector<2x1xf32>
    %697 = vector.extract_strided_slice %669 {offsets = [1, 0], sizes = [1, 16], strides = [1, 1]} : vector<2x16xf32> to vector<1x16xf32>
    %698 = vector.broadcast %696 : vector<2x1xf32> to vector<2x16xf32>
    %699 = vector.broadcast %697 : vector<1x16xf32> to vector<2x16xf32>
    %700 = arith.mulf %698, %699 : vector<2x16xf32>
    %701 = arith.addf %695, %700 : vector<2x16xf32>
    %702 = vector.extract_strided_slice %701 {offsets = [0, 0], sizes = [1, 16], strides = [1, 1]} : vector<2x16xf32> to vector<1x16xf32>
    %703 = vector.extract_strided_slice %701 {offsets = [1, 0], sizes = [1, 16], strides = [1, 1]} : vector<2x16xf32> to vector<1x16xf32>
    %704 = arith.addf %702, %703 : vector<1x16xf32>
    %cst_157 = arith.constant 5.000000e-01 : f32
    %705 = vector.broadcast %cst_157 : f32 to vector<1x16xf32>
    %706 = arith.mulf %705, %704 : vector<1x16xf32>
    %707 = vector.extract_strided_slice %584 {offsets = [0, 48], sizes = [2, 16], strides = [1, 1]} : vector<2x64xf32> to vector<2x16xf32>
    %708 = vector.extract_strided_slice %585 {offsets = [0, 48], sizes = [2, 16], strides = [1, 1]} : vector<2x64xf32> to vector<2x16xf32>
    %709 = vector.extract_strided_slice %586 {offsets = [0, 48], sizes = [2, 16], strides = [1, 1]} : vector<2x64xf32> to vector<2x16xf32>
    %710 = vector.extract_strided_slice %708 {offsets = [0, 0], sizes = [1, 16], strides = [1, 1]} : vector<2x16xf32> to vector<1x16xf32>
    %711 = vector.broadcast %710 : vector<1x16xf32> to vector<2x16xf32>
    %712 = arith.mulf %707, %711 : vector<2x16xf32>
    %cst_158 = arith.constant dense<0.000000e+00> : vector<2xf32>
    %713 = vector.multi_reduction <add>, %712, %cst_158 [1] : vector<2x16xf32> to vector<2xf32>
    %714 = vector.shape_cast %713 : vector<2xf32> to vector<2x1xf32>
    %715 = vector.extract_strided_slice %708 {offsets = [1, 0], sizes = [1, 16], strides = [1, 1]} : vector<2x16xf32> to vector<1x16xf32>
    %716 = vector.broadcast %715 : vector<1x16xf32> to vector<2x16xf32>
    %717 = arith.mulf %707, %716 : vector<2x16xf32>
    %cst_159 = arith.constant dense<0.000000e+00> : vector<2xf32>
    %718 = vector.multi_reduction <add>, %717, %cst_159 [1] : vector<2x16xf32> to vector<2xf32>
    %719 = vector.shape_cast %718 : vector<2xf32> to vector<2x1xf32>
    %720 = tpu.concatenate %714, %719 in 1 : vector<2x1xf32>, vector<2x1xf32> -> vector<2x2xf32>
    %cst_160 = arith.constant dense<0xFF800000> : vector<2xf32>
    %721 = vector.multi_reduction <maximumf>, %720, %cst_160 [1] : vector<2x2xf32> to vector<2xf32>
    %722 = vector.shape_cast %721 : vector<2xf32> to vector<2x1xf32>
    %723 = vector.broadcast %722 : vector<2x1xf32> to vector<2x2xf32>
    %724 = arith.subf %720, %723 : vector<2x2xf32>
    %725 = math.exp %724 : vector<2x2xf32>
    %cst_161 = arith.constant dense<0.000000e+00> : vector<2xf32>
    %726 = vector.multi_reduction <add>, %725, %cst_161 [1] : vector<2x2xf32> to vector<2xf32>
    %727 = vector.shape_cast %726 : vector<2xf32> to vector<2x1xf32>
    %728 = tpu.reciprocal %727 {approx = true} : vector<2x1xf32> -> vector<2x1xf32>
    %729 = vector.broadcast %728 : vector<2x1xf32> to vector<2x2xf32>
    %730 = arith.mulf %725, %729 : vector<2x2xf32>
    %731 = vector.extract_strided_slice %730 {offsets = [0, 0], sizes = [2, 1], strides = [1, 1]} : vector<2x2xf32> to vector<2x1xf32>
    %732 = vector.extract_strided_slice %709 {offsets = [0, 0], sizes = [1, 16], strides = [1, 1]} : vector<2x16xf32> to vector<1x16xf32>
    %733 = vector.broadcast %731 : vector<2x1xf32> to vector<2x16xf32>
    %734 = vector.broadcast %732 : vector<1x16xf32> to vector<2x16xf32>
    %735 = arith.mulf %733, %734 : vector<2x16xf32>
    %736 = vector.extract_strided_slice %730 {offsets = [0, 1], sizes = [2, 1], strides = [1, 1]} : vector<2x2xf32> to vector<2x1xf32>
    %737 = vector.extract_strided_slice %709 {offsets = [1, 0], sizes = [1, 16], strides = [1, 1]} : vector<2x16xf32> to vector<1x16xf32>
    %738 = vector.broadcast %736 : vector<2x1xf32> to vector<2x16xf32>
    %739 = vector.broadcast %737 : vector<1x16xf32> to vector<2x16xf32>
    %740 = arith.mulf %738, %739 : vector<2x16xf32>
    %741 = arith.addf %735, %740 : vector<2x16xf32>
    %742 = vector.extract_strided_slice %741 {offsets = [0, 0], sizes = [1, 16], strides = [1, 1]} : vector<2x16xf32> to vector<1x16xf32>
    %743 = vector.extract_strided_slice %741 {offsets = [1, 0], sizes = [1, 16], strides = [1, 1]} : vector<2x16xf32> to vector<1x16xf32>
    %744 = arith.addf %742, %743 : vector<1x16xf32>
    %cst_162 = arith.constant 5.000000e-01 : f32
    %745 = vector.broadcast %cst_162 : f32 to vector<1x16xf32>
    %746 = arith.mulf %745, %744 : vector<1x16xf32>
    %747 = tpu.concatenate %626, %666, %706, %746 in 1 : vector<1x16xf32>, vector<1x16xf32>, vector<1x16xf32>, vector<1x16xf32> -> vector<1x64xf32>
    %748 = tpu.concatenate %582, %747 in 0 : vector<1x64xf32>, vector<1x64xf32> -> vector<2x64xf32>
    %c0_163 = arith.constant 0 : index
    %c0_164 = arith.constant 0 : index
    %749 = vector.load %arg26[%c0_163, %c0_164] : memref<64x64xf32, #tpu.memory_space<vmem>>, vector<64x64xf32>
    %cst_165 = arith.constant dense<0.000000e+00> : vector<2x64xf32>
    %750 = tpu.matmul %748, %749, %cst_165 {dimension_numbers = #tpu.dot_dimension_numbers<[1], [0], [0], [1], [0, 0, 1, 1], [], []>} : vector<2x64xf32>, vector<64x64xf32>, vector<2x64xf32> -> vector<2x64xf32>
    %c0_166 = arith.constant 0 : index
    %c0_167 = arith.constant 0 : index
    %751 = vector.load %arg27[%c0_166, %c0_167] : memref<1x64xf32, #tpu.memory_space<vmem>>, vector<1x64xf32>
    %752 = vector.broadcast %751 : vector<1x64xf32> to vector<2x64xf32>
    %753 = arith.addf %750, %752 : vector<2x64xf32>
    %c0_168 = arith.constant 0 : index
    %c0_169 = arith.constant 0 : index
    %754 = vector.load %arg28[%c0_168, %c0_169] : memref<64x64xf32, #tpu.memory_space<vmem>>, vector<64x64xf32>
    %cst_170 = arith.constant dense<0.000000e+00> : vector<2x64xf32>
    %755 = tpu.matmul %753, %754, %cst_170 {dimension_numbers = #tpu.dot_dimension_numbers<[1], [0], [0], [1], [0, 0, 1, 1], [], []>} : vector<2x64xf32>, vector<64x64xf32>, vector<2x64xf32> -> vector<2x64xf32>
    %c0_171 = arith.constant 0 : index
    %c0_172 = arith.constant 0 : index
    %756 = vector.load %arg29[%c0_171, %c0_172] : memref<1x64xf32, #tpu.memory_space<vmem>>, vector<1x64xf32>
    %757 = vector.broadcast %756 : vector<1x64xf32> to vector<2x64xf32>
    %758 = arith.addf %755, %757 : vector<2x64xf32>
    %c0_173 = arith.constant 0 : index
    %c0_174 = arith.constant 0 : index
    %759 = vector.load %arg3[%c0_173, %c0_174] : memref<2x10xf32, #tpu.memory_space<vmem>>, vector<2x10xf32>
    %c0_175 = arith.constant 0 : index
    %c0_176 = arith.constant 0 : index
    %760 = vector.load %arg30[%c0_175, %c0_176] : memref<10x64xf32, #tpu.memory_space<vmem>>, vector<10x64xf32>
    %cst_177 = arith.constant dense<0.000000e+00> : vector<2x64xf32>
    %761 = tpu.matmul %759, %760, %cst_177 {dimension_numbers = #tpu.dot_dimension_numbers<[1], [0], [0], [1], [0, 0, 1, 1], [], []>} : vector<2x10xf32>, vector<10x64xf32>, vector<2x64xf32> -> vector<2x64xf32>
    %c0_178 = arith.constant 0 : index
    %c0_179 = arith.constant 0 : index
    %762 = vector.load %arg31[%c0_178, %c0_179] : memref<1x64xf32, #tpu.memory_space<vmem>>, vector<1x64xf32>
    %763 = vector.broadcast %762 : vector<1x64xf32> to vector<2x64xf32>
    %764 = arith.addf %761, %763 : vector<2x64xf32>
    %cst_180 = arith.constant 0.000000e+00 : f32
    %765 = vector.broadcast %cst_180 : f32 to vector<2x64xf32>
    %766 = arith.maximumf %764, %765 : vector<2x64xf32>
    %767 = arith.mulf %758, %766 : vector<2x64xf32>
    %c0_181 = arith.constant 0 : index
    %c0_182 = arith.constant 0 : index
    %768 = vector.load %arg32[%c0_181, %c0_182] : memref<1x64xf32, #tpu.memory_space<vmem>>, vector<1x64xf32>
    %769 = vector.broadcast %768 : vector<1x64xf32> to vector<2x64xf32>
    %770 = arith.mulf %767, %769 : vector<2x64xf32>
    %cst_183 = arith.constant dense<0.000000e+00> : vector<2xf32>
    %771 = vector.multi_reduction <add>, %770, %cst_183 [1] : vector<2x64xf32> to vector<2xf32>
    %772 = vector.shape_cast %771 : vector<2xf32> to vector<2x1xf32>
    %c0_184 = arith.constant 0 : index
    %c0_185 = arith.constant 0 : index
    %773 = vector.load %arg33[%c0_184, %c0_185] : memref<1x1xf32, #tpu.memory_space<vmem>>, vector<1x1xf32>
    %774 = vector.broadcast %773 : vector<1x1xf32> to vector<2x1xf32>
    %775 = arith.addf %772, %774 : vector<2x1xf32>
    %c0_186 = arith.constant 0 : index
    %c0_187 = arith.constant 0 : index
    %776 = vector.load %arg34[%c0_186, %c0_187] : memref<2x1xf32, #tpu.memory_space<vmem>>, vector<2x1xf32>
    tpu.vector_store %arg34[%c0_186, %c0_187], %775 {strides = array<i32>} : memref<2x1xf32, #tpu.memory_space<vmem>>, vector<2x1xf32>,
    return
  }
  func.func @transform_0(%arg0: i32) -> (i32, i32) {
    %c0_i32 = arith.constant 0 : i32
    %c0_i32_0 = arith.constant 0 : i32
    %c0_i32_1 = arith.constant 0 : i32
    return %c0_i32, %c0_i32_0 : i32, i32
  }
  func.func @transform_1(%arg0: i32) -> (i32, i32) {
    %c0_i32 = arith.constant 0 : i32
    %c0_i32_0 = arith.constant 0 : i32
    %c0_i32_1 = arith.constant 0 : i32
    return %c0_i32, %c0_i32_0 : i32, i32
  }
  func.func @transform_2(%arg0: i32) -> (i32, i32) {
    %c0_i32 = arith.constant 0 : i32
    %c0_i32_0 = arith.constant 0 : i32
    %c0_i32_1 = arith.constant 0 : i32
    return %c0_i32, %c0_i32_0 : i32, i32
  }
  func.func @transform_3(%arg0: i32) -> (i32, i32) {
    %c0_i32 = arith.constant 0 : i32
    %c0_i32_0 = arith.constant 0 : i32
    %c0_i32_1 = arith.constant 0 : i32
    return %c0_i32, %c0_i32_0 : i32, i32
  }
  func.func @transform_4(%arg0: i32) -> (i32, i32) {
    %c0_i32 = arith.constant 0 : i32
    %c0_i32_0 = arith.constant 0 : i32
    %c0_i32_1 = arith.constant 0 : i32
    return %c0_i32, %c0_i32_0 : i32, i32
  }
  func.func @transform_5(%arg0: i32) -> (i32, i32) {
    %c0_i32 = arith.constant 0 : i32
    %c0_i32_0 = arith.constant 0 : i32
    %c0_i32_1 = arith.constant 0 : i32
    return %c0_i32, %c0_i32_0 : i32, i32
  }
  func.func @transform_6(%arg0: i32) -> (i32, i32) {
    %c0_i32 = arith.constant 0 : i32
    %c0_i32_0 = arith.constant 0 : i32
    %c0_i32_1 = arith.constant 0 : i32
    return %c0_i32, %c0_i32_0 : i32, i32
  }
  func.func @transform_7(%arg0: i32) -> (i32, i32) {
    %c0_i32 = arith.constant 0 : i32
    %c0_i32_0 = arith.constant 0 : i32
    %c0_i32_1 = arith.constant 0 : i32
    return %c0_i32, %c0_i32_0 : i32, i32
  }
  func.func @transform_8(%arg0: i32) -> (i32, i32) {
    %c0_i32 = arith.constant 0 : i32
    %c0_i32_0 = arith.constant 0 : i32
    %c0_i32_1 = arith.constant 0 : i32
    return %c0_i32, %c0_i32_0 : i32, i32
  }
  func.func @transform_9(%arg0: i32) -> (i32, i32) {
    %c0_i32 = arith.constant 0 : i32
    %c0_i32_0 = arith.constant 0 : i32
    %c0_i32_1 = arith.constant 0 : i32
    return %c0_i32, %c0_i32_0 : i32, i32
  }
  func.func @transform_10(%arg0: i32) -> (i32, i32) {
    %c0_i32 = arith.constant 0 : i32
    %c0_i32_0 = arith.constant 0 : i32
    %c0_i32_1 = arith.constant 0 : i32
    return %c0_i32, %c0_i32_0 : i32, i32
  }
  func.func @transform_11(%arg0: i32) -> (i32, i32) {
    %c0_i32 = arith.constant 0 : i32
    %c0_i32_0 = arith.constant 0 : i32
    %c0_i32_1 = arith.constant 0 : i32
    return %c0_i32, %c0_i32_0 : i32, i32
  }
  func.func @transform_12(%arg0: i32) -> (i32, i32) {
    %c0_i32 = arith.constant 0 : i32
    %c0_i32_0 = arith.constant 0 : i32
    %c0_i32_1 = arith.constant 0 : i32
    return %c0_i32, %c0_i32_0 : i32, i32
  }
  func.func @transform_13(%arg0: i32) -> (i32, i32) {
    %c0_i32 = arith.constant 0 : i32
    %c0_i32_0 = arith.constant 0 : i32
    %c0_i32_1 = arith.constant 0 : i32
    return %c0_i32, %c0_i32_0 : i32, i32
  }
  func.func @transform_14(%arg0: i32) -> (i32, i32) {
    %c0_i32 = arith.constant 0 : i32
    %c0_i32_0 = arith.constant 0 : i32
    %c0_i32_1 = arith.constant 0 : i32
    return %c0_i32, %c0_i32_0 : i32, i32
  }
  func.func @transform_15(%arg0: i32) -> (i32, i32) {
    %c0_i32 = arith.constant 0 : i32
    %c0_i32_0 = arith.constant 0 : i32
    %c0_i32_1 = arith.constant 0 : i32
    return %c0_i32, %c0_i32_0 : i32, i32
  }
  func.func @transform_16(%arg0: i32) -> (i32, i32) {
    %c0_i32 = arith.constant 0 : i32
    %c0_i32_0 = arith.constant 0 : i32
    %c0_i32_1 = arith.constant 0 : i32
    return %c0_i32, %c0_i32_0 : i32, i32
  }
  func.func @transform_17(%arg0: i32) -> (i32, i32) {
    %c0_i32 = arith.constant 0 : i32
    %c0_i32_0 = arith.constant 0 : i32
    %c0_i32_1 = arith.constant 0 : i32
    return %c0_i32, %c0_i32_0 : i32, i32
  }
  func.func @transform_18(%arg0: i32) -> (i32, i32) {
    %c0_i32 = arith.constant 0 : i32
    %c0_i32_0 = arith.constant 0 : i32
    %c0_i32_1 = arith.constant 0 : i32
    return %c0_i32, %c0_i32_0 : i32, i32
  }
  func.func @transform_19(%arg0: i32) -> (i32, i32) {
    %c0_i32 = arith.constant 0 : i32
    %c0_i32_0 = arith.constant 0 : i32
    %c0_i32_1 = arith.constant 0 : i32
    return %c0_i32, %c0_i32_0 : i32, i32
  }
  func.func @transform_20(%arg0: i32) -> (i32, i32) {
    %c0_i32 = arith.constant 0 : i32
    %c0_i32_0 = arith.constant 0 : i32
    %c0_i32_1 = arith.constant 0 : i32
    return %c0_i32, %c0_i32_0 : i32, i32
  }
  func.func @transform_21(%arg0: i32) -> (i32, i32) {
    %c0_i32 = arith.constant 0 : i32
    %c0_i32_0 = arith.constant 0 : i32
    %c0_i32_1 = arith.constant 0 : i32
    return %c0_i32, %c0_i32_0 : i32, i32
  }
  func.func @transform_22(%arg0: i32) -> (i32, i32) {
    %c0_i32 = arith.constant 0 : i32
    %c0_i32_0 = arith.constant 0 : i32
    %c0_i32_1 = arith.constant 0 : i32
    return %c0_i32, %c0_i32_0 : i32, i32
  }
  func.func @transform_23(%arg0: i32) -> (i32, i32) {
    %c0_i32 = arith.constant 0 : i32
    %c0_i32_0 = arith.constant 0 : i32
    %c0_i32_1 = arith.constant 0 : i32
    return %c0_i32, %c0_i32_0 : i32, i32
  }
  func.func @transform_24(%arg0: i32) -> (i32, i32) {
    %c0_i32 = arith.constant 0 : i32
    %c0_i32_0 = arith.constant 0 : i32
    %c0_i32_1 = arith.constant 0 : i32
    return %c0_i32, %c0_i32_0 : i32, i32
  }
  func.func @transform_25(%arg0: i32) -> (i32, i32) {
    %c0_i32 = arith.constant 0 : i32
    %c0_i32_0 = arith.constant 0 : i32
    %c0_i32_1 = arith.constant 0 : i32
    return %c0_i32, %c0_i32_0 : i32, i32
  }
  func.func @transform_26(%arg0: i32) -> (i32, i32) {
    %c0_i32 = arith.constant 0 : i32
    %c0_i32_0 = arith.constant 0 : i32
    %c0_i32_1 = arith.constant 0 : i32
    return %c0_i32, %c0_i32_0 : i32, i32
  }
  func.func @transform_27(%arg0: i32) -> (i32, i32) {
    %c0_i32 = arith.constant 0 : i32
    %c0_i32_0 = arith.constant 0 : i32
    %c0_i32_1 = arith.constant 0 : i32
    return %c0_i32, %c0_i32_0 : i32, i32
  }
  func.func @transform_28(%arg0: i32) -> (i32, i32) {
    %c0_i32 = arith.constant 0 : i32
    %c0_i32_0 = arith.constant 0 : i32
    %c0_i32_1 = arith.constant 0 : i32
    return %c0_i32, %c0_i32_0 : i32, i32
  }
  func.func @transform_29(%arg0: i32) -> (i32, i32) {
    %c0_i32 = arith.constant 0 : i32
    %c0_i32_0 = arith.constant 0 : i32
    %c0_i32_1 = arith.constant 0 : i32
    return %c0_i32, %c0_i32_0 : i32, i32
  }
  func.func @transform_30(%arg0: i32) -> (i32, i32) {
    %c0_i32 = arith.constant 0 : i32
    %c0_i32_0 = arith.constant 0 : i32
    %c0_i32_1 = arith.constant 0 : i32
    return %c0_i32, %c0_i32_0 : i32, i32
  }
  func.func @transform_31(%arg0: i32) -> (i32, i32) {
    %c0_i32 = arith.constant 0 : i32
    %c0_i32_0 = arith.constant 0 : i32
    %c0_i32_1 = arith.constant 0 : i32
    return %c0_i32, %c0_i32_0 : i32, i32
  }
  func.func @transform_32(%arg0: i32) -> (i32, i32) {
    %c0_i32 = arith.constant 0 : i32
    %c0_i32_0 = arith.constant 0 : i32
    %c0_i32_1 = arith.constant 0 : i32
    return %c0_i32, %c0_i32_0 : i32, i32
  }
  func.func @transform_33(%arg0: i32) -> (i32, i32) {
    %c0_i32 = arith.constant 0 : i32
    %c0_i32_0 = arith.constant 0 : i32
    %c0_i32_1 = arith.constant 0 : i32
    return %c0_i32, %c0_i32_0 : i32, i32
  }
}

</mosaic_0001>

<bundles_post_ra>
// kernel: tpu_custom_call.1
= control target key start
LH: loop header
LB: loop body
LE: loop exit
PB: predicated region body
PF: predicated region fallthrough
CT: control target
= control target key end

     0   :  { %s4089_s6 = smov 1   ;;  %s4090_s10 = smov 2   ;;  %s4969_s0 = inlined_call_operand.smem [shape: u32[34], index: -1, kind: input, shape index: {}] }
   0x1   :  { %s4157_s5 = sld [smem:[%s4969_s0]]   ;;  %s4091_s14 = smov 3  }
   0x2   :  { %s4162_s9 = sld [smem:[%s4969_s0 + %s4089_s6]]   ;;  %s4092_s18 = smov 4  }
   0x3   :  { %s4167_s13 = sld [smem:[%s4969_s0 + %s4090_s10]]   ;;  %s4093_s22 = smov 5  }
   0x4   :  { %s4172_s17 = sld [smem:[%s4969_s0 + %s4091_s14]]   ;;  %s4094_s26 = smov 6  }
   0x5   :  { %s4177_s21 = sld [smem:[%s4969_s0 + %s4092_s18]]   ;;  %s4095_s30 = smov 7  }
   0x6   :  { %s4182_s25 = sld [smem:[%s4969_s0 + %s4093_s22]]   ;;  %s4096_s4 = smov 8  }
   0x7   :  { %s4187_s29 = sld [smem:[%s4969_s0 + %s4094_s26]]   ;;  %s4097_s10 = smov 9  }
   0x8   :  { %s4192_s3 = sld [smem:[%s4969_s0 + %s4095_s30]]   ;;  %s4098_s15 = smov 10  }
   0x9   :  { %4971 = sst [smem:[#allocation34_spill]] %s4167_s13  ;;  %s4099_s20 = smov 11  }
   0xa   :  { %s4197_s8 = sld [smem:[%s4969_s0 + %s4096_s4]]   ;;  %s4100_s26 = smov 12  }
   0xb   :  { %4972 = sst [smem:[#allocation35_spill]] %s4177_s21  ;;  %s4101_s1 = smov 13  }
   0xc   :  { %s4202_s14 = sld [smem:[%s4969_s0 + %s4097_s10]]   ;;  %s4102_s7 = smov 14  }
   0xd   :  { %4973 = sst [smem:[#allocation36_spill]] %s4187_s29  ;;  %s4104_s22 = smov 16  }
   0xe   :  { %s4207_s19 = sld [smem:[%s4969_s0 + %s4098_s15]]   ;;  %s4103_s15 = smov 15  }
   0xf   :  { %s4212_s24 = sld [smem:[%s4969_s0 + %s4099_s20]]   ;;  %s4105_s28 = smov 17  }
  0x10   :  { %4974 = sst [smem:[#allocation37_spill]] %s4197_s8 }
  0x11   :  { %s4217_s30 = sld [smem:[%s4969_s0 + %s4100_s26]]  }
  0x12   :  { %s4222_s6 = sld [smem:[%s4969_s0 + %s4101_s1]]   ;;  %s4121_s1 = smov 33  }
  0x13   :  { %s4227_s12 = sld [smem:[%s4969_s0 + %s4102_s7]]   ;;  %s4106_s7 = smov 18  }
  0x14   :  { %4975 = sst [smem:[#allocation38_spill]] %s4207_s19 }
  0x15   :  { %s4232_s20 = sld [smem:[%s4969_s0 + %s4103_s15]]   ;;  %s4107_s15 = smov 19  }
  0x16   :  { %s4237_s27 = sld [smem:[%s4969_s0 + %s4104_s22]]   ;;  %s4108_s22 = smov 20  }
  0x17   :  { %4976 = sst [smem:[#allocation39_spill]] %s4217_s30 }
  0x18   :  { %s4242_s4 = sld [smem:[%s4969_s0 + %s4105_s28]]   ;;  %s4109_s28 = smov 21  }
  0x19   :  { %4977 = sst [smem:[#allocation40_spill]] %s4227_s12 }
  0x1a   :  { %s4247_s13 = sld [smem:[%s4969_s0 + %s4106_s7]]   ;;  %s4110_s7 = smov 22  }
  0x1b   :  { %s4252_s30 = sld [smem:[%s4969_s0 + %s4107_s15]]   ;;  %s4111_s15 = smov 23  }
  0x1c   :  { %4978 = sst [smem:[#allocation41_spill]] %s4237_s27 }
  0x1d   :  { %s4257_s27 = sld [smem:[%s4969_s0 + %s4108_s22]]   ;;  %s4112_s22 = smov 24  }
  0x1e   :  { %s4262_s12 = sld [smem:[%s4969_s0 + %s4109_s28]]   ;;  %s4113_s28 = smov 25  }
  0x1f   :  { %s4272_s19 = sld [smem:[%s4969_s0 + %s4111_s15]]   ;;  %s4115_s15 = smov 27  }
  0x20   :  { %4979 = sst [smem:[#allocation42_spill]] %s4247_s13 }
  0x21   :  { %s4267_s13 = sld [smem:[%s4969_s0 + %s4110_s7]]   ;;  %s4114_s7 = smov 26  }
  0x22   :  { %s4282_s8 = sld [smem:[%s4969_s0 + %s4113_s28]]   ;;  %s4117_s28 = smov 29  }
  0x23   :  { %4980 = sst [smem:[#allocation43_spill]] %s4257_s27 }
  0x24   :  { %s4277_s27 = sld [smem:[%s4969_s0 + %s4112_s22]]   ;;  %s4116_s22 = smov 28  }
  0x25   :  { %s4292_s29 = sld [smem:[%s4969_s0 + %s4115_s15]]   ;;  %s4119_s15 = smov 31  }
  0x26   :  { %s4302_s21 = sld [smem:[%s4969_s0 + %s4117_s28]]  }
  0x27   :  { %4981 = sst [smem:[#allocation44_spill]] %s4267_s13 }
  0x28   :  { %s4287_s13 = sld [smem:[%s4969_s0 + %s4114_s7]]   ;;  %s4118_s7 = smov 30  }
  0x2a   :  { %4982 = sst [smem:[#allocation45_spill]] %s4277_s27 }
  0x2b   :  { %4984 = sst [smem:[#allocation47_spill]] %s4292_s29 }
  0x2c   :  { %s4297_s27 = sld [smem:[%s4969_s0 + %s4116_s22]]   ;;  %s4120_s22 = smov 32  }
  0x2d   :  { %4986 = sst [smem:[#allocation49_spill]] %s4302_s21 }
  0x2e   :  { %4983 = sst [smem:[#allocation46_spill]] %s4287_s13 }
  0x2f   :  { %s4307_s13 = sld [smem:[%s4969_s0 + %s4118_s7]]  }
  0x30   :  { %s4312_s29 = sld [smem:[%s4969_s0 + %s4119_s15]]  }
  0x31   :  { %s4320_s21 = sld [smem:[%s4969_s0 + %s4121_s1]]  }
  0x32   :  { %4985 = sst [smem:[#allocation48_spill]] %s4297_s27 }
  0x33   :  { %s3129_s27 = sld [smem:[%s4969_s0 + %s4120_s22]]  }
  0x39   :  { %v72_v0 = vstv %s3129_s27 }
  0x3a   :  { %73 = vst [vmem:[#allocation2] sm:$0x1] %v72_v0 }
  0x3b   :  { %74 = vsyncpa [#allocation4], 0 }
  0x3c   :  { %75 = vsyncpa [#allocation6], 0 }
  0x3d   :  { %76 = vsyncpa [#allocation9], 0 }
  0x3e   :  { %77 = vsyncpa [#allocation12], 0 }
  0x3f   :  { %78 = vsyncpa [#allocation15], 0 }
  0x40   :  { %79 = vsyncpa [#allocation18], 0 }
  0x41   :  { %80 = vsyncpa [#allocation21], 0 }
  0x42   :  { %81 = vsyncpa [#allocation24], 0  ;;  %s4122_s7 = smov [#allocation5]   ;;  %s4123_s11 = smov [#allocation8]  }
  0x43   :  { %s99_s10 = sshll.u32 %s4122_s7, 4  ;;  %s127_s15 = sshll.u32 %s4123_s11, 4  ;;  %s100_s10 = int_to_ptr.vmem [resolvable:$true] %s99_s10  ;;  %s128_s15 = int_to_ptr.vmem [resolvable:$true] %s127_s15 }
  0x44   :  { %s3781_s16 = scalar_lea.vmem %s100_s10, 512  ;;  %p3786_p1 = scmp.lt.s32.totalorder %s100_s10, %s100_s10 }
  0x45   :  { %p3782_p0 = scmp.ne.s32.totalorder %s100_s10, %s3781_s16  ;;  %p3787_p2 = scmp.lt.s32.totalorder %s3781_s16, %s3781_s16 }
  0x47   :  { %p3788_p3 = por %p3787_p2, %p3786_p1 }
  0x49   :  { %p3789_p4 = pnand %p3788_p3, %p3782_p0 }
  0x4b   :  { %3792 = shalt.err (!%p3789_p4)
}
  0x4c   :  { %s4124_s0 = smov 128   ;;  %s4125_s27 = smov 8  }
  0x4d   :  { %105 = dma.hbm_to_vmem [thread:$0]  %s4162_s9, 512, %s100_s10, [#allocation6], %s4124_s0, %s4124_s0, %s4125_s27  }
  0x4e   :  { %s3801_s18 = scalar_lea.vmem %s128_s15, 1024  ;;  %p3806_p6 = scmp.lt.s32.totalorder %s128_s15, %s128_s15 }
  0x4f   :  { %p3802_p5 = scmp.ne.s32.totalorder %s128_s15, %s3801_s18  ;;  %p3807_p7 = scmp.lt.s32.totalorder %s3801_s18, %s3801_s18 }
  0x51   :  { %p3808_p8 = por %p3807_p7, %p3806_p6 }
  0x53   :  { %p3809_p9 = pnand %p3808_p8, %p3802_p5 }
  0x55   :  { %3812 = shalt.err (!%p3809_p9)
}
  0x56   :  { %133 = dma.hbm_to_vmem [thread:$0]  %s4182_s25, 1024, %s128_s15, [#allocation9], %s4124_s0, %s4124_s0, %s4125_s27  }
  0x57   :  { %s4126_s22 = smov [#allocation11]   ;;  %s4127_s26 = smov [#allocation14]  }
  0x58   :  { %s155_s23 = sshll.u32 %s4126_s22, 4  ;;  %s183_s1 = sshll.u32 %s4127_s26, 4  ;;  %s156_s23 = int_to_ptr.vmem [resolvable:$true] %s155_s23  ;;  %s184_s1 = int_to_ptr.vmem [resolvable:$true] %s183_s1 }
  0x59   :  { %s3821_s28 = scalar_lea.vmem %s156_s23, 1024  ;;  %p3826_p11 = scmp.lt.s32.totalorder %s156_s23, %s156_s23 }
  0x5a   :  { %p3822_p10 = scmp.ne.s32.totalorder %s156_s23, %s3821_s28  ;;  %p3827_p12 = scmp.lt.s32.totalorder %s3821_s28, %s3821_s28 }
  0x5c   :  { %p3828_p13 = por %p3827_p12, %p3826_p11 }
  0x5e   :  { %p3829_p0 = pnand %p3828_p13, %p3822_p10 }
  0x60   :  { %3832 = shalt.err (!%p3829_p0)
}
  0x61   :  { %161 = dma.hbm_to_vmem [thread:$0]  %s4202_s14, 1024, %s156_s23, [#allocation12], %s4124_s0, %s4124_s0, %s4125_s27  }
  0x62   :  { %s3841_s9 = scalar_lea.vmem %s184_s1, 512  ;;  %p3846_p2 = scmp.lt.s32.totalorder %s184_s1, %s184_s1 }
  0x63   :  { %p3842_p1 = scmp.ne.s32.totalorder %s184_s1, %s3841_s9  ;;  %p3847_p3 = scmp.lt.s32.totalorder %s3841_s9, %s3841_s9 }
  0x65   :  { %p3848_p4 = por %p3847_p3, %p3846_p2 }
  0x67   :  { %p3849_p5 = pnand %p3848_p4, %p3842_p1 }
  0x69   :  { %3852 = shalt.err (!%p3849_p5)
}
  0x6a   :  { %189 = dma.hbm_to_vmem [thread:$0]  %s4222_s6, 512, %s184_s1, [#allocation15], %s4124_s0, %s4124_s0, %s4125_s27  }
  0x6b   :  { %s4128_s25 = smov [#allocation17]   ;;  %s4129_s7 = smov [#allocation20]  }
  0x6c   :  { %s211_s2 = sshll.u32 %s4128_s25, 4  ;;  %s239_s10 = sshll.u32 %s4129_s7, 4  ;;  %s212_s2 = int_to_ptr.vmem [resolvable:$true] %s211_s2  ;;  %s240_s10 = int_to_ptr.vmem [resolvable:$true] %s239_s10 }
  0x6d   :  { %s3861_s11 = scalar_lea.vmem %s212_s2, 1024  ;;  %p3866_p7 = scmp.lt.s32.totalorder %s212_s2, %s212_s2 }
  0x6e   :  { %p3862_p6 = scmp.ne.s32.totalorder %s212_s2, %s3861_s11  ;;  %p3867_p8 = scmp.lt.s32.totalorder %s3861_s11, %s3861_s11 }
  0x70   :  { %p3868_p9 = por %p3867_p8, %p3866_p7 }
  0x72   :  { %p3869_p10 = pnand %p3868_p9, %p3862_p6 }
  0x74   :  { %3872 = shalt.err (!%p3869_p10)
}
  0x75   :  { %217 = dma.hbm_to_vmem [thread:$0]  %s4242_s4, 1024, %s212_s2, [#allocation18], %s4124_s0, %s4124_s0, %s4125_s27  }
  0x76   :  { %s3881_s14 = scalar_lea.vmem %s240_s10, 1024  ;;  %p3886_p12 = scmp.lt.s32.totalorder %s240_s10, %s240_s10 }
  0x77   :  { %p3882_p11 = scmp.ne.s32.totalorder %s240_s10, %s3881_s14  ;;  %p3887_p13 = scmp.lt.s32.totalorder %s3881_s14, %s3881_s14 }
  0x79   :  { %p3888_p0 = por %p3887_p13, %p3886_p12 }
  0x7b   :  { %p3889_p1 = pnand %p3888_p0, %p3882_p11 }
  0x7d   :  { %3892 = shalt.err (!%p3889_p1)
}
  0x7e   :  { %245 = dma.hbm_to_vmem [thread:$0]  %s4262_s12, 1024, %s240_s10, [#allocation21], %s4124_s0, %s4124_s0, %s4125_s27  }
  0x7f   :  { %s4130_s6 = smov [#allocation23]   ;;  %s4131_s16 = smov [#allocation3]  }
  0x80   :  { %s267_s15 = sshll.u32 %s4130_s6, 4  ;;  %s87_s18 = sshll.u32 %s4131_s16, 4  ;;  %s268_s15 = int_to_ptr.vmem [resolvable:$true] %s267_s15  ;;  %s88_s18 = int_to_ptr.vmem [resolvable:$true] %s87_s18 }
  0x81   :  { %s3901_s22 = scalar_lea.vmem %s268_s15, 1024  ;;  %p3906_p3 = scmp.lt.s32.totalorder %s268_s15, %s268_s15 }
  0x82   :  { %p3902_p2 = scmp.ne.s32.totalorder %s268_s15, %s3901_s22  ;;  %p3907_p4 = scmp.lt.s32.totalorder %s3901_s22, %s3901_s22 }
  0x84   :  { %p3908_p5 = por %p3907_p4, %p3906_p3 }
  0x86   :  { %p3909_p6 = pnand %p3908_p5, %p3902_p2 }
  0x88   :  { %3912 = shalt.err (!%p3909_p6)
}
  0x89   :  { %273 = dma.hbm_to_vmem [thread:$0]  %s4282_s8, 1024, %s268_s15, [#allocation24], %s4124_s0, %s4124_s0, %s4125_s27  }
  0x8a   :  { %s3921_s4 = scalar_lea.vmem %s88_s18, 512  ;;  %p3926_p8 = scmp.lt.s32.totalorder %s88_s18, %s88_s18 }
  0x8b   :  { %p3922_p7 = scmp.ne.s32.totalorder %s88_s18, %s3921_s4  ;;  %p3927_p9 = scmp.lt.s32.totalorder %s3921_s4, %s3921_s4 }
  0x8d   :  { %p3928_p10 = por %p3927_p9, %p3926_p8 }
  0x8f   :  { %p3929_p11 = pnand %p3928_p10, %p3922_p7 }
  0x91   :  { %3932 = shalt.err (!%p3929_p11)
}
  0x92   :  { %93 = dma.hbm_to_vmem [thread:$0]  %s4157_s5, 512, %s88_s18, [#allocation4], %s4124_s0, %s4124_s0, %s4125_s27  }
  0x93   :  { %s4132_s12 = smov [#allocation7]   ;;  %s4133_s26 = smov [#allocation10]  }
  0x94   :  { %s113_s23 = sshll.u32 %s4132_s12, 4  ;;  %s141_s1 = sshll.u32 %s4133_s26, 4  ;;  %s114_s23 = int_to_ptr.vmem [resolvable:$true] %s113_s23  ;;  %s142_s1 = int_to_ptr.vmem [resolvable:$true] %s141_s1 }
  0x95   :  { %s3941_s28 = scalar_lea.vmem %s114_s23, 640  ;;  %p3946_p13 = scmp.lt.s32.totalorder %s114_s23, %s114_s23 }
  0x96   :  { %p3942_p12 = scmp.ne.s32.totalorder %s114_s23, %s3941_s28  ;;  %p3947_p0 = scmp.lt.s32.totalorder %s3941_s28, %s3941_s28 }
  0x98   :  { %p3948_p1 = por %p3947_p0, %p3946_p13 }
  0x9a   :  { %p3949_p2 = pnand %p3948_p1, %p3942_p12 }
  0x9c   :  { %3952 = shalt.err (!%p3949_p2)
}
  0x9d   :  { %119 = dma.hbm_to_vmem [thread:$0]  %s4172_s17, 640, %s114_s23, [#allocation6], %s4124_s0, %s4124_s0, %s4125_s27  }
  0x9e   :  { %s3961_s8 = scalar_lea.vmem %s142_s1, 1024  ;;  %p3966_p4 = scmp.lt.s32.totalorder %s142_s1, %s142_s1 }
  0x9f   :  { %p3962_p3 = scmp.ne.s32.totalorder %s142_s1, %s3961_s8  ;;  %p3967_p5 = scmp.lt.s32.totalorder %s3961_s8, %s3961_s8 }
  0xa1   :  { %p3968_p6 = por %p3967_p5, %p3966_p4 }
  0xa3   :  { %p3969_p7 = pnand %p3968_p6, %p3962_p3 }
  0xa5   :  { %3972 = shalt.err (!%p3969_p7)
}
  0xa6   :  { %147 = dma.hbm_to_vmem [thread:$0]  %s4192_s3, 1024, %s142_s1, [#allocation9], %s4124_s0, %s4124_s0, %s4125_s27  }
  0xa7   :  { %s4134_s5 = smov [#allocation13]   ;;  %s4135_s25 = smov [#allocation16]  }
  0xa8   :  { %s169_s9 = sshll.u32 %s4134_s5, 4  ;;  %s197_s2 = sshll.u32 %s4135_s25, 4  ;;  %s170_s9 = int_to_ptr.vmem [resolvable:$true] %s169_s9  ;;  %s198_s2 = int_to_ptr.vmem [resolvable:$true] %s197_s2 }
  0xa9   :  { %s3981_s7 = scalar_lea.vmem %s170_s9, 1024  ;;  %p3986_p9 = scmp.lt.s32.totalorder %s170_s9, %s170_s9 }
  0xaa   :  { %p3982_p8 = scmp.ne.s32.totalorder %s170_s9, %s3981_s7  ;;  %p3987_p10 = scmp.lt.s32.totalorder %s3981_s7, %s3981_s7 }
  0xac   :  { %p3988_p11 = por %p3987_p10, %p3986_p9 }
  0xae   :  { %p3989_p12 = pnand %p3988_p11, %p3982_p8 }
  0xb0   :  { %3992 = shalt.err (!%p3989_p12)
}
  0xb1   :  { %175 = dma.hbm_to_vmem [thread:$0]  %s4212_s24, 1024, %s170_s9, [#allocation12], %s4124_s0, %s4124_s0, %s4125_s27  }
  0xb2   :  { %s4001_s17 = scalar_lea.vmem %s198_s2, 1024  ;;  %p4006_p0 = scmp.lt.s32.totalorder %s198_s2, %s198_s2 }
  0xb3   :  { %p4002_p13 = scmp.ne.s32.totalorder %s198_s2, %s4001_s17  ;;  %p4007_p1 = scmp.lt.s32.totalorder %s4001_s17, %s4001_s17 }
  0xb5   :  { %p4008_p2 = por %p4007_p1, %p4006_p0 }
  0xb7   :  { %p4009_p3 = pnand %p4008_p2, %p4002_p13 }
  0xb9   :  { %4012 = shalt.err (!%p4009_p3)
}
  0xba   :  { %203 = dma.hbm_to_vmem [thread:$0]  %s4232_s20, 1024, %s198_s2, [#allocation15], %s4124_s0, %s4124_s0, %s4125_s27  }
  0xbb   :  { %s4136_s3 = smov [#allocation19]   ;;  %s4137_s11 = smov [#allocation22]  }
  0xbc   :  { %s225_s10 = sshll.u32 %s4136_s3, 4  ;;  %s253_s14 = sshll.u32 %s4137_s11, 4  ;;  %s226_s10 = int_to_ptr.vmem [resolvable:$true] %s225_s10  ;;  %s254_s14 = int_to_ptr.vmem [resolvable:$true] %s253_s14 }
  0xbd   :  { %s4021_s6 = scalar_lea.vmem %s226_s10, 1024  ;;  %p4026_p5 = scmp.lt.s32.totalorder %s226_s10, %s226_s10 }
  0xbe   :  { %p4022_p4 = scmp.ne.s32.totalorder %s226_s10, %s4021_s6  ;;  %p4027_p6 = scmp.lt.s32.totalorder %s4021_s6, %s4021_s6 }
  0xc0   :  { %p4028_p7 = por %p4027_p6, %p4026_p5 }
  0xc2   :  { %p4029_p8 = pnand %p4028_p7, %p4022_p4 }
  0xc4   :  { %4032 = shalt.err (!%p4029_p8)
}
  0xc5   :  { %231 = dma.hbm_to_vmem [thread:$0]  %s4252_s30, 1024, %s226_s10, [#allocation18], %s4124_s0, %s4124_s0, %s4125_s27  }
  0xc6   :  { %s4041_s24 = scalar_lea.vmem %s254_s14, 2048  ;;  %p4046_p10 = scmp.lt.s32.totalorder %s254_s14, %s254_s14 }
  0xc7   :  { %p4042_p9 = scmp.ne.s32.totalorder %s254_s14, %s4041_s24  ;;  %p4047_p11 = scmp.lt.s32.totalorder %s4041_s24, %s4041_s24 }
  0xc9   :  { %p4048_p12 = por %p4047_p11, %p4046_p10 }
  0xcb   :  { %p4049_p13 = pnand %p4048_p12, %p4042_p9 }
  0xcd   :  { %4052 = shalt.err (!%p4049_p13)
}
  0xce   :  { %s4138_s20 = smov 256   ;;  %s4139_s15 = smov 16  }
  0xcf   :  { %259 = dma.hbm_to_vmem [thread:$0]  %s4272_s19, 2048, %s254_s14, [#allocation21], %s4138_s20, %s4138_s20, %s4139_s15  }
  0xd0   :  { %s4140_s16 = smov [#allocation25]  }
  0xd1   :  { %s281_s18 = sshll.u32 %s4140_s16, 4  ;;  %s282_s18 = int_to_ptr.vmem [resolvable:$true] %s281_s18 }
  0xd2   :  { %s4061_s22 = scalar_lea.vmem %s282_s18, 1024  ;;  %p4066_p1 = scmp.lt.s32.totalorder %s282_s18, %s282_s18 }
  0xd3   :  { %p4062_p0 = scmp.ne.s32.totalorder %s282_s18, %s4061_s22  ;;  %p4067_p2 = scmp.lt.s32.totalorder %s4061_s22, %s4061_s22 }
  0xd5   :  { %p4068_p3 = por %p4067_p2, %p4066_p1 }
  0xd7   :  { %p4069_p4 = pnand %p4068_p3, %p4062_p0 }
  0xd9   :  { %4072 = shalt.err (!%p4069_p4)
}
  0xda   :  { %s4987_s30 = sld [smem:[#allocation47_spill]] }
  0xe0   :  { %287 = dma.hbm_to_vmem [thread:$0]  %s4987_s30, 1024, %s282_s18, [#allocation24], %s4124_s0, %s4124_s0, %s4125_s27  }
  0xe1   :  { %4073 = dma.done.wait [#allocation4], 512  }
  0xe2   :  { %4074 = vsyncadd [#allocation4], 4294966784 }
  0xe3   :  { %4075 = dma.done.wait [#allocation6], 1152  }
  0xe4   :  { %4076 = vsyncadd [#allocation6], 4294966144 }
  0xe5   :  { %4077 = dma.done.wait [#allocation9], 2048  }
  0xe6   :  { %4078 = vsyncadd [#allocation9], 4294965248 }
  0xe7   :  { %4079 = dma.done.wait [#allocation12], 2048  }
  0xe8   :  { %4080 = vsyncadd [#allocation12], 4294965248 }
  0xe9   :  { %4081 = dma.done.wait [#allocation15], 1536  }
  0xea   :  { %4082 = vsyncadd [#allocation15], 4294965760 }
  0xeb   :  { %4083 = dma.done.wait [#allocation18], 2048  }
  0xec   :  { %4084 = vsyncadd [#allocation18], 4294965248 }
  0xed   :  { %4085 = dma.done.wait [#allocation21], 3072  }
  0xee   :  { %4086 = vsyncadd [#allocation21], 4294964224 }
  0xef   :  { %4087 = dma.done.wait [#allocation24], 2048  }
  0xf0   :  { %4088 = vsyncadd [#allocation24], 4294965248  ;;  %vm395_vm0 = vcmask 326656   ;;  %v351_v1 = vld [vmem:[#allocation7 + $0x20] sm:$0xff]  ;;  %v350_v2 = vld [vmem:[#allocation7 + $0x18] sm:$0xff]  ;;  %v4141_v14 = vmov 0.0   ;;  %v670_v38 = vlaneseq }
  0xf1   :  { %3308 = vmatprep.subr.mxu0 %v351_v1  ;;  %v343_v3 = vld [vmem:[#allocation3] sm:$0xff]  ;;  %v349_v4 = vld [vmem:[#allocation7 + $0x10] sm:$0xff]  ;;  %v368_v6 = vld [vmem:[#allocation10 + $0x30] sm:$0xff]  ;;  %s4988_s19 = sld [smem:[#allocation35_spill]]  ;;  %vm4142_vm1 = vmmov 0   ;;  %vm499_vm2 = vcmask 523264  }
  0xf2   :  { %3309 = vmatpush3.msra.mxu0 %v351_v1  ;;  %3318 = vmatprep.mubr.msk.f32.mxu0 %vm395_vm0, %v343_v3  ;;  %v369_v5 = vld [vmem:[#allocation10 + $0x38] sm:$0xff]  ;;  %v348_v7 = vld [vmem:[#allocation7 + $0x8] sm:$0xff]  ;;  %v367_v8 = vld [vmem:[#allocation10 + $0x28] sm:$0xff]  ;;  %s4989_s0 = sld [smem:[#allocation36_spill]]  ;;  %v4420_v39 = vshrl.u32 %v670_v38, 7  ;;  %s4143_s4 = smov 112  }
  0xf3   :  { %3310 = vmatprep.subr.mxu0 %v350_v2  ;;  %3324 = vmatprep.subr.mxu1 %v369_v5  ;;  %v347_v9 = vld [vmem:[#allocation7] sm:$0xff]  ;;  %v366_v10 = vld [vmem:[#allocation10 + $0x20] sm:$0xff]  ;;  %v345_v12 = vld [vmem:[#allocation3 + $0x10] sm:$0xff]  ;;  %s4990_s27 = sld [smem:[#allocation37_spill]]  ;;  %s4144_s12 = smov 96   ;;  %vm676_vm3 = vcmask 130048  }
  0xf4   :  { %3311 = vmatpush3.msra.mxu0 %v350_v2  ;;  %3325 = vmatpush3.msra.mxu1 %v369_v5  ;;  %v344_v11 = vld [vmem:[#allocation3 + $0x8] sm:$0xff]  ;;  %v4380_v13 = vld [vmem:[#allocation8 + $0x38] sm:$0xff]  ;;  %v359_v15 = vld [vmem:[#allocation8 + $0x30] sm:$0xff]  ;;  %v4424_v41 = vsub.s32 0, %v4420_v39  ;;  %s4145_s23 = smov 80   ;;  %vm708_vm4 = vcmask 654848  }
  0xf5   :  { %3312 = vmatprep.subr.mxu0 %v349_v4  ;;  %3326 = vmatprep.subr.mxu1 %v368_v6  ;;  %v365_v16 = vld [vmem:[#allocation10 + $0x18] sm:$0xff]  ;;  %v346_v17 = vld [vmem:[#allocation3 + $0x18] sm:$0xff]  ;;  %v358_v18 = vld [vmem:[#allocation8 + $0x28] sm:$0xff]  ;;  %s4146_s26 = smov 64   ;;  %vm757_vm5 = vcmask 786048   ;;  %vm804_vm6 = vcmask 917248  }
  0xf6   :  { %3313 = vmatpush3.msra.mxu0 %v349_v4  ;;  %3327 = vmatpush3.msra.mxu1 %v368_v6  ;;  %v364_v19 = vld [vmem:[#allocation10 + $0x10] sm:$0xff]  ;;  %v357_v20 = vld [vmem:[#allocation8 + $0x20] sm:$0xff]  ;;  %v356_v21 = vld [vmem:[#allocation8 + $0x18] sm:$0xff]  ;;  %vm851_vm7 = vcmask 1048448   ;;  %vm1387_vm8 = vcmask 1045504   ;;  %vm878_vm9 = vcmask 261120  }
  0xf7   :  { %3314 = vmatprep.subr.mxu0 %v348_v7  ;;  %3328 = vmatprep.subr.mxu1 %v367_v8  ;;  %v355_v22 = vld [vmem:[#allocation8 + $0x10] sm:$0xff]  ;;  %v363_v23 = vld [vmem:[#allocation10 + $0x8] sm:$0xff]  ;;  %v362_v25 = vld [vmem:[#allocation10] sm:$0xff]  ;;  %vm880_vm10 = vcmask 392192   ;;  %vm1163_vm11 = vcmask 1040384   ;;  %vm1374_vm12 = vcmask 244736  }
  0xf8   :  { %3315 = vmatpush3.msra.mxu0 %v348_v7  ;;  %3329 = vmatpush3.msra.mxu1 %v367_v8  ;;  %v354_v24 = vld [vmem:[#allocation8 + $0x8] sm:$0xff]  ;;  %v353_v26 = vld [vmem:[#allocation8] sm:$0xff]  ;;  %v3131_v27 = vld [vmem:[%s4988_s19] ss:$0 sm:$0xff]  ;;  %s4991_s1 = sld [smem:[#allocation38_spill]]  ;;  %vm2306_vm13 = vcmask 1041408  }
  0xf9   :  { %3316 = vmatprep.subr.mxu0 %v347_v9  ;;  %3330 = vmatprep.subr.mxu1 %v366_v10  ;;  %v361_v40 = vld [vmem:[%s4989_s0] sm:$0x1]  ;;  %s4992_s28 = sld [smem:[#allocation40_spill]]  ;;  %vm2308_vm14 = vcmask 1042432   ;;  %vm2421_vm15 = vcmask 123904  }
  0xfa   :  { %3317 = vmatpush3.msra.mxu0 %v347_v9  ;;  %3331 = vmatpush3.msra.mxu1 %v366_v10  ;;  %v3136_v42 = vld [vmem:[%s4990_s27] ss:$0 sm:$0xff]  ;;  %s4993_s8 = sld [smem:[#allocation41_spill]] }
  0xfb   :  { %3319 = vmatmul.mubr.msk.f32.vlgmr.msra.gmra.mxu0 %vm395_vm0, %v344_v11  ;;  %3346 = vmatprep.subr.mxu0 %v4141_v14  ;;  %s4994_s5 = sld [smem:[#allocation42_spill]] }
  0xfc   :  { %3321 = vmatprep.mubr.msk.f32.mxu0 %vm395_vm0, %v345_v12  ;;  %3347 = vmatpush3.msra.mxu0 %v4380_v13  ;;  %s4995_s9 = sld [smem:[#allocation43_spill]] }
  0xfd   :  { %3348 = vmatprep.subr.mxu0 %v4141_v14  ;;  %3332 = vmatprep.subr.mxu1 %v365_v16  ;;  %s4996_s25 = sld [smem:[#allocation39_spill]] }
  0xfe   :  { %3349 = vmatpush3.msra.mxu0 %v359_v15  ;;  %3333 = vmatpush3.msra.mxu1 %v365_v16  ;;  %s4997_s2 = sld [smem:[#allocation44_spill]] }
  0xff   :  { %3322 = vmatmul.mubr.msk.f32.gmra.mxu0 %vm395_vm0, %v346_v17  ;;  %3350 = vmatprep.subr.mxu0 %v4141_v14  ;;  %s4998_s7 = sld [smem:[#allocation45_spill]]  ;;  %vm2613_vm0 = vcmask 125954  }
 0x100   :  { %3351 = vmatpush3.msra.mxu0 %v358_v18  ;;  %3334 = vmatprep.subr.mxu1 %v364_v19  ;;  %s4999_s17 = sld [smem:[#allocation49_spill]] }
 0x101   :  { %3352 = vmatprep.subr.mxu0 %v4141_v14  ;;  %3335 = vmatpush3.msra.mxu1 %v364_v19  ;;  %s5000_s3 = sld [smem:[#allocation34_spill]] }
 0x102   :  { %3353 = vmatpush3.msra.mxu0 %v357_v20  ;;  %3336 = vmatprep.subr.mxu1 %v363_v23  ;;  %s5001_s10 = sld [smem:[#allocation46_spill]] }
 0x103   :  { %3354 = vmatprep.subr.mxu0 %v4141_v14  ;;  %3337 = vmatpush3.msra.mxu1 %v363_v23  ;;  %s5002_s11 = sld [smem:[#allocation48_spill]] }
 0x104   :  { %3355 = vmatpush3.msra.mxu0 %v356_v21  ;;  %3338 = vmatprep.subr.mxu1 %v362_v25 }
 0x105   :  { %3356 = vmatprep.subr.mxu0 %v4141_v14  ;;  %3339 = vmatpush3.msra.mxu1 %v362_v25 }
 0x106   :  { %3357 = vmatpush3.msra.mxu0 %v355_v22  ;;  %3362 = vmatprep.mubr.msk.f32.mxu0 %vm4142_vm1, %v4141_v14 }
 0x107   :  { %3358 = vmatprep.subr.mxu0 %v4141_v14  ;;  %3365 = vmatprep.subr.mxu1 %v4141_v14 }
 0x108   :  { %3359 = vmatpush3.msra.mxu0 %v354_v24 }
 0x109   :  { %3360 = vmatprep.subr.mxu0 %v4141_v14 }
 0x10a   :  { %3361 = vmatpush3.msra.mxu0 %v353_v26 }
 0x10b   :  { %3384 = vmatprep.subr.mxu0 %v4141_v14 }
 0x1bb   :  { %v3320_v28 = vpop.f32.mrf.mxu0 }
 0x1bc   :  { %v480_v29 = vadd.f32 %v3320_v28, %v3131_v27 }
 0x1bd   :  { %v474_v30 = vpop.f32.mrf.mxu0 }
 0x1be   :  { %v597_v31 = vrot.slane %v480_v29, 7  ;;  %v475_v32 = vadd.f32 %v3131_v27, %v474_v30 }
 0x1bf   :  { %v3323_v33 = vpop.f32.mrf.mxu0 }
 0x1c0   :  { %3340 = vmatprep.mubr.msk.f32.mxu1 %vm499_vm2, %v475_v32  ;;  %3363 = vmatmul.mubr.msk.f32.vlgmr.msra.gmra.mxu0 %vm499_vm2, %v597_v31  ;;  %v490_v34 = vadd.f32 %v3323_v33, %v3131_v27 }
 0x1c1   :  { %3341 = vmatmul.mubr.msk.f32.vlgmr.msra.gmra.mxu1 %vm499_vm2, %v480_v29  ;;  %v484_v35 = vpop.f32.mrf.mxu0  ;;  %3400 = vmatprep.mubr.msk.f32.mxu0 %vm4142_vm1, %v4141_v14 }
 0x1c2   :  { %3366 = vmatpush3.msra.mxu1 %v4380_v13  ;;  %v485_v36 = vadd.f32 %v3131_v27, %v484_v35  ;;  %v882_v37 = vrot.slane %v490_v34, 7 }
 0x1c3   :  { %3367 = vmatprep.subr.mxu1 %v4141_v14 }
 0x1c4   :  { %3368 = vmatpush3.msra.mxu1 %v359_v15  ;;  %3343 = vmatprep.mubr.msk.f32.mxu1 %vm499_vm2, %v485_v36 }
 0x1c5   :  { %3369 = vmatprep.subr.mxu1 %v4141_v14  ;;  %3344 = vmatmul.mubr.msk.f32.gmra.mxu1 %vm499_vm2, %v490_v34 }
 0x1c6   :  { %3370 = vmatpush3.msra.mxu1 %v358_v18  ;;  %3381 = vmatprep.mubr.msk.f32.mxu1 %vm4142_vm1, %v4141_v14 }
 0x1c7   :  { %3371 = vmatprep.subr.mxu1 %v4141_v14 }
 0x1c8   :  { %3372 = vmatpush3.msra.mxu1 %v357_v20 }
 0x1c9   :  { %3373 = vmatprep.subr.mxu1 %v4141_v14 }
 0x1ca   :  { %3374 = vmatpush3.msra.mxu1 %v356_v21 }
 0x1cb   :  { %3375 = vmatprep.subr.mxu1 %v4141_v14 }
 0x1cc   :  { %3376 = vmatpush3.msra.mxu1 %v355_v22 }
 0x1cd   :  { %3377 = vmatprep.subr.mxu1 %v4141_v14 }
 0x1ce   :  { %3378 = vmatpush3.msra.mxu1 %v354_v24 }
 0x1cf   :  { %3379 = vmatprep.subr.mxu1 %v4141_v14 }
 0x1d0   :  { %3380 = vmatpush3.msra.mxu1 %v353_v26 }
 0x1d1   :  { %3382 = vmatmul.mubr.msk.f32.vlgmr.msra.gmra.mxu1 %vm499_vm2, %v882_v37  ;;  %3403 = vmatprep.subr.mxu1 %v4141_v14 }
 0x1d2   :  { %3419 = vmatprep.mubr.msk.f32.mxu1 %vm4142_vm1, %v4141_v14 }
 0x280   :  { %v666_v43 = vpop.f32.mrf.mxu0 }
 0x281   :  { %v667_v44 = vadd.f32 %v666_v43, %v361_v40  ;;  %v3342_v45 = vpop.f32.mrf.mxu1 }
 0x282   :  { %v4427_v46 = vadd.f32 %v3342_v45, %v3136_v42  ;;  %v3364_v47 = vpop.f32.mrf.mxu0 }
 0x283   :  { %v673_v48 = vrot.slane %v667_v44, %v4424_v41  ;;  %v578_v49 = vpop.f32.mrf.mxu1 }
 0x284   :  { %v4430_v50 = vadd.f32 %v3136_v42, %v578_v49 }
 0x285   :  { %v675_v51 = vmul.f32 %v673_v48, %v4427_v46  ;;  %v3345_v53 = vpop.f32.mrf.mxu1 }
 0x286   :  { %v674_v52 = vmul.f32 %v673_v48, %v4430_v50  ;;  %v4442_v61 = vadd.f32 %v3345_v53, %v3136_v42 }
 0x287   :  { %722 = vrot.lane.b32.xlu1 %v675_v51, %s4143_s4  ;;  %v588_v54 = vpop.f32.mrf.mxu1  ;;  %v680_v63 = vsel %vm676_vm3, %v675_v51, 0.0 }
 0x288   :  { %720 = vrot.lane.b32.xlu0 %v674_v52, %s4143_s4  ;;  %v4438_v58 = vadd.f32 %v3136_v42, %v588_v54  ;;  %v677_v1 = vsel %vm676_vm3, %v674_v52, 0.0 }
 0x28b   :  { %769 = vrot.lane.b32.xlu1 %v675_v51, %s4144_s12 }
 0x28c   :  { %767 = vrot.lane.b32.xlu0 %v674_v52, %s4144_s12 }
 0x291   :  { %v951_v55 = vpop.f32.mrf.mxu1 }
 0x292   :  { %v952_v56 = vadd.f32 %v951_v55, %v361_v40 }
 0x293   :  { %v3383_v57 = vpop.f32.mrf.mxu1 }
 0x294   :  { %v958_v59 = vrot.slane %v952_v56, %v4424_v41 }
 0x296   :  { %v959_v60 = vmul.f32 %v958_v59, %v4438_v58  ;;  %v960_v62 = vmul.f32 %v958_v59, %v4442_v61 }
 0x298   :  { %1049 = vrot.lane.b32.xlu1 %v959_v60, %s4144_s12  ;;  %1003 = vrot.lane.b32.xlu0 %v959_v60, %s4143_s4  ;;  %v961_v0 = vsel %vm676_vm3, %v959_v60, 0.0  ;;  %v964_v2 = vsel %vm676_vm3, %v960_v62, 0.0 }
 0x29c   :  { %1051 = vrot.lane.b32.xlu1 %v960_v62, %s4144_s12  ;;  %1005 = vrot.lane.b32.xlu0 %v960_v62, %s4143_s4 }
 0x2a0   :  { %1097 = vrot.lane.b32.xlu1 %v960_v62, %s4145_s23  ;;  %1095 = vrot.lane.b32.xlu0 %v959_v60, %s4145_s23 }
 0x2a4   :  { %816 = vrot.lane.b32.xlu1 %v675_v51, %s4145_s23  ;;  %814 = vrot.lane.b32.xlu0 %v674_v52, %s4145_s23 }
 0x2c3   :  { %681 = vadd.xlane.f32.xlu0 %v680_v63 }
 0x2c7   :  { %962 = vadd.xlane.f32.xlu0 %v961_v0 }
 0x2c8   :  { %678 = vadd.xlane.f32.xlu1 %v677_v1 }
 0x2cc   :  { %965 = vadd.xlane.f32.xlu1 %v964_v2 }
 0x2f9   :  { %v723_v3 = vpop.permute.xlu1 %722 }
 0x2fa   :  { %v721_v4 = vpop.permute.xlu0 %720  ;;  %v729_v5 = vsel %vm676_vm3, %v723_v3, 0.0 }
 0x2fb   :  { %730 = vadd.xlane.f32.xlu0 %v729_v5  ;;  %v726_v6 = vsel %vm676_vm3, %v721_v4, 0.0 }
 0x2fc   :  { %727 = vadd.xlane.f32.xlu1 %v726_v6 }
 0x2fd   :  { %v770_v7 = vpop.permute.xlu1 %769 }
 0x2fe   :  { %v768_v8 = vpop.permute.xlu0 %767  ;;  %v776_v9 = vsel %vm676_vm3, %v770_v7, 0.0 }
 0x2ff   :  { %777 = vadd.xlane.f32.xlu0 %v776_v9  ;;  %v773_v10 = vsel %vm676_vm3, %v768_v8, 0.0 }
 0x300   :  { %774 = vadd.xlane.f32.xlu1 %v773_v10 }
 0x30a   :  { %v1050_v11 = vpop.permute.xlu1 %1049  ;;  %v1004_v12 = vpop.permute.xlu0 %1003 }
 0x30b   :  { %v1009_v13 = vsel %vm676_vm3, %v1004_v12, 0.0  ;;  %v1055_v15 = vsel %vm676_vm3, %v1050_v11, 0.0 }
 0x30c   :  { %1010 = vadd.xlane.f32.xlu0 %v1009_v13  ;;  %1056 = vadd.xlane.f32.xlu1 %v1055_v15 }
 0x30e   :  { %v1052_v16 = vpop.permute.xlu1 %1051  ;;  %v1006_v17 = vpop.permute.xlu0 %1005 }
 0x30f   :  { %v1012_v18 = vsel %vm676_vm3, %v1006_v17, 0.0  ;;  %v1058_v21 = vsel %vm676_vm3, %v1052_v16, 0.0 }
 0x310   :  { %1013 = vadd.xlane.f32.xlu0 %v1012_v18 }
 0x312   :  { %v1098_v19 = vpop.permute.xlu1 %1097  ;;  %v1096_v20 = vpop.permute.xlu0 %1095 }
 0x313   :  { %v1101_v22 = vsel %vm676_vm3, %v1096_v20, 0.0  ;;  %v1104_v24 = vsel %vm676_vm3, %v1098_v19, 0.0 }
 0x314   :  { %1059 = vadd.xlane.f32.xlu0 %v1058_v21  ;;  %1102 = vadd.xlane.f32.xlu1 %v1101_v22 }
 0x316   :  { %v815_v23 = vpop.permute.xlu0 %814  ;;  %v817_v26 = vpop.permute.xlu1 %816 }
 0x317   :  { %v820_v25 = vsel %vm676_vm3, %v815_v23, 0.0  ;;  %v823_v27 = vsel %vm676_vm3, %v817_v26, 0.0 }
 0x318   :  { %1105 = vadd.xlane.f32.xlu0 %v1104_v24  ;;  %821 = vadd.xlane.f32.xlu1 %v820_v25 }
 0x31c   :  { %824 = vadd.xlane.f32.xlu0 %v823_v27 }
 0x34c   :  { %v682_v28 = vpop.xlane.xlu0 %681 }
 0x350   :  { %v963_v32 = vpop.xlane.xlu0 %962 }
 0x351   :  { %v679_v29 = vpop.xlane.xlu1 %678 }
 0x352   :  { %v683_v30 = vmax.f32 %v679_v29, %v682_v28 }
 0x354   :  { %v684_v31 = vrot.slane %v683_v30, 4 }
 0x355   :  { %v966_v33 = vpop.xlane.xlu1 %965 }
 0x356   :  { %v685_v34 = vmax.f32 %v683_v30, %v684_v31  ;;  %v967_v35 = vmax.f32 %v963_v32, %v966_v33 }
 0x358   :  { %v686_v36 = vrot.slane %v685_v34, 2  ;;  %v968_v37 = vrot.slane %v967_v35, 4 }
 0x35a   :  { %v687_v38 = vmax.f32 %v685_v34, %v686_v36  ;;  %v969_v40 = vmax.f32 %v967_v35, %v968_v37 }
 0x35c   :  { %v688_v42 = vrot.slane %v687_v38, 1  ;;  %v970_v43 = vrot.slane %v969_v40, 2 }
 0x35e   :  { %v689_v44 = vmax.f32 %v687_v38, %v688_v42  ;;  %v971_v45 = vmax.f32 %v969_v40, %v970_v43 }
 0x360   :  { %v690_v47 = vsub.f32 %v679_v29, %v689_v44  ;;  %v691_v48 = vsub.f32 %v682_v28, %v689_v44  ;;  %v972_v49 = vrot.slane %v971_v45, 1 }
 0x362   :  { %v692_v51 = vmul.f32 1.442695, %v690_v47  ;;  %v694_v52 = vmul.f32 1.442695, %v691_v48  ;;  %v973_v53 = vmax.f32 %v971_v45, %v972_v49 }
 0x364   :  { %3645 = vpow2.f32 %v692_v51  ;;  %v974_v54 = vsub.f32 %v963_v32, %v973_v53  ;;  %v975_v55 = vsub.f32 %v966_v33, %v973_v53 }
 0x365   :  { %3647 = vpow2.f32 %v694_v52 }
 0x366   :  { %v976_v56 = vmul.f32 1.442695, %v974_v54  ;;  %v978_v57 = vmul.f32 1.442695, %v975_v55 }
 0x368   :  { %3649 = vpow2.f32 %v976_v56 }
 0x369   :  { %3651 = vpow2.f32 %v978_v57 }
 0x371   :  { %v3646_v59 = vpop.eup %3645 }
 0x372   :  { %v3648_v60 = vpop.eup %3647 }
 0x373   :  { %v696_v62 = vadd.f32 %v3648_v60, %v3646_v59 }
 0x375   :  { %v3650_v63 = vpop.eup %3649  ;;  %v697_v0 = vrot.slane %v696_v62, 4 }
 0x376   :  { %v3652_v1 = vpop.eup %3651 }
 0x377   :  { %v698_v2 = vadd.f32 %v697_v0, %v696_v62  ;;  %v980_v3 = vadd.f32 %v3652_v1, %v3650_v63 }
 0x379   :  { %v699_v4 = vrot.slane %v698_v2, 2  ;;  %v981_v5 = vrot.slane %v980_v3, 4 }
 0x37b   :  { %v700_v6 = vadd.f32 %v699_v4, %v698_v2  ;;  %v982_v7 = vadd.f32 %v981_v5, %v980_v3 }
 0x37d   :  { %v701_v8 = vrot.slane %v700_v6, 1  ;;  %v983_v9 = vrot.slane %v982_v7, 2 }
 0x37f   :  { %v702_v10 = vadd.f32 %v701_v8, %v700_v6  ;;  %v984_v11 = vadd.f32 %v983_v9, %v982_v7 }
 0x381   :  { %3653 = vrcp.f32 %v702_v10  ;;  %v985_v12 = vrot.slane %v984_v11, 1 }
 0x383   :  { %v986_v13 = vadd.f32 %v985_v12, %v984_v11 }
 0x384   :  { %v731_v15 = vpop.xlane.xlu0 %730 }
 0x385   :  { %3655 = vrcp.f32 %v986_v13  ;;  %v728_v16 = vpop.xlane.xlu1 %727 }
 0x386   :  { %v732_v17 = vmax.f32 %v728_v16, %v731_v15 }
 0x388   :  { %v733_v18 = vrot.slane %v732_v17, 4  ;;  %v778_v19 = vpop.xlane.xlu0 %777 }
 0x389   :  { %v775_v20 = vpop.xlane.xlu1 %774 }
 0x38a   :  { %v734_v21 = vmax.f32 %v732_v17, %v733_v18  ;;  %v779_v22 = vmax.f32 %v775_v20, %v778_v19 }
 0x38c   :  { %v735_v23 = vrot.slane %v734_v21, 2  ;;  %v780_v24 = vrot.slane %v779_v22, 4 }
 0x38e   :  { %v3654_v25 = vpop.eup %3653  ;;  %v736_v26 = vmax.f32 %v734_v21, %v735_v23  ;;  %v781_v27 = vmax.f32 %v779_v22, %v780_v24 }
 0x38f   :  { %v704_v28 = vmul.f32 %v3654_v25, %v3646_v59  ;;  %v705_v29 = vmul.f32 %v3654_v25, %v3648_v60 }
 0x390   :  { %v737_v30 = vrot.slane %v736_v26, 1  ;;  %v782_v31 = vrot.slane %v781_v27, 2 }
 0x391   :  { %v706_v32 = vmul.f32 %v704_v28, %v4430_v50  ;;  %v707_v33 = vmul.f32 %v705_v29, %v4427_v46 }
 0x392   :  { %v3656_v34 = vpop.eup %3655  ;;  %v738_v35 = vmax.f32 %v736_v26, %v737_v30  ;;  %v783_v36 = vmax.f32 %v781_v27, %v782_v31 }
 0x393   :  { %v709_v37 = vsel %vm708_vm4, %v706_v32, 0.0  ;;  %v710_v38 = vsel %vm708_vm4, %v707_v33, 0.0  ;;  %v988_v40 = vmul.f32 %v3656_v34, %v3650_v63  ;;  %v989_v42 = vmul.f32 %v3656_v34, %v3652_v1 }
 0x394   :  { %v739_v43 = vsub.f32 %v728_v16, %v738_v35  ;;  %v740_v44 = vsub.f32 %v731_v15, %v738_v35  ;;  %v784_v45 = vrot.slane %v783_v36, 1  ;;  %v711_v47 = vadd.f32 %v710_v38, %v709_v37 }
 0x395   :  { %v4473_v48 = vpop.xlane.xlu0 %1010  ;;  %v990_v49 = vmul.f32 %v988_v40, %v4438_v58  ;;  %v991_v51 = vmul.f32 %v989_v42, %v4442_v61  ;;  %v1057_v5 = vpop.xlane.xlu1 %1056 }
 0x396   :  { %v741_v52 = vmul.f32 1.442695, %v739_v43  ;;  %v743_v53 = vmul.f32 1.442695, %v740_v44  ;;  %v785_v54 = vmax.f32 %v783_v36, %v784_v45  ;;  %v712_v55 = vrot.slane %v711_v47, 4 }
 0x397   :  { %v992_v56 = vsel %vm708_vm4, %v990_v49, 0.0  ;;  %v993_v57 = vsel %vm708_vm4, %v991_v51, 0.0 }
 0x398   :  { %3657 = vpow2.f32 %v741_v52  ;;  %v786_v59 = vsub.f32 %v775_v20, %v785_v54  ;;  %v787_v60 = vsub.f32 %v778_v19, %v785_v54  ;;  %v713_v62 = vadd.f32 %v712_v55, %v711_v47 }
 0x399   :  { %3659 = vpow2.f32 %v743_v53  ;;  %v1014_v63 = vpop.xlane.xlu0 %1013  ;;  %v994_v0 = vadd.f32 %v993_v57, %v992_v56 }
 0x39a   :  { %v788_v1 = vmul.f32 1.442695, %v786_v59  ;;  %v790_v2 = vmul.f32 1.442695, %v787_v60  ;;  %v1015_v3 = vmax.f32 %v4473_v48, %v1014_v63  ;;  %v714_v4 = vrot.slane %v713_v62, 2 }
 0x39b   :  { %v995_v6 = vrot.slane %v994_v0, 4 }
 0x39c   :  { %3661 = vpow2.f32 %v788_v1  ;;  %v1016_v7 = vrot.slane %v1015_v3, 4  ;;  %v715_v8 = vadd.f32 %v714_v4, %v713_v62 }
 0x39d   :  { %3663 = vpow2.f32 %v790_v2  ;;  %v1060_v9 = vpop.xlane.xlu0 %1059  ;;  %v996_v10 = vadd.f32 %v995_v6, %v994_v0  ;;  %v4480_v15 = vpop.xlane.xlu1 %1102 }
 0x39e   :  { %v1017_v11 = vmax.f32 %v1015_v3, %v1016_v7  ;;  %v1061_v12 = vmax.f32 %v1057_v5, %v1060_v9  ;;  %v716_v13 = vrot.slane %v715_v8, 1 }
 0x39f   :  { %v997_v16 = vrot.slane %v996_v10, 2 }
 0x3a0   :  { %v1018_v17 = vrot.slane %v1017_v11, 2  ;;  %v1062_v18 = vrot.slane %v1061_v12, 4  ;;  %v717_v19 = vadd.f32 %v716_v13, %v715_v8 }
 0x3a1   :  { %v1106_v20 = vpop.xlane.xlu0 %1105  ;;  %v998_v21 = vadd.f32 %v997_v16, %v996_v10  ;;  %v822_v30 = vpop.xlane.xlu1 %821 }
 0x3a2   :  { %v1019_v22 = vmax.f32 %v1017_v11, %v1018_v17  ;;  %v1063_v23 = vmax.f32 %v1061_v12, %v1062_v18  ;;  %v1107_v24 = vmax.f32 %v4480_v15, %v1106_v20  ;;  %862 = vrot.lane.b32.xlu1 %v717_v19, %s4146_s26 }
 0x3a3   :  { %v999_v25 = vrot.slane %v998_v21, 1 }
 0x3a4   :  { %v1020_v26 = vrot.slane %v1019_v22, 1  ;;  %v1064_v27 = vrot.slane %v1063_v23, 2  ;;  %v1108_v28 = vrot.slane %v1107_v24, 4 }
 0x3a5   :  { %v4484_v29 = vpop.eup %3657  ;;  %v825_v31 = vpop.xlane.xlu0 %824  ;;  %v1000_v32 = vadd.f32 %v999_v25, %v998_v21 }
 0x3a6   :  { %v4486_v33 = vpop.eup %3659  ;;  %v1021_v34 = vmax.f32 %v1019_v22, %v1020_v26  ;;  %v1065_v35 = vmax.f32 %v1063_v23, %v1064_v27  ;;  %v1109_v36 = vmax.f32 %v1107_v24, %v1108_v28  ;;  %v826_v37 = vmax.f32 %v822_v30, %v825_v31 }
 0x3a7   :  { %v745_v38 = vadd.f32 %v4486_v33, %v4484_v29  ;;  %1142 = vrot.lane.b32.xlu1 %v1000_v32, %s4146_s26 }
 0x3a8   :  { %v1022_v40 = vsub.f32 %v4473_v48, %v1021_v34  ;;  %v1023_v42 = vsub.f32 %v1014_v63, %v1021_v34  ;;  %v1066_v43 = vrot.slane %v1065_v35, 1  ;;  %v1110_v44 = vrot.slane %v1109_v36, 2 }
 0x3a9   :  { %v4492_v45 = vpop.eup %3661  ;;  %v746_v47 = vrot.slane %v745_v38, 4  ;;  %v827_v49 = vrot.slane %v826_v37, 4 }
 0x3aa   :  { %v4494_v51 = vpop.eup %3663  ;;  %v1024_v52 = vmul.f32 1.442695, %v1022_v40  ;;  %v1026_v53 = vmul.f32 1.442695, %v1023_v42  ;;  %v1067_v54 = vmax.f32 %v1065_v35, %v1066_v43  ;;  %v1111_v55 = vmax.f32 %v1109_v36, %v1110_v44 }
 0x3ab   :  { %v747_v56 = vadd.f32 %v746_v47, %v745_v38  ;;  %v792_v57 = vadd.f32 %v4494_v51, %v4492_v45  ;;  %v828_v59 = vmax.f32 %v826_v37, %v827_v49 }
 0x3ac   :  { %3665 = vpow2.f32 %v1024_v52  ;;  %v1068_v48 = vsub.f32 %v1057_v5, %v1067_v54  ;;  %v1069_v60 = vsub.f32 %v1060_v9, %v1067_v54  ;;  %v1112_v62 = vrot.slane %v1111_v55, 1 }
 0x3ad   :  { %v748_v63 = vrot.slane %v747_v56, 2  ;;  %v793_v0 = vrot.slane %v792_v57, 4  ;;  %3667 = vpow2.f32 %v1026_v53  ;;  %v829_v1 = vrot.slane %v828_v59, 2 }
 0x3ae   :  { %v1070_v2 = vmul.f32 1.442695, %v1068_v48  ;;  %v1072_v3 = vmul.f32 1.442695, %v1069_v60  ;;  %v1113_v4 = vmax.f32 %v1111_v55, %v1112_v62 }
 0x3af   :  { %v749_v6 = vadd.f32 %v748_v63, %v747_v56  ;;  %v794_v7 = vadd.f32 %v793_v0, %v792_v57  ;;  %v830_v8 = vmax.f32 %v828_v59, %v829_v1 }
 0x3b0   :  { %3669 = vpow2.f32 %v1070_v2  ;;  %v1114_v10 = vsub.f32 %v4480_v15, %v1113_v4  ;;  %v1115_v11 = vsub.f32 %v1106_v20, %v1113_v4 }
 0x3b1   :  { %v750_v12 = vrot.slane %v749_v6, 1  ;;  %v795_v13 = vrot.slane %v794_v7, 2  ;;  %3671 = vpow2.f32 %v1072_v3  ;;  %v831_v5 = vrot.slane %v830_v8, 1 }
 0x3b2   :  { %v1116_v9 = vmul.f32 1.442695, %v1114_v10  ;;  %v1118_v16 = vmul.f32 1.442695, %v1115_v11 }
 0x3b3   :  { %v751_v17 = vadd.f32 %v750_v12, %v749_v6  ;;  %v796_v18 = vadd.f32 %v795_v13, %v794_v7  ;;  %v832_v19 = vmax.f32 %v830_v8, %v831_v5  ;;  %v378_v6 = vld [vmem:[#allocation11 + $0x38] sm:$0xff] }
 0x3b4   :  { %3673 = vpow2.f32 %v1116_v9  ;;  %3385 = vmatpush3.msra.mxu0 %v378_v6 }
 0x3b5   :  { %3675 = vrcp.f32 %v751_v17  ;;  %v797_v21 = vrot.slane %v796_v18, 1  ;;  %v833_v22 = vsub.f32 %v822_v30, %v832_v19  ;;  %v834_v23 = vsub.f32 %v825_v31, %v832_v19  ;;  %3386 = vmatprep.subr.mxu0 %v4141_v14 }
 0x3b6   :  { %3677 = vpow2.f32 %v1118_v16 }
 0x3b7   :  { %v798_v24 = vadd.f32 %v797_v21, %v796_v18  ;;  %v835_v25 = vmul.f32 1.442695, %v833_v22  ;;  %v837_v26 = vmul.f32 1.442695, %v834_v23 }
 0x3b9   :  { %v4499_v15 = vpop.eup %3665  ;;  %3679 = vrcp.f32 %v798_v24 }
 0x3ba   :  { %v4501_v20 = vpop.eup %3667  ;;  %3681 = vpow2.f32 %v835_v25 }
 0x3bb   :  { %v1028_v27 = vadd.f32 %v4501_v20, %v4499_v15  ;;  %3683 = vpow2.f32 %v837_v26 }
 0x3bd   :  { %v4505_v28 = vpop.eup %3669  ;;  %v1029_v32 = vrot.slane %v1028_v27, 4 }
 0x3be   :  { %v4507_v34 = vpop.eup %3671 }
 0x3bf   :  { %v1030_v30 = vadd.f32 %v1029_v32, %v1028_v27  ;;  %v1074_v31 = vadd.f32 %v4507_v34, %v4505_v28 }
 0x3c1   :  { %v4511_v35 = vpop.eup %3673  ;;  %v1031_v36 = vrot.slane %v1030_v30, 2  ;;  %v1075_v37 = vrot.slane %v1074_v31, 4 }
 0x3c2   :  { %v3676_v38 = vpop.eup %3675 }
 0x3c3   :  { %v4513_v40 = vpop.eup %3677  ;;  %v1032_v42 = vadd.f32 %v1031_v36, %v1030_v30  ;;  %v1076_v43 = vadd.f32 %v1075_v37, %v1074_v31  ;;  %v753_v44 = vmul.f32 %v3676_v38, %v4484_v29  ;;  %v754_v47 = vmul.f32 %v3676_v38, %v4486_v33 }
 0x3c4   :  { %v1120_v49 = vadd.f32 %v4513_v40, %v4511_v35 }
 0x3c5   :  { %v1033_v52 = vrot.slane %v1032_v42, 1  ;;  %v1077_v53 = vrot.slane %v1076_v43, 2  ;;  %v755_v54 = vmul.f32 %v753_v44, %v4430_v50  ;;  %v756_v55 = vmul.f32 %v754_v47, %v4427_v46 }
 0x3c6   :  { %v3680_v56 = vpop.eup %3679  ;;  %v1121_v57 = vrot.slane %v1120_v49, 4 }
 0x3c7   :  { %v4521_v59 = vpop.eup %3681  ;;  %v1034_v48 = vadd.f32 %v1033_v52, %v1032_v42  ;;  %v1078_v60 = vadd.f32 %v1077_v53, %v1076_v43  ;;  %v758_v29 = vsel %vm757_vm5, %v755_v54, 0.0  ;;  %v759_v33 = vsel %vm757_vm5, %v756_v55, 0.0 }
 0x3c8   :  { %v4525_v62 = vpop.eup %3683  ;;  %v1122_v63 = vadd.f32 %v1121_v57, %v1120_v49  ;;  %v760_v0 = vadd.f32 %v759_v33, %v758_v29  ;;  %v800_v1 = vmul.f32 %v3680_v56, %v4492_v45  ;;  %v801_v2 = vmul.f32 %v3680_v56, %v4494_v51  ;;  %v376_v56 = vld [vmem:[#allocation11 + $0x28] sm:$0xff] }
 0x3c9   :  { %3685 = vrcp.f32 %v1034_v48  ;;  %v1079_v3 = vrot.slane %v1078_v60, 1  ;;  %v839_v4 = vadd.f32 %v4525_v62, %v4521_v59 }
 0x3ca   :  { %v1123_v7 = vrot.slane %v1122_v63, 2  ;;  %v761_v8 = vrot.slane %v760_v0, 4  ;;  %v802_v12 = vmul.f32 %v800_v1, %v4430_v50  ;;  %v803_v13 = vmul.f32 %v801_v2, %v4427_v46  ;;  %v375_v1 = vld [vmem:[#allocation11 + $0x20] sm:$0xff]  ;;  %v374_v2 = vld [vmem:[#allocation11 + $0x18] sm:$0xff] }
 0x3cb   :  { %v1080_v10 = vadd.f32 %v1079_v3, %v1078_v60  ;;  %v840_v11 = vrot.slane %v839_v4, 4 }
 0x3cc   :  { %v1124_v45 = vadd.f32 %v1123_v7, %v1122_v63  ;;  %v762_v5 = vadd.f32 %v761_v8, %v760_v0  ;;  %v805_v18 = vsel %vm804_vm6, %v802_v12, 0.0  ;;  %v806_v19 = vsel %vm804_vm6, %v803_v13, 0.0 }
 0x3cd   :  { %3687 = vrcp.f32 %v1080_v10  ;;  %v841_v51 = vadd.f32 %v840_v11, %v839_v4  ;;  %v807_v25 = vadd.f32 %v806_v19, %v805_v18  ;;  %v372_v18 = vld [vmem:[#allocation11 + $0x8] sm:$0xff] }
 0x3ce   :  { %v1125_v9 = vrot.slane %v1124_v45, 1  ;;  %v763_v16 = vrot.slane %v762_v5, 2 }
 0x3cf   :  { %v842_v17 = vrot.slane %v841_v51, 2  ;;  %v808_v31 = vrot.slane %v807_v25, 4 }
 0x3d0   :  { %v1126_v21 = vadd.f32 %v1125_v9, %v1124_v45  ;;  %v764_v22 = vadd.f32 %v763_v16, %v762_v5 }
 0x3d1   :  { %v843_v23 = vadd.f32 %v842_v17, %v841_v51  ;;  %v809_v44 = vadd.f32 %v808_v31, %v807_v25  ;;  %v373_v17 = vld [vmem:[#allocation11 + $0x10] sm:$0xff]  ;;  %v1330_v31 = vld [vmem:[#allocation14 + $0x18] sm:$0x3f] }
 0x3d2   :  { %3689 = vrcp.f32 %v1126_v21  ;;  %v765_v24 = vrot.slane %v764_v22, 1 }
 0x3d3   :  { %v844_v26 = vrot.slane %v843_v23, 1  ;;  %v810_v60 = vrot.slane %v809_v44, 2 }
 0x3d4   :  { %v766_v27 = vadd.f32 %v765_v24, %v764_v22 }
 0x3d5   :  { %v845_v32 = vadd.f32 %v844_v26, %v843_v23  ;;  %v811_v8 = vadd.f32 %v810_v60, %v809_v44 }
 0x3d6   :  { %v3686_v30 = vpop.eup %3685  ;;  %866 = vrot.lane.b32.xlu0 %v766_v27, %s4146_s26 }
 0x3d7   :  { %3691 = vrcp.f32 %v845_v32  ;;  %v1036_v36 = vmul.f32 %v3686_v30, %v4499_v15  ;;  %v1037_v37 = vmul.f32 %v3686_v30, %v4501_v20  ;;  %v377_v20 = vld [vmem:[#allocation11 + $0x30] sm:$0xff]  ;;  %v812_v21 = vrot.slane %v811_v8, 1 }
 0x3d8   :  { %3387 = vmatpush3.msra.mxu0 %v377_v20  ;;  %v381_v20 = vld [vmem:[#allocation13 + $0x8] sm:$0xff] }
 0x3d9   :  { %v1038_v38 = vmul.f32 %v1036_v36, %v4438_v58  ;;  %v1039_v42 = vmul.f32 %v1037_v37, %v4442_v61  ;;  %3388 = vmatprep.subr.mxu0 %v4141_v14  ;;  %v813_v26 = vadd.f32 %v812_v21, %v811_v8  ;;  %v3143_v21 = vld [vmem:[%s4991_s1] ss:$0 sm:$0xff] }
 0x3da   :  { %v3688_v43 = vpop.eup %3687  ;;  %3389 = vmatpush3.msra.mxu0 %v376_v56 }
 0x3db   :  { %v1040_v47 = vsel %vm757_vm5, %v1038_v38, 0.0  ;;  %v1041_v49 = vsel %vm757_vm5, %v1039_v42, 0.0  ;;  %v1082_v52 = vmul.f32 %v3688_v43, %v4505_v28  ;;  %v1083_v53 = vmul.f32 %v3688_v43, %v4507_v34  ;;  %3390 = vmatprep.subr.mxu0 %v4141_v14 }
 0x3dc   :  { %v1042_v54 = vadd.f32 %v1041_v49, %v1040_v47  ;;  %3391 = vmatpush3.msra.mxu0 %v375_v1  ;;  %v387_v49 = vld [vmem:[#allocation13 + $0x38] sm:$0xff] }
 0x3dd   :  { %v1084_v55 = vmul.f32 %v1082_v52, %v4438_v58  ;;  %v1085_v15 = vmul.f32 %v1083_v53, %v4442_v61  ;;  %3392 = vmatprep.subr.mxu0 %v4141_v14  ;;  %v386_v52 = vld [vmem:[#allocation13 + $0x30] sm:$0xff]  ;;  %3404 = vmatpush3.msra.mxu1 %v387_v49  ;;  %v385_v53 = vld [vmem:[#allocation13 + $0x28] sm:$0xff] }
 0x3de   :  { %v1043_v57 = vrot.slane %v1042_v54, 4  ;;  %3393 = vmatpush3.msra.mxu0 %v374_v2  ;;  %3405 = vmatprep.subr.mxu1 %v4141_v14 }
 0x3df   :  { %v3690_v48 = vpop.eup %3689  ;;  %v1086_v29 = vsel %vm804_vm6, %v1084_v55, 0.0  ;;  %v1087_v33 = vsel %vm804_vm6, %v1085_v15, 0.0  ;;  %3394 = vmatprep.subr.mxu0 %v4141_v14  ;;  %3406 = vmatpush3.msra.mxu1 %v386_v52  ;;  %v383_v55 = vld [vmem:[#allocation13 + $0x18] sm:$0xff]  ;;  %v382_v15 = vld [vmem:[#allocation13 + $0x10] sm:$0xff] }
 0x3e0   :  { %v1044_v28 = vadd.f32 %v1043_v57, %v1042_v54  ;;  %v1088_v63 = vadd.f32 %v1087_v33, %v1086_v29  ;;  %v1128_v34 = vmul.f32 %v3690_v48, %v4511_v35  ;;  %v1129_v0 = vmul.f32 %v3690_v48, %v4513_v40  ;;  %3395 = vmatpush3.msra.mxu0 %v373_v17  ;;  %v384_v54 = vld [vmem:[#allocation13 + $0x20] sm:$0xff]  ;;  %v4616_v17 = vld [vmem:[#allocation16 + $0x10] sm:$0xff] }
 0x3e1   :  { %3396 = vmatprep.subr.mxu0 %v4141_v14  ;;  %3407 = vmatprep.subr.mxu1 %v4141_v14 }
 0x3e2   :  { %v1045_v3 = vrot.slane %v1044_v28, 2  ;;  %v1089_v4 = vrot.slane %v1088_v63, 4  ;;  %v1130_v6 = vmul.f32 %v1128_v34, %v4438_v58  ;;  %v1131_v7 = vmul.f32 %v1129_v0, %v4442_v61  ;;  %3397 = vmatpush3.msra.mxu0 %v372_v18  ;;  %3408 = vmatpush3.msra.mxu1 %v385_v53  ;;  %v1333_v18 = vld [vmem:[#allocation16 + $0x8] sm:$0xff] }
 0x3e3   :  { %3398 = vmatprep.subr.mxu0 %v4141_v14  ;;  %3409 = vmatprep.subr.mxu1 %v4141_v14 }
 0x3e4   :  { %v3692_v10 = vpop.eup %3691  ;;  %v1046_v35 = vadd.f32 %v1045_v3, %v1044_v28  ;;  %v1090_v11 = vadd.f32 %v1089_v4, %v1088_v63  ;;  %v1132_v40 = vsel %vm851_vm7, %v1130_v6, 0.0  ;;  %v1133_v12 = vsel %vm851_vm7, %v1131_v7, 0.0  ;;  %3410 = vmatpush3.msra.mxu1 %v384_v54  ;;  %v1323_v7 = vld [vmem:[#allocation5] sm:$0xff]  ;;  %v1340_v54 = vld [vmem:[%s4993_s8] sm:$0x1] }
 0x3e5   :  { %v1134_v13 = vadd.f32 %v1133_v12, %v1132_v40  ;;  %v847_v45 = vmul.f32 %v3692_v10, %v4521_v59  ;;  %v848_v5 = vmul.f32 %v3692_v10, %v4525_v62  ;;  %3411 = vmatprep.subr.mxu1 %v4141_v14  ;;  %v1329_v10 = vld [vmem:[#allocation14 + $0x10] sm:$0xff]  ;;  %v1324_v40 = vld [vmem:[#allocation5 + $0x8] sm:$0xff]  ;;  %v1325_v12 = vld [vmem:[#allocation5 + $0x10] sm:$0xff] }
 0x3e6   :  { %v1047_v58 = vrot.slane %v1046_v35, 1  ;;  %v1091_v61 = vrot.slane %v1090_v11, 2  ;;  %3412 = vmatpush3.msra.mxu1 %v383_v55 }
 0x3e7   :  { %v1135_v51 = vrot.slane %v1134_v13, 4  ;;  %v849_v9 = vmul.f32 %v847_v45, %v4430_v50  ;;  %v850_v16 = vmul.f32 %v848_v5, %v4427_v46  ;;  %v371_v46 = vld [vmem:[#allocation11] sm:$0xff]  ;;  %3413 = vmatprep.subr.mxu1 %v4141_v14  ;;  %v4596_v5 = vld [vmem:[#allocation16 + $0x38] sm:$0xff] }
 0x3e8   :  { %v1048_v19 = vadd.f32 %v1047_v58, %v1046_v35  ;;  %v1092_v22 = vadd.f32 %v1091_v61, %v1090_v11  ;;  %3399 = vmatpush3.msra.mxu0 %v371_v46  ;;  %3414 = vmatpush3.msra.mxu1 %v382_v15  ;;  %v1328_v35 = vld [vmem:[#allocation14 + $0x8] sm:$0xff]  ;;  %v1327_v11 = vld [vmem:[#allocation14] sm:$0xff]  ;;  %v1348_v58 = vld [vmem:[#allocation17 + $0x38] sm:$0xff] }
 0x3e9   :  { %v1136_v23 = vadd.f32 %v1135_v51, %v1134_v13  ;;  %v852_v59 = vsel %vm851_vm7, %v849_v9, 0.0  ;;  %v853_v62 = vsel %vm851_vm7, %v850_v16, 0.0  ;;  %3422 = vmatprep.subr.msk.mxu0 %vm1387_vm8, %v1330_v31  ;;  %3415 = vmatprep.subr.mxu1 %v4141_v14  ;;  %v1326_v13 = vld [vmem:[#allocation5 + $0x18] sm:$0xff]  ;;  %v380_v45 = vld [vmem:[#allocation13] sm:$0xff]  ;;  %v4604_v51 = vld [vmem:[#allocation16 + $0x28] sm:$0xff] }
 0x3ea   :  { %1146 = vrot.lane.b32.xlu0 %v1048_v19, %s4146_s26  ;;  %v1093_v24 = vrot.slane %v1092_v22, 1  ;;  %v854_v25 = vadd.f32 %v853_v62, %v852_v59  ;;  %3416 = vmatpush3.msra.mxu1 %v381_v20  ;;  %v4600_v61 = vld [vmem:[#allocation16 + $0x30] sm:$0xff]  ;;  %v4608_v9 = vld [vmem:[#allocation16 + $0x20] sm:$0xff]  ;;  %v4612_v16 = vld [vmem:[#allocation16 + $0x18] sm:$0xff] }
 0x3eb   :  { %v1137_v50 = vrot.slane %v1136_v23, 2  ;;  %3417 = vmatprep.subr.mxu1 %v4141_v14  ;;  %v1332_v19 = vld [vmem:[#allocation16] sm:$0xff]  ;;  %v1347_v62 = vld [vmem:[#allocation17 + $0x30] sm:$0xff]  ;;  %v1344_v46 = vld [vmem:[#allocation17 + $0x18] sm:$0xff] }
 0x3ec   :  { %v1094_v27 = vadd.f32 %v1093_v24, %v1092_v22  ;;  %v855_v32 = vrot.slane %v854_v25, 4  ;;  %3418 = vmatpush3.msra.mxu1 %v380_v45  ;;  %v1346_v24 = vld [vmem:[#allocation17 + $0x28] sm:$0xff] }
 0x3ed   :  { %v1138_v30 = vadd.f32 %v1137_v50, %v1136_v23  ;;  %3436 = vmatprep.subr.mxu1 %v1348_v58  ;;  %v3147_v50 = vld [vmem:[%s4992_s28] ss:$0 sm:$0xff] }
 0x3ee   :  { %870 = vrot.lane.b32.xlu0 %v813_v26, %s4146_s26  ;;  %1150 = vrot.lane.b32.xlu1 %v1094_v27, %s4146_s26  ;;  %v856_v36 = vadd.f32 %v855_v32, %v854_v25  ;;  %v1345_v25 = vld [vmem:[#allocation17 + $0x20] sm:$0xff]  ;;  %v1343_v32 = vld [vmem:[#allocation17 + $0x10] sm:$0xff] }
 0x3ef   :  { %v1139_v37 = vrot.slane %v1138_v30, 1 }
 0x3f0   :  { %v857_v38 = vrot.slane %v856_v36, 2 }
 0x3f1   :  { %v1140_v42 = vadd.f32 %v1139_v37, %v1138_v30  ;;  %v1342_v37 = vld [vmem:[#allocation17 + $0x8] sm:$0xff] }
 0x3f2   :  { %v858_v43 = vadd.f32 %v857_v38, %v856_v36 }
 0x3f3   :  { %1154 = vrot.lane.b32.xlu1 %v1140_v42, %s4146_s26  ;;  %v1341_v42 = vld [vmem:[#allocation17] sm:$0xff] }
 0x3f4   :  { %v859_v44 = vrot.slane %v858_v43, 1 }
 0x3f6   :  { %v860_v47 = vadd.f32 %v859_v44, %v858_v43 }
 0x3f8   :  { %874 = vrot.lane.b32.xlu1 %v860_v47, %s4146_s26 }
 0x414   :  { %v863_v56 = vpop.permute.xlu1 %862 }
 0x419   :  { %v1143_v57 = vpop.permute.xlu1 %1142 }
 0x448   :  { %v867_v48 = vpop.permute.xlu0 %866 }
 0x449   :  { %v877_v1 = vsel %vm676_vm3, %v863_v56, %v867_v48  ;;  %v3153_v56 = vld [vmem:[%s4994_s5] ss:$0 sm:$0xff] }
 0x45c   :  { %v1147_v29 = vpop.permute.xlu0 %1146 }
 0x45d   :  { %v1157_v33 = vsel %vm676_vm3, %v1143_v57, %v1147_v29 }
 0x460   :  { %v1151_v60 = vpop.permute.xlu1 %1150  ;;  %v871_v34 = vpop.permute.xlu0 %870 }
 0x461   :  { %v1158_v63 = vsel %vm878_vm9, %v1157_v33, %v1151_v60  ;;  %v879_v2 = vsel %vm878_vm9, %v877_v1, %v871_v34 }
 0x465   :  { %v1155_v28 = vpop.permute.xlu1 %1154 }
 0x466   :  { %v1159_v0 = vsel %vm880_vm10, %v1158_v63, %v1155_v28 }
 0x467   :  { %v1161_v3 = vrot.slane %v1159_v0, 7 }
 0x46a   :  { %v875_v4 = vpop.permute.xlu1 %874 }
 0x46b   :  { %v881_v6 = vsel %vm880_vm10, %v879_v2, %v875_v4 }
 0x46c   :  { %v1164_v8 = vsel %vm1163_vm11, %v881_v6, %v1161_v3 }
 0x46d   :  { %3401 = vmatmul.mubr.msk.f32.vlgmr.msra.gmra.mxu0 %vm499_vm2, %v1164_v8 }
 0x46e   :  { %3423 = vmatpush3.msk.msra.mxu0 %vm1387_vm8, %v1330_v31  ;;  %3430 = vmatprep.mubr.msk.f32.mxu0 %vm1374_vm12, %v1323_v7 }
 0x46f   :  { %3424 = vmatprep.subr.mxu0 %v1329_v10 }
 0x470   :  { %3425 = vmatpush3.msra.mxu0 %v1329_v10 }
 0x471   :  { %3426 = vmatprep.subr.mxu0 %v1328_v35 }
 0x472   :  { %3427 = vmatpush3.msra.mxu0 %v1328_v35 }
 0x473   :  { %3428 = vmatprep.subr.mxu0 %v1327_v11 }
 0x474   :  { %3429 = vmatpush3.msra.mxu0 %v1327_v11 }
 0x475   :  { %3431 = vmatmul.mubr.msk.f32.vlgmr.msra.gmra.mxu0 %vm1374_vm12, %v1324_v40  ;;  %3458 = vmatprep.subr.mxu0 %v4141_v14 }
 0x476   :  { %3433 = vmatprep.mubr.msk.f32.mxu0 %vm1374_vm12, %v1325_v12  ;;  %3459 = vmatpush3.msra.mxu0 %v4596_v5 }
 0x477   :  { %3460 = vmatprep.subr.mxu0 %v4141_v14 }
 0x478   :  { %3461 = vmatpush3.msra.mxu0 %v4600_v61 }
 0x479   :  { %3434 = vmatmul.mubr.msk.f32.gmra.mxu0 %vm1374_vm12, %v1326_v13  ;;  %3462 = vmatprep.subr.mxu0 %v4141_v14 }
 0x47a   :  { %3474 = vmatprep.mubr.msk.f32.mxu0 %vm4142_vm1, %v4141_v14  ;;  %3463 = vmatpush3.msra.mxu0 %v4604_v51 }
 0x47b   :  { %3464 = vmatprep.subr.mxu0 %v4141_v14 }
 0x47c   :  { %3465 = vmatpush3.msra.mxu0 %v4608_v9 }
 0x47d   :  { %3466 = vmatprep.subr.mxu0 %v4141_v14 }
 0x47e   :  { %3467 = vmatpush3.msra.mxu0 %v4612_v16 }
 0x47f   :  { %3468 = vmatprep.subr.mxu0 %v4141_v14 }
 0x480   :  { %3469 = vmatpush3.msra.mxu0 %v4616_v17 }
 0x481   :  { %3470 = vmatprep.subr.mxu0 %v4141_v14 }
 0x482   :  { %3471 = vmatpush3.msra.mxu0 %v1333_v18 }
 0x483   :  { %3472 = vmatprep.subr.mxu0 %v4141_v14 }
 0x484   :  { %3473 = vmatpush3.msra.mxu0 %v1332_v19 }
 0x485   :  { %3496 = vmatprep.subr.mxu0 %v4141_v14 }
 0x52d   :  { %v1240_v22 = vpop.f32.mrf.mxu0 }
 0x52e   :  { %v1241_v23 = vadd.f32 %v3143_v21, %v1240_v22 }
 0x52f   :  { %v3402_v59 = vpop.f32.mrf.mxu0 }
 0x530   :  { %3420 = vmatmul.mubr.msk.f32.vlgmr.msra.gmra.mxu1 %vm499_vm2, %v1241_v23 }
 0x531   :  { %3437 = vmatpush3.msra.mxu1 %v1348_v58 }
 0x532   :  { %3438 = vmatprep.subr.mxu1 %v1347_v62 }
 0x533   :  { %3439 = vmatpush3.msra.mxu1 %v1347_v62 }
 0x534   :  { %3440 = vmatprep.subr.mxu1 %v1346_v24 }
 0x535   :  { %3441 = vmatpush3.msra.mxu1 %v1346_v24  ;;  %v3432_v26 = vpop.f32.mrf.mxu0 }
 0x536   :  { %3442 = vmatprep.subr.mxu1 %v1345_v25  ;;  %v1463_v27 = vadd.f32 %v3432_v26, %v3147_v50 }
 0x537   :  { %3443 = vmatpush3.msra.mxu1 %v1345_v25  ;;  %v1457_v30 = vpop.f32.mrf.mxu0 }
 0x538   :  { %3444 = vmatprep.subr.mxu1 %v1344_v46  ;;  %v1579_v31 = vrot.slane %v1463_v27, 7  ;;  %v1458_v36 = vadd.f32 %v3147_v50, %v1457_v30 }
 0x539   :  { %3445 = vmatpush3.msra.mxu1 %v1344_v46  ;;  %v3435_v38 = vpop.f32.mrf.mxu0 }
 0x53a   :  { %3446 = vmatprep.subr.mxu1 %v1343_v32  ;;  %3452 = vmatprep.mubr.msk.f32.mxu1 %vm499_vm2, %v1458_v36  ;;  %v1473_v47 = vadd.f32 %v3435_v38, %v3147_v50 }
 0x53b   :  { %3447 = vmatpush3.msra.mxu1 %v1343_v32  ;;  %3475 = vmatmul.mubr.msk.f32.vlgmr.msra.gmra.mxu0 %vm499_vm2, %v1579_v31  ;;  %v1467_v43 = vpop.f32.mrf.mxu0 }
 0x53c   :  { %3448 = vmatprep.subr.mxu1 %v1342_v37  ;;  %3512 = vmatprep.mubr.msk.f32.mxu0 %vm4142_vm1, %v4141_v14  ;;  %v1468_v44 = vadd.f32 %v3147_v50, %v1467_v43  ;;  %v1857_v49 = vrot.slane %v1473_v47, 7 }
 0x53d   :  { %3449 = vmatpush3.msra.mxu1 %v1342_v37 }
 0x53e   :  { %3450 = vmatprep.subr.mxu1 %v1341_v42 }
 0x53f   :  { %3451 = vmatpush3.msra.mxu1 %v1341_v42 }
 0x540   :  { %3453 = vmatmul.mubr.msk.f32.vlgmr.msra.gmra.mxu1 %vm499_vm2, %v1463_v27  ;;  %3477 = vmatprep.subr.mxu1 %v4141_v14 }
 0x541   :  { %3478 = vmatpush3.msra.mxu1 %v4596_v5  ;;  %3455 = vmatprep.mubr.msk.f32.mxu1 %vm499_vm2, %v1468_v44 }
 0x542   :  { %3479 = vmatprep.subr.mxu1 %v4141_v14 }
 0x543   :  { %3480 = vmatpush3.msra.mxu1 %v4600_v61 }
 0x544   :  { %3481 = vmatprep.subr.mxu1 %v4141_v14  ;;  %3456 = vmatmul.mubr.msk.f32.gmra.mxu1 %vm499_vm2, %v1473_v47 }
 0x545   :  { %3482 = vmatpush3.msra.mxu1 %v4604_v51  ;;  %3493 = vmatprep.mubr.msk.f32.mxu1 %vm4142_vm1, %v4141_v14 }
 0x546   :  { %3483 = vmatprep.subr.mxu1 %v4141_v14 }
 0x547   :  { %3484 = vmatpush3.msra.mxu1 %v4608_v9 }
 0x548   :  { %3485 = vmatprep.subr.mxu1 %v4141_v14 }
 0x549   :  { %3486 = vmatpush3.msra.mxu1 %v4612_v16 }
 0x54a   :  { %3487 = vmatprep.subr.mxu1 %v4141_v14 }
 0x54b   :  { %3488 = vmatpush3.msra.mxu1 %v4616_v17 }
 0x54c   :  { %3489 = vmatprep.subr.mxu1 %v4141_v14 }
 0x54d   :  { %3490 = vmatpush3.msra.mxu1 %v1333_v18 }
 0x54e   :  { %3491 = vmatprep.subr.mxu1 %v4141_v14 }
 0x54f   :  { %3492 = vmatpush3.msra.mxu1 %v1332_v19 }
 0x550   :  { %3494 = vmatmul.mubr.msk.f32.vlgmr.msra.gmra.mxu1 %vm499_vm2, %v1857_v49  ;;  %3515 = vmatprep.subr.mxu1 %v4141_v14 }
 0x551   :  { %3531 = vmatprep.mubr.msk.f32.mxu1 %vm4142_vm1, %v4141_v14 }
 0x5f0   :  { %v4652_v52 = vpop.f32.mrf.mxu1 }
 0x5f2   :  { %v3421_v53 = vpop.f32.mrf.mxu1 }
 0x5fb   :  { %v1648_v55 = vpop.f32.mrf.mxu0 }
 0x5fc   :  { %v1649_v15 = vadd.f32 %v1648_v55, %v1340_v54 }
 0x5fd   :  { %v3476_v20 = vpop.f32.mrf.mxu0 }
 0x5fe   :  { %v1655_v57 = vrot.slane %v1649_v15, %v4424_v41 }
 0x600   :  { %v3454_v48 = vpop.f32.mrf.mxu1 }
 0x601   :  { %v4657_v60 = vadd.f32 %v3454_v48, %v3153_v56 }
 0x602   :  { %v1560_v29 = vpop.f32.mrf.mxu1 }
 0x603   :  { %v4659_v33 = vadd.f32 %v3153_v56, %v1560_v29  ;;  %v1657_v28 = vmul.f32 %v1655_v57, %v4657_v60 }
 0x604   :  { %v3457_v34 = vpop.f32.mrf.mxu1 }
 0x605   :  { %1702 = vrot.lane.b32.xlu1 %v1657_v28, %s4143_s4  ;;  %v1656_v63 = vmul.f32 %v1655_v57, %v4659_v33  ;;  %v4667_v4 = vadd.f32 %v3457_v34, %v3153_v56  ;;  %v1661_v35 = vsel %vm676_vm3, %v1657_v28, 0.0 }
 0x606   :  { %v1570_v0 = vpop.f32.mrf.mxu1 }
 0x607   :  { %1700 = vrot.lane.b32.xlu0 %v1656_v63, %s4143_s4  ;;  %v4669_v6 = vadd.f32 %v3153_v56, %v1570_v0  ;;  %v1658_v40 = vsel %vm676_vm3, %v1656_v63, 0.0 }
 0x609   :  { %1748 = vrot.lane.b32.xlu1 %v1657_v28, %s4144_s12 }
 0x60b   :  { %1746 = vrot.lane.b32.xlu0 %v1656_v63, %s4144_s12 }
 0x610   :  { %v1926_v1 = vpop.f32.mrf.mxu1 }
 0x611   :  { %v1927_v2 = vadd.f32 %v1926_v1, %v1340_v54 }
 0x612   :  { %v3495_v3 = vpop.f32.mrf.mxu1 }
 0x613   :  { %v1933_v7 = vrot.slane %v1927_v2, %v4424_v41 }
 0x615   :  { %v1934_v8 = vmul.f32 %v1933_v7, %v4669_v6  ;;  %v1935_v10 = vmul.f32 %v1933_v7, %v4667_v4 }
 0x617   :  { %1980 = vrot.lane.b32.xlu1 %v1935_v10, %s4143_s4  ;;  %1978 = vrot.lane.b32.xlu0 %v1934_v8, %s4143_s4  ;;  %v1936_v11 = vsel %vm676_vm3, %v1934_v8, 0.0  ;;  %v1939_v12 = vsel %vm676_vm3, %v1935_v10, 0.0 }
 0x61b   :  { %2026 = vrot.lane.b32.xlu1 %v1935_v10, %s4144_s12  ;;  %2024 = vrot.lane.b32.xlu0 %v1934_v8, %s4144_s12 }
 0x61f   :  { %2072 = vrot.lane.b32.xlu1 %v1935_v10, %s4145_s23  ;;  %2070 = vrot.lane.b32.xlu0 %v1934_v8, %s4145_s23 }
 0x623   :  { %1794 = vrot.lane.b32.xlu1 %v1657_v28, %s4145_s23  ;;  %1792 = vrot.lane.b32.xlu0 %v1656_v63, %s4145_s23 }
 0x642   :  { %1662 = vadd.xlane.f32.xlu0 %v1661_v35 }
 0x646   :  { %1937 = vadd.xlane.f32.xlu0 %v1936_v11 }
 0x647   :  { %1659 = vadd.xlane.f32.xlu1 %v1658_v40 }
 0x64b   :  { %1940 = vadd.xlane.f32.xlu1 %v1939_v12 }
 0x677   :  { %v1703_v13 = vpop.permute.xlu1 %1702 }
 0x678   :  { %v1709_v45 = vsel %vm676_vm3, %v1703_v13, 0.0 }
 0x679   :  { %1710 = vadd.xlane.f32.xlu0 %v1709_v45  ;;  %v1701_v5 = vpop.permute.xlu0 %1700 }
 0x67a   :  { %v1706_v58 = vsel %vm676_vm3, %v1701_v5, 0.0 }
 0x67b   :  { %v1749_v61 = vpop.permute.xlu1 %1748  ;;  %1707 = vadd.xlane.f32.xlu1 %v1706_v58 }
 0x67c   :  { %v1755_v51 = vsel %vm676_vm3, %v1749_v61, 0.0 }
 0x67d   :  { %1756 = vadd.xlane.f32.xlu0 %v1755_v51  ;;  %v1747_v9 = vpop.permute.xlu0 %1746 }
 0x67e   :  { %v1752_v16 = vsel %vm676_vm3, %v1747_v9, 0.0 }
 0x67f   :  { %1753 = vadd.xlane.f32.xlu1 %v1752_v16 }
 0x689   :  { %v1981_v17 = vpop.permute.xlu1 %1980  ;;  %v1979_v18 = vpop.permute.xlu0 %1978 }
 0x68a   :  { %v1984_v19 = vsel %vm676_vm3, %v1979_v18, 0.0  ;;  %v1987_v23 = vsel %vm676_vm3, %v1981_v17, 0.0 }
 0x68b   :  { %1985 = vadd.xlane.f32.xlu0 %v1984_v19 }
 0x68d   :  { %v2027_v21 = vpop.permute.xlu1 %2026  ;;  %v2025_v22 = vpop.permute.xlu0 %2024 }
 0x68e   :  { %v2030_v59 = vsel %vm676_vm3, %v2025_v22, 0.0  ;;  %v2033_v25 = vsel %vm676_vm3, %v2027_v21, 0.0 }
 0x68f   :  { %1988 = vadd.xlane.f32.xlu0 %v1987_v23  ;;  %2031 = vadd.xlane.f32.xlu1 %v2030_v59 }
 0x691   :  { %v2073_v62 = vpop.permute.xlu1 %2072  ;;  %v2071_v24 = vpop.permute.xlu0 %2070 }
 0x692   :  { %v2076_v50 = vsel %vm676_vm3, %v2071_v24, 0.0  ;;  %v2079_v26 = vsel %vm676_vm3, %v2073_v62, 0.0 }
 0x693   :  { %2034 = vadd.xlane.f32.xlu0 %v2033_v25  ;;  %2077 = vadd.xlane.f32.xlu1 %v2076_v50 }
 0x695   :  { %v1793_v46 = vpop.permute.xlu0 %1792  ;;  %v1795_v32 = vpop.permute.xlu1 %1794 }
 0x696   :  { %v1798_v27 = vsel %vm676_vm3, %v1793_v46, 0.0  ;;  %v1801_v30 = vsel %vm676_vm3, %v1795_v32, 0.0 }
 0x697   :  { %2080 = vadd.xlane.f32.xlu0 %v2079_v26  ;;  %1799 = vadd.xlane.f32.xlu1 %v1798_v27 }
 0x69b   :  { %1802 = vadd.xlane.f32.xlu0 %v1801_v30 }
 0x6cb   :  { %v1663_v31 = vpop.xlane.xlu0 %1662 }
 0x6cf   :  { %v1938_v42 = vpop.xlane.xlu0 %1937 }
 0x6d0   :  { %v1660_v36 = vpop.xlane.xlu1 %1659 }
 0x6d1   :  { %v1664_v37 = vmax.f32 %v1660_v36, %v1663_v31 }
 0x6d3   :  { %v1665_v38 = vrot.slane %v1664_v37, 4 }
 0x6d4   :  { %v1941_v43 = vpop.xlane.xlu1 %1940 }
 0x6d5   :  { %v1666_v44 = vmax.f32 %v1664_v37, %v1665_v38  ;;  %v1942_v47 = vmax.f32 %v1938_v42, %v1941_v43 }
 0x6d7   :  { %v1667_v49 = vrot.slane %v1666_v44, 2  ;;  %v1943_v53 = vrot.slane %v1942_v47, 4 }
 0x6d9   :  { %v1668_v54 = vmax.f32 %v1666_v44, %v1667_v49  ;;  %v1944_v55 = vmax.f32 %v1942_v47, %v1943_v53 }
 0x6db   :  { %v1669_v15 = vrot.slane %v1668_v54, 1  ;;  %v1945_v20 = vrot.slane %v1944_v55, 2 }
 0x6dd   :  { %v1670_v56 = vmax.f32 %v1668_v54, %v1669_v15  ;;  %v1946_v57 = vmax.f32 %v1944_v55, %v1945_v20 }
 0x6df   :  { %v1671_v48 = vsub.f32 %v1660_v36, %v1670_v56  ;;  %v1672_v29 = vsub.f32 %v1663_v31, %v1670_v56  ;;  %v1947_v28 = vrot.slane %v1946_v57, 1 }
 0x6e1   :  { %v1673_v63 = vmul.f32 1.442695, %v1671_v48  ;;  %v1675_v34 = vmul.f32 1.442695, %v1672_v29  ;;  %v1948_v0 = vmax.f32 %v1946_v57, %v1947_v28 }
 0x6e3   :  { %3693 = vpow2.f32 %v1673_v63  ;;  %v1949_v1 = vsub.f32 %v1938_v42, %v1948_v0  ;;  %v1950_v2 = vsub.f32 %v1941_v43, %v1948_v0 }
 0x6e4   :  { %3695 = vpow2.f32 %v1675_v34 }
 0x6e5   :  { %v1951_v3 = vmul.f32 1.442695, %v1949_v1  ;;  %v1953_v7 = vmul.f32 1.442695, %v1950_v2 }
 0x6e7   :  { %3697 = vpow2.f32 %v1951_v3 }
 0x6e8   :  { %3699 = vpow2.f32 %v1953_v7 }
 0x6f0   :  { %v3694_v8 = vpop.eup %3693 }
 0x6f1   :  { %v3696_v10 = vpop.eup %3695 }
 0x6f2   :  { %v1677_v35 = vadd.f32 %v3696_v10, %v3694_v8 }
 0x6f4   :  { %v3698_v11 = vpop.eup %3697  ;;  %v1678_v40 = vrot.slane %v1677_v35, 4 }
 0x6f5   :  { %v3700_v12 = vpop.eup %3699 }
 0x6f6   :  { %v1679_v13 = vadd.f32 %v1678_v40, %v1677_v35  ;;  %v1955_v45 = vadd.f32 %v3700_v12, %v3698_v11 }
 0x6f8   :  { %v1680_v5 = vrot.slane %v1679_v13, 2  ;;  %v1956_v58 = vrot.slane %v1955_v45, 4 }
 0x6fa   :  { %v1681_v61 = vadd.f32 %v1680_v5, %v1679_v13  ;;  %v1957_v51 = vadd.f32 %v1956_v58, %v1955_v45 }
 0x6fc   :  { %v1682_v9 = vrot.slane %v1681_v61, 1  ;;  %v1958_v16 = vrot.slane %v1957_v51, 2 }
 0x6fe   :  { %v1683_v17 = vadd.f32 %v1682_v9, %v1681_v61  ;;  %v1959_v18 = vadd.f32 %v1958_v16, %v1957_v51 }
 0x700   :  { %3701 = vrcp.f32 %v1683_v17  ;;  %v1960_v19 = vrot.slane %v1959_v18, 1 }
 0x702   :  { %v1961_v21 = vadd.f32 %v1960_v19, %v1959_v18  ;;  %v1711_v22 = vpop.xlane.xlu0 %1710 }
 0x704   :  { %3703 = vrcp.f32 %v1961_v21  ;;  %v1708_v23 = vpop.xlane.xlu1 %1707 }
 0x705   :  { %v1712_v59 = vmax.f32 %v1708_v23, %v1711_v22 }
 0x706   :  { %v1757_v24 = vpop.xlane.xlu0 %1756 }
 0x707   :  { %v1713_v62 = vrot.slane %v1712_v59, 4 }
 0x708   :  { %v1754_v25 = vpop.xlane.xlu1 %1753 }
 0x709   :  { %v1714_v50 = vmax.f32 %v1712_v59, %v1713_v62  ;;  %v1758_v46 = vmax.f32 %v1754_v25, %v1757_v24 }
 0x70b   :  { %v1715_v26 = vrot.slane %v1714_v50, 2  ;;  %v1759_v27 = vrot.slane %v1758_v46, 4 }
 0x70d   :  { %v3702_v32 = vpop.eup %3701  ;;  %v1716_v30 = vmax.f32 %v1714_v50, %v1715_v26  ;;  %v1760_v31 = vmax.f32 %v1758_v46, %v1759_v27 }
 0x70e   :  { %v1685_v36 = vmul.f32 %v3702_v32, %v3694_v8  ;;  %v1686_v37 = vmul.f32 %v3702_v32, %v3696_v10 }
 0x70f   :  { %v1717_v38 = vrot.slane %v1716_v30, 1  ;;  %v1761_v42 = vrot.slane %v1760_v31, 2 }
 0x710   :  { %v1687_v43 = vmul.f32 %v1685_v36, %v4659_v33  ;;  %v1688_v44 = vmul.f32 %v1686_v37, %v4657_v60 }
 0x711   :  { %v3704_v47 = vpop.eup %3703  ;;  %v1718_v49 = vmax.f32 %v1716_v30, %v1717_v38  ;;  %v1762_v53 = vmax.f32 %v1760_v31, %v1761_v42 }
 0x712   :  { %v1689_v54 = vsel %vm708_vm4, %v1687_v43, 0.0  ;;  %v1690_v55 = vsel %vm708_vm4, %v1688_v44, 0.0  ;;  %v1963_v15 = vmul.f32 %v3704_v47, %v3698_v11  ;;  %v1964_v20 = vmul.f32 %v3704_v47, %v3700_v12 }
 0x713   :  { %v1719_v56 = vsub.f32 %v1708_v23, %v1718_v49  ;;  %v1720_v57 = vsub.f32 %v1711_v22, %v1718_v49  ;;  %v1763_v48 = vrot.slane %v1762_v53, 1  ;;  %v1691_v29 = vadd.f32 %v1690_v55, %v1689_v54 }
 0x714   :  { %v4702_v28 = vpop.xlane.xlu0 %1985  ;;  %v1965_v63 = vmul.f32 %v1963_v15, %v4669_v6  ;;  %v1966_v34 = vmul.f32 %v1964_v20, %v4667_v4 }
 0x715   :  { %v1721_v0 = vmul.f32 1.442695, %v1719_v56  ;;  %v1723_v1 = vmul.f32 1.442695, %v1720_v57  ;;  %v1764_v2 = vmax.f32 %v1762_v53, %v1763_v48  ;;  %v1692_v3 = vrot.slane %v1691_v29, 4 }
 0x716   :  { %v1967_v7 = vsel %vm708_vm4, %v1965_v63, 0.0  ;;  %v1968_v8 = vsel %vm708_vm4, %v1966_v34, 0.0  ;;  %vm2437_vm4 = vcmask 7168  }
 0x717   :  { %3705 = vpow2.f32 %v1721_v0  ;;  %v1765_v10 = vsub.f32 %v1754_v25, %v1764_v2  ;;  %v1766_v35 = vsub.f32 %v1757_v24, %v1764_v2  ;;  %v1693_v11 = vadd.f32 %v1692_v3, %v1691_v29 }
 0x718   :  { %3707 = vpow2.f32 %v1723_v1  ;;  %v1989_v40 = vpop.xlane.xlu0 %1988  ;;  %v4708_v12 = vpop.xlane.xlu1 %2031  ;;  %v1969_v13 = vadd.f32 %v1968_v8, %v1967_v7 }
 0x719   :  { %v1767_v45 = vmul.f32 1.442695, %v1765_v10  ;;  %v1769_v5 = vmul.f32 1.442695, %v1766_v35  ;;  %v1990_v58 = vmax.f32 %v4702_v28, %v1989_v40  ;;  %v1694_v61 = vrot.slane %v1693_v11, 2 }
 0x71a   :  { %v1970_v51 = vrot.slane %v1969_v13, 4 }
 0x71b   :  { %3709 = vpow2.f32 %v1767_v45  ;;  %v1991_v9 = vrot.slane %v1990_v58, 4  ;;  %v1695_v16 = vadd.f32 %v1694_v61, %v1693_v11 }
 0x71c   :  { %3711 = vpow2.f32 %v1769_v5  ;;  %v2035_v17 = vpop.xlane.xlu0 %2034  ;;  %v1971_v18 = vadd.f32 %v1970_v51, %v1969_v13  ;;  %v2078_v23 = vpop.xlane.xlu1 %2077 }
 0x71d   :  { %v1992_v19 = vmax.f32 %v1990_v58, %v1991_v9  ;;  %v2036_v21 = vmax.f32 %v4708_v12, %v2035_v17  ;;  %v1696_v22 = vrot.slane %v1695_v16, 1 }
 0x71e   :  { %v1972_v59 = vrot.slane %v1971_v18, 2 }
 0x71f   :  { %v1993_v62 = vrot.slane %v1992_v19, 2  ;;  %v2037_v24 = vrot.slane %v2036_v21, 4  ;;  %v1697_v25 = vadd.f32 %v1696_v22, %v1695_v16 }
 0x720   :  { %v2081_v50 = vpop.xlane.xlu0 %2080  ;;  %v1973_v46 = vadd.f32 %v1972_v59, %v1971_v18  ;;  %v1800_v42 = vpop.xlane.xlu1 %1799 }
 0x721   :  { %v1994_v26 = vmax.f32 %v1992_v19, %v1993_v62  ;;  %v2038_v27 = vmax.f32 %v2036_v21, %v2037_v24  ;;  %v2082_v32 = vmax.f32 %v2078_v23, %v2081_v50  ;;  %1839 = vrot.lane.b32.xlu1 %v1697_v25, %s4146_s26 }
 0x722   :  { %v1974_v30 = vrot.slane %v1973_v46, 1 }
 0x723   :  { %v1995_v31 = vrot.slane %v1994_v26, 1  ;;  %v2039_v36 = vrot.slane %v2038_v27, 2  ;;  %v2083_v37 = vrot.slane %v2082_v32, 4 }
 0x724   :  { %v4713_v38 = vpop.eup %3705  ;;  %v1803_v43 = vpop.xlane.xlu0 %1802  ;;  %v1975_v44 = vadd.f32 %v1974_v30, %v1973_v46 }
 0x725   :  { %v4715_v47 = vpop.eup %3707  ;;  %v1996_v49 = vmax.f32 %v1994_v26, %v1995_v31  ;;  %v2040_v53 = vmax.f32 %v2038_v27, %v2039_v36  ;;  %v2084_v54 = vmax.f32 %v2082_v32, %v2083_v37  ;;  %v1804_v55 = vmax.f32 %v1800_v42, %v1803_v43 }
 0x726   :  { %v1725_v15 = vadd.f32 %v4715_v47, %v4713_v38  ;;  %2117 = vrot.lane.b32.xlu1 %v1975_v44, %s4146_s26 }
 0x727   :  { %v1997_v20 = vsub.f32 %v4702_v28, %v1996_v49  ;;  %v1998_v56 = vsub.f32 %v1989_v40, %v1996_v49  ;;  %v2041_v57 = vrot.slane %v2040_v53, 1  ;;  %v2085_v48 = vrot.slane %v2084_v54, 2 }
 0x728   :  { %v4721_v29 = vpop.eup %3709  ;;  %v1726_v63 = vrot.slane %v1725_v15, 4  ;;  %v1805_v34 = vrot.slane %v1804_v55, 4 }
 0x729   :  { %v4723_v0 = vpop.eup %3711  ;;  %v1999_v1 = vmul.f32 1.442695, %v1997_v20  ;;  %v2001_v2 = vmul.f32 1.442695, %v1998_v56  ;;  %v2042_v3 = vmax.f32 %v2040_v53, %v2041_v57  ;;  %v2086_v7 = vmax.f32 %v2084_v54, %v2085_v48 }
 0x72a   :  { %v1727_v8 = vadd.f32 %v1726_v63, %v1725_v15  ;;  %v1771_v10 = vadd.f32 %v4723_v0, %v4721_v29  ;;  %v1806_v35 = vmax.f32 %v1804_v55, %v1805_v34 }
 0x72b   :  { %3713 = vpow2.f32 %v1999_v1  ;;  %v2043_v28 = vsub.f32 %v4708_v12, %v2042_v3  ;;  %v2044_v11 = vsub.f32 %v2035_v17, %v2042_v3  ;;  %v2087_v40 = vrot.slane %v2086_v7, 1 }
 0x72c   :  { %v1728_v13 = vrot.slane %v1727_v8, 2  ;;  %v1772_v45 = vrot.slane %v1771_v10, 4  ;;  %3715 = vpow2.f32 %v2001_v2  ;;  %v1807_v5 = vrot.slane %v1806_v35, 2 }
 0x72d   :  { %v2045_v58 = vmul.f32 1.442695, %v2043_v28  ;;  %v2047_v61 = vmul.f32 1.442695, %v2044_v11  ;;  %v2088_v51 = vmax.f32 %v2086_v7, %v2087_v40 }
 0x72e   :  { %v1729_v9 = vadd.f32 %v1728_v13, %v1727_v8  ;;  %v1773_v16 = vadd.f32 %v1772_v45, %v1771_v10  ;;  %v1808_v18 = vmax.f32 %v1806_v35, %v1807_v5 }
 0x72f   :  { %3717 = vpow2.f32 %v2045_v58  ;;  %v2089_v19 = vsub.f32 %v2078_v23, %v2088_v51  ;;  %v2090_v21 = vsub.f32 %v2081_v50, %v2088_v51 }
 0x730   :  { %v1730_v22 = vrot.slane %v1729_v9, 1  ;;  %v1774_v59 = vrot.slane %v1773_v16, 2  ;;  %3719 = vpow2.f32 %v2047_v61  ;;  %v1809_v62 = vrot.slane %v1808_v18, 1 }
 0x731   :  { %v2091_v12 = vmul.f32 1.442695, %v2089_v19  ;;  %v2093_v17 = vmul.f32 1.442695, %v2090_v21 }
 0x732   :  { %v1731_v24 = vadd.f32 %v1730_v22, %v1729_v9  ;;  %v1775_v25 = vadd.f32 %v1774_v59, %v1773_v16  ;;  %v1810_v46 = vmax.f32 %v1808_v18, %v1809_v62  ;;  %v1357_v16 = vld [vmem:[#allocation19 + $0x38] sm:$0xff] }
 0x733   :  { %3721 = vpow2.f32 %v2091_v12  ;;  %3497 = vmatpush3.msra.mxu0 %v1357_v16 }
 0x734   :  { %3723 = vrcp.f32 %v1731_v24  ;;  %v1776_v26 = vrot.slane %v1775_v25, 1  ;;  %v1811_v27 = vsub.f32 %v1800_v42, %v1810_v46  ;;  %v1812_v32 = vsub.f32 %v1803_v43, %v1810_v46  ;;  %3498 = vmatprep.subr.mxu0 %v4141_v14 }
 0x735   :  { %3725 = vpow2.f32 %v2093_v17 }
 0x736   :  { %v1777_v30 = vadd.f32 %v1776_v26, %v1775_v25  ;;  %v1813_v31 = vmul.f32 1.442695, %v1811_v27  ;;  %v1815_v36 = vmul.f32 1.442695, %v1812_v32 }
 0x738   :  { %v4728_v23 = vpop.eup %3713  ;;  %3727 = vrcp.f32 %v1777_v30 }
 0x739   :  { %v4730_v50 = vpop.eup %3715  ;;  %3729 = vpow2.f32 %v1813_v31 }
 0x73a   :  { %v2003_v37 = vadd.f32 %v4730_v50, %v4728_v23  ;;  %3731 = vpow2.f32 %v1815_v36 }
 0x73c   :  { %v4734_v44 = vpop.eup %3717  ;;  %v2004_v49 = vrot.slane %v2003_v37, 4 }
 0x73d   :  { %v4736_v53 = vpop.eup %3719 }
 0x73e   :  { %v2005_v42 = vadd.f32 %v2004_v49, %v2003_v37  ;;  %v2049_v43 = vadd.f32 %v4736_v53, %v4734_v44 }
 0x740   :  { %v4740_v54 = vpop.eup %3721  ;;  %v2006_v55 = vrot.slane %v2005_v42, 2  ;;  %v2050_v15 = vrot.slane %v2049_v43, 4 }
 0x741   :  { %v3724_v20 = vpop.eup %3723 }
 0x742   :  { %v4742_v56 = vpop.eup %3725  ;;  %v2007_v57 = vadd.f32 %v2006_v55, %v2005_v42  ;;  %v2051_v48 = vadd.f32 %v2050_v15, %v2049_v43  ;;  %v1733_v63 = vmul.f32 %v3724_v20, %v4713_v38  ;;  %v1734_v34 = vmul.f32 %v3724_v20, %v4715_v47 }
 0x743   :  { %v2095_v1 = vadd.f32 %v4742_v56, %v4740_v54 }
 0x744   :  { %v2008_v2 = vrot.slane %v2007_v57, 1  ;;  %v2052_v3 = vrot.slane %v2051_v48, 2  ;;  %v1735_v7 = vmul.f32 %v1733_v63, %v4659_v33  ;;  %v1736_v8 = vmul.f32 %v1734_v34, %v4657_v60 }
 0x745   :  { %v3728_v10 = vpop.eup %3727  ;;  %v2096_v35 = vrot.slane %v2095_v1, 4 }
 0x746   :  { %v4750_v28 = vpop.eup %3729  ;;  %v2009_v11 = vadd.f32 %v2008_v2, %v2007_v57  ;;  %v2053_v40 = vadd.f32 %v2052_v3, %v2051_v48  ;;  %v1737_v13 = vsel %vm757_vm5, %v1735_v7, 0.0  ;;  %v1738_v38 = vsel %vm757_vm5, %v1736_v8, 0.0 }
 0x747   :  { %v4754_v47 = vpop.eup %3731  ;;  %v2097_v45 = vadd.f32 %v2096_v35, %v2095_v1  ;;  %v1739_v5 = vadd.f32 %v1738_v38, %v1737_v13  ;;  %v1779_v58 = vmul.f32 %v3728_v10, %v4721_v29  ;;  %v1780_v61 = vmul.f32 %v3728_v10, %v4723_v0  ;;  %v1355_v35 = vld [vmem:[#allocation19 + $0x28] sm:$0xff] }
 0x748   :  { %3733 = vrcp.f32 %v2009_v11  ;;  %v2054_v51 = vrot.slane %v2053_v40, 1  ;;  %v1817_v9 = vadd.f32 %v4754_v47, %v4750_v28 }
 0x749   :  { %v2098_v18 = vrot.slane %v2097_v45, 2  ;;  %v1740_v19 = vrot.slane %v1739_v5, 4  ;;  %v1781_v59 = vmul.f32 %v1779_v58, %v4659_v33  ;;  %v1782_v62 = vmul.f32 %v1780_v61, %v4657_v60  ;;  %v1354_v61 = vld [vmem:[#allocation19 + $0x20] sm:$0xff] }
 0x74a   :  { %v2055_v21 = vadd.f32 %v2054_v51, %v2053_v40  ;;  %v1818_v22 = vrot.slane %v1817_v9, 4  ;;  %v1353_v51 = vld [vmem:[#allocation19 + $0x18] sm:$0xff] }
 0x74b   :  { %v2099_v29 = vadd.f32 %v2098_v18, %v2097_v45  ;;  %v1741_v12 = vadd.f32 %v1740_v19, %v1739_v5  ;;  %v1783_v46 = vsel %vm804_vm6, %v1781_v59, 0.0  ;;  %v1784_v26 = vsel %vm804_vm6, %v1782_v62, 0.0 }
 0x74c   :  { %3735 = vrcp.f32 %v2055_v21  ;;  %v1819_v0 = vadd.f32 %v1818_v22, %v1817_v9  ;;  %v1785_v36 = vadd.f32 %v1784_v26, %v1783_v46  ;;  %v1352_v46 = vld [vmem:[#allocation19 + $0x10] sm:$0xff]  ;;  %v1351_v26 = vld [vmem:[#allocation19 + $0x8] sm:$0xff] }
 0x74d   :  { %v2100_v17 = vrot.slane %v2099_v29, 1  ;;  %v1742_v24 = vrot.slane %v1741_v12, 2 }
 0x74e   :  { %v1820_v25 = vrot.slane %v1819_v0, 2  ;;  %v1786_v55 = vrot.slane %v1785_v36, 4 }
 0x74f   :  { %v2101_v27 = vadd.f32 %v2100_v17, %v2099_v29  ;;  %v1743_v32 = vadd.f32 %v1742_v24, %v1741_v12 }
 0x750   :  { %v1821_v30 = vadd.f32 %v1820_v25, %v1819_v0  ;;  %v1787_v34 = vadd.f32 %v1786_v55, %v1785_v36 }
 0x751   :  { %3737 = vrcp.f32 %v2101_v27  ;;  %v1744_v31 = vrot.slane %v1743_v32, 1 }
 0x752   :  { %v1822_v37 = vrot.slane %v1821_v30, 1  ;;  %v1788_v13 = vrot.slane %v1787_v34, 2 }
 0x753   :  { %v1745_v49 = vadd.f32 %v1744_v31, %v1743_v32 }
 0x754   :  { %v1823_v42 = vadd.f32 %v1822_v37, %v1821_v30  ;;  %v1789_v21 = vadd.f32 %v1788_v13, %v1787_v34  ;;  %v1364_v34 = vld [vmem:[#allocation20 + $0x28] sm:$0xff] }
 0x755   :  { %v3734_v43 = vpop.eup %3733  ;;  %1843 = vrot.lane.b32.xlu0 %v1745_v49, %s4146_s26 }
 0x756   :  { %3739 = vrcp.f32 %v1823_v42  ;;  %v2011_v15 = vmul.f32 %v3734_v43, %v4728_v23  ;;  %v2012_v20 = vmul.f32 %v3734_v43, %v4730_v50  ;;  %v1356_v50 = vld [vmem:[#allocation19 + $0x30] sm:$0xff]  ;;  %v1790_v32 = vrot.slane %v1789_v21, 1 }
 0x757   :  { %3499 = vmatpush3.msra.mxu0 %v1356_v50 }
 0x758   :  { %v2013_v57 = vmul.f32 %v2011_v15, %v4669_v6  ;;  %v2014_v48 = vmul.f32 %v2012_v20, %v4667_v4  ;;  %3500 = vmatprep.subr.mxu0 %v4141_v14  ;;  %v1791_v49 = vadd.f32 %v1790_v32, %v1789_v21  ;;  %v1366_v15 = vld [vmem:[#allocation20 + $0x38] sm:$0xff]  ;;  %v1359_v21 = vld [vmem:[#allocation20] sm:$0xff] }
 0x759   :  { %v3736_v63 = vpop.eup %3735  ;;  %3501 = vmatpush3.msra.mxu0 %v1355_v35  ;;  %3516 = vmatpush3.msra.mxu1 %v1366_v15  ;;  %v2313_v32 = vld [vmem:[#allocation22 + $0x18] sm:$0xff] }
 0x75a   :  { %v2015_v1 = vsel %vm757_vm5, %v2013_v57, 0.0  ;;  %v2016_v2 = vsel %vm757_vm5, %v2014_v48, 0.0  ;;  %v2057_v3 = vmul.f32 %v3736_v63, %v4734_v44  ;;  %v2058_v7 = vmul.f32 %v3736_v63, %v4736_v53  ;;  %3502 = vmatprep.subr.mxu0 %v4141_v14  ;;  %v1365_v57 = vld [vmem:[#allocation20 + $0x30] sm:$0xff]  ;;  %3517 = vmatprep.subr.mxu1 %v4141_v14 }
 0x75b   :  { %v2017_v8 = vadd.f32 %v2016_v2, %v2015_v1  ;;  %3503 = vmatpush3.msra.mxu0 %v1354_v61  ;;  %3518 = vmatpush3.msra.mxu1 %v1365_v57  ;;  %vm2439_vm5 = vcmask 9216  }
 0x75c   :  { %v2059_v10 = vmul.f32 %v2057_v3, %v4669_v6  ;;  %v2060_v23 = vmul.f32 %v2058_v7, %v4667_v4  ;;  %3504 = vmatprep.subr.mxu0 %v4141_v14  ;;  %3519 = vmatprep.subr.mxu1 %v4141_v14  ;;  %v1363_v3 = vld [vmem:[#allocation20 + $0x20] sm:$0xff] }
 0x75d   :  { %v2018_v11 = vrot.slane %v2017_v8, 4  ;;  %3505 = vmatpush3.msra.mxu0 %v1353_v51  ;;  %3520 = vmatpush3.msra.mxu1 %v1364_v34 }
 0x75e   :  { %v3738_v40 = vpop.eup %3737  ;;  %v2061_v38 = vsel %vm804_vm6, %v2059_v10, 0.0  ;;  %v2062_v45 = vsel %vm804_vm6, %v2060_v23, 0.0  ;;  %3506 = vmatprep.subr.mxu0 %v4141_v14  ;;  %3521 = vmatprep.subr.mxu1 %v4141_v14  ;;  %v1361_v23 = vld [vmem:[#allocation20 + $0x10] sm:$0xff]  ;;  %vm2630_vm6 = vcmask 11266  }
 0x75f   :  { %v2019_v44 = vadd.f32 %v2018_v11, %v2017_v8  ;;  %v2063_v5 = vadd.f32 %v2062_v45, %v2061_v38  ;;  %v2103_v53 = vmul.f32 %v3738_v40, %v4740_v54  ;;  %v2104_v58 = vmul.f32 %v3738_v40, %v4742_v56  ;;  %3507 = vmatpush3.msra.mxu0 %v1352_v46  ;;  %v1362_v8 = vld [vmem:[#allocation20 + $0x18] sm:$0xff]  ;;  %v2316_v46 = vld [vmem:[#allocation22 + $0x30] sm:$0xff] }
 0x760   :  { %3508 = vmatprep.subr.mxu0 %v4141_v14  ;;  %3522 = vmatpush3.msra.mxu1 %v1363_v3 }
 0x761   :  { %v2020_v9 = vrot.slane %v2019_v44, 2  ;;  %v2064_v16 = vrot.slane %v2063_v5, 4  ;;  %v2105_v18 = vmul.f32 %v2103_v53, %v4669_v6  ;;  %v2106_v19 = vmul.f32 %v2104_v58, %v4667_v4  ;;  %3509 = vmatpush3.msra.mxu0 %v1351_v26  ;;  %3523 = vmatprep.subr.mxu1 %v4141_v14  ;;  %v2315_v26 = vld [vmem:[#allocation22 + $0x28] sm:$0xff] }
 0x762   :  { %3510 = vmatprep.subr.mxu0 %v4141_v14  ;;  %3524 = vmatpush3.msra.mxu1 %v1362_v8 }
 0x763   :  { %v3740_v22 = vpop.eup %3739  ;;  %v2021_v59 = vadd.f32 %v2020_v9, %v2019_v44  ;;  %v2065_v54 = vadd.f32 %v2064_v16, %v2063_v5  ;;  %v2107_v56 = vsel %vm851_vm7, %v2105_v18, 0.0  ;;  %v2108_v62 = vsel %vm851_vm7, %v2106_v19, 0.0  ;;  %3525 = vmatprep.subr.mxu1 %v4141_v14  ;;  %v1360_v19 = vld [vmem:[#allocation20 + $0x8] sm:$0xff] }
 0x764   :  { %v2109_v29 = vadd.f32 %v2108_v62, %v2107_v56  ;;  %v1825_v12 = vmul.f32 %v3740_v22, %v4750_v28  ;;  %v1826_v0 = vmul.f32 %v3740_v22, %v4754_v47  ;;  %3526 = vmatpush3.msra.mxu1 %v1361_v23  ;;  %v2325_v22 = vld [vmem:[#allocation22 + $0x78] sm:$0xff]  ;;  %v2322_v56 = vld [vmem:[#allocation22 + $0x60] sm:$0xff] }
 0x765   :  { %v2022_v4 = vrot.slane %v2021_v59, 1  ;;  %v2066_v6 = vrot.slane %v2065_v54, 2  ;;  %3527 = vmatprep.subr.mxu1 %v4141_v14  ;;  %v2321_v62 = vld [vmem:[#allocation22 + $0x58] sm:$0xff] }
 0x766   :  { %v2110_v17 = vrot.slane %v2109_v29, 4  ;;  %v1827_v24 = vmul.f32 %v1825_v12, %v4659_v33  ;;  %v1828_v25 = vmul.f32 %v1826_v0, %v4657_v60  ;;  %v1350_v60 = vld [vmem:[#allocation19] sm:$0xff]  ;;  %3528 = vmatpush3.msra.mxu1 %v1360_v19  ;;  %v2319_v12 = vld [vmem:[#allocation22 + $0x48] sm:$0xff] }
 0x767   :  { %v2023_v27 = vadd.f32 %v2022_v4, %v2021_v59  ;;  %v2067_v30 = vadd.f32 %v2066_v6, %v2065_v54  ;;  %3511 = vmatpush3.msra.mxu0 %v1350_v60  ;;  %3529 = vmatprep.subr.mxu1 %v4141_v14  ;;  %v2324_v59 = vld [vmem:[#allocation22 + $0x70] sm:$0xff]  ;;  %v2323_v54 = vld [vmem:[#allocation22 + $0x68] sm:$0xff]  ;;  %v2318_v0 = vld [vmem:[#allocation22 + $0x40] sm:$0xff] }
 0x768   :  { %v2111_v31 = vadd.f32 %v2110_v17, %v2109_v29  ;;  %v1829_v28 = vsel %vm851_vm7, %v1827_v24, 0.0  ;;  %v1830_v47 = vsel %vm851_vm7, %v1828_v25, 0.0  ;;  %3530 = vmatpush3.msra.mxu1 %v1359_v21  ;;  %2357 = vmatprep.subr.mxu0 %v2325_v22  ;;  %v2320_v29 = vld [vmem:[#allocation22 + $0x50] sm:$0xff]  ;;  %v2317_v25 = vld [vmem:[#allocation22 + $0x38] sm:$0xff]  ;;  %vm3084_vm7 = vcmask 1024  }
 0x769   :  { %2121 = vrot.lane.b32.xlu0 %v2023_v27, %s4146_s26  ;;  %v2068_v36 = vrot.slane %v2067_v30, 1  ;;  %v1831_v37 = vadd.f32 %v1830_v47, %v1829_v28  ;;  %3534 = vmatprep.subr.mxu1 %v4141_v14  ;;  %v3160_v4 = vld [vmem:[%s4995_s9] ss:$0 sm:$0xff]  ;;  %v2314_v27 = vld [vmem:[#allocation22 + $0x20] sm:$0xff] }
 0x76a   :  { %v2112_v33 = vrot.slane %v2111_v31, 2  ;;  %v2310_v28 = vld [vmem:[#allocation22] sm:$0xff]  ;;  %v3145_v47 = vld [vmem:[%s4996_s25] ss:$0 sm:$0xff] }
 0x76b   :  { %v2069_v42 = vadd.f32 %v2068_v36, %v2067_v30  ;;  %v1832_v43 = vrot.slane %v1831_v37, 4  ;;  %v2312_v30 = vld [vmem:[#allocation22 + $0x10] sm:$0xff] }
 0x76c   :  { %v2113_v55 = vadd.f32 %v2112_v33, %v2111_v31  ;;  %v2311_v31 = vld [vmem:[#allocation22 + $0x8] sm:$0xff]  ;;  %v3162_v36 = vld [vmem:[%s4997_s2] ss:$0 sm:$0xff] }
 0x76d   :  { %1847 = vrot.lane.b32.xlu0 %v1791_v49, %s4146_s26  ;;  %2125 = vrot.lane.b32.xlu1 %v2069_v42, %s4146_s26  ;;  %v1833_v20 = vadd.f32 %v1832_v43, %v1831_v37  ;;  %v1320_v37 = vadd.f32 %v3145_v47, %v4652_v52 }
 0x76e   :  { %v2114_v48 = vrot.slane %v2113_v55, 1 }
 0x76f   :  { %v1834_v63 = vrot.slane %v1833_v20, 2  ;;  %v2301_v43 = vrot.slane %v1320_v37, 7 }
 0x770   :  { %v2115_v1 = vadd.f32 %v2114_v48, %v2113_v55  ;;  %v4832_v48 = vld [vmem:[%s4998_s7] sm:$0x3] }
 0x771   :  { %v1835_v2 = vadd.f32 %v1834_v63, %v1833_v20  ;;  %v2331_v52 = vrot.slane %v4832_v48, %v4424_v41 }
 0x772   :  { %2129 = vrot.lane.b32.xlu1 %v2115_v1, %s4146_s26 }
 0x773   :  { %v1836_v7 = vrot.slane %v1835_v2, 1 }
 0x775   :  { %v1837_v10 = vadd.f32 %v1836_v7, %v1835_v2  ;;  %v2606_v2 = vsub.s32 2, %v4420_v39  ;;  %v2619_v7 = vsub.s32 3, %v4420_v39 }
 0x777   :  { %1851 = vrot.lane.b32.xlu1 %v1837_v10, %s4146_s26  ;;  %v4846_v10 = vsub.s32 1, %v4420_v39  ;;  %v2799_v39 = vld [vmem:[#allocation23] sm:$0xff] }
 0x793   :  { %v1840_v50 = vpop.permute.xlu1 %1839 }
 0x798   :  { %v2118_v35 = vpop.permute.xlu1 %2117 }
 0x7c7   :  { %v1844_v11 = vpop.permute.xlu0 %1843 }
 0x7c8   :  { %v1854_v58 = vsel %vm676_vm3, %v1840_v50, %v1844_v11 }
 0x7db   :  { %v2122_v13 = vpop.permute.xlu0 %2121 }
 0x7dc   :  { %v2132_v38 = vsel %vm676_vm3, %v2118_v35, %v2122_v13 }
 0x7df   :  { %v2126_v40 = vpop.permute.xlu1 %2125  ;;  %v1848_v5 = vpop.permute.xlu0 %1847 }
 0x7e0   :  { %v2133_v44 = vsel %vm878_vm9, %v2132_v38, %v2126_v40  ;;  %v1855_v61 = vsel %vm878_vm9, %v1854_v58, %v1848_v5 }
 0x7e4   :  { %v2130_v45 = vpop.permute.xlu1 %2129 }
 0x7e5   :  { %v2134_v53 = vsel %vm880_vm10, %v2133_v44, %v2130_v45 }
 0x7e6   :  { %v2136_v51 = vrot.slane %v2134_v53, 7 }
 0x7e9   :  { %v1852_v9 = vpop.permute.xlu1 %1851 }
 0x7ea   :  { %v1856_v16 = vsel %vm880_vm10, %v1855_v61, %v1852_v9 }
 0x7eb   :  { %v2138_v18 = vsel %vm1163_vm11, %v1856_v16, %v2136_v51 }
 0x7ec   :  { %3513 = vmatmul.mubr.msk.f32.vlgmr.msra.gmra.mxu0 %vm499_vm2, %v2138_v18 }
 0x7ed   :  { %2405 = vmatprep.mubr.f32.mxu0 %v4141_v14  ;;  %2358 = vmatpush1.msra.mxu0 %v2324_v59 }
 0x7ee   :  { %2359 = vmatprep.subr.mxu0 %v2323_v54 }
 0x7ef   :  { %2360 = vmatpush1.msra.mxu0 %v2322_v56 }
 0x7f0   :  { %2361 = vmatprep.subr.mxu0 %v2321_v62 }
 0x7f1   :  { %2362 = vmatpush1.msra.mxu0 %v2320_v29 }
 0x7f2   :  { %2363 = vmatprep.subr.mxu0 %v2319_v12 }
 0x7f3   :  { %2364 = vmatpush1.msra.mxu0 %v2318_v0 }
 0x7f4   :  { %2365 = vmatprep.subr.mxu0 %v2317_v25 }
 0x7f5   :  { %2366 = vmatpush1.msra.mxu0 %v2316_v46 }
 0x7f6   :  { %2367 = vmatprep.subr.mxu0 %v2315_v26 }
 0x7f7   :  { %2368 = vmatpush1.msra.mxu0 %v2314_v27 }
 0x7f8   :  { %2369 = vmatprep.subr.mxu0 %v2313_v32 }
 0x7f9   :  { %2370 = vmatpush1.msra.mxu0 %v2312_v30 }
 0x7fa   :  { %2371 = vmatprep.subr.mxu0 %v2311_v31 }
 0x7fb   :  { %2372 = vmatpush1.msra.mxu0 %v2310_v28 }
 0x7fc   :  { %3553 = vmatprep.subr.mxu0 %v4141_v14 }
 0x8ac   :  { %v2214_v6 = vpop.f32.mrf.mxu0 }
 0x8ad   :  { %v2215_v17 = vadd.f32 %v3160_v4, %v2214_v6 }
 0x8ae   :  { %v3514_v24 = vpop.f32.mrf.mxu0 }
 0x8af   :  { %3532 = vmatmul.mubr.msk.f32.vlgmr.msra.gmra.mxu1 %vm499_vm2, %v2215_v17 }
 0x8b0   :  { %3550 = vmatprep.mubr.msk.f32.mxu1 %vm4142_vm1, %v4141_v14 }
 0x96f   :  { %v2293_v33 = vpop.f32.mrf.mxu1 }
 0x970   :  { %v2294_v60 = vadd.f32 %v3162_v36, %v2293_v33 }
 0x971   :  { %v3533_v49 = vpop.f32.mrf.mxu1 }
 0x972   :  { %v2298_v42 = vrot.slane %v2294_v60, 7  ;;  %v2303_v55 = vrot.slane %v2294_v60, 6 }
 0x974   :  { %v2305_v15 = vsel %vm1163_vm11, %v1320_v37, %v2298_v42 }
 0x975   :  { %v2307_v20 = vsel %vm2306_vm13, %v2305_v15, %v2301_v43 }
 0x976   :  { %v2309_v57 = vsel %vm2308_vm14, %v2307_v20, %v2303_v55 }
 0x977   :  { %3164 = vmatmul.mubr.msk.f32.vlgmr.msra.gmra.mxu0 %vm499_vm2, %v2309_v57 }
 0x978   :  { %3569 = vmatprep.mubr.msk.f32.mxu0 %vm4142_vm1, %v4141_v14 }
 0xa37   :  { %v2407_v63 = vpop.f32.mrf.mxu0 }
 0xa38   :  { %v2408_v34 = vadd.f32 %v2407_v63, %v2331_v52 }
 0xa3a   :  { %v2415_v1 = vrot.slane %v2408_v34, %v4424_v41  ;;  %v2607_v3 = vrot.slane %v2408_v34, %v2606_v2  ;;  %v2620_v8 = vrot.slane %v2408_v34, %v2619_v7  ;;  %v2428_v23 = vrot.slane %v2408_v34, %v4846_v10 }
 0xa3c   :  { %2417 = vrot.lane.b32.xlu0 %v2415_v1, %s4146_s26 }
 0xa40   :  { %2609 = vrot.lane.b32.xlu0 %v2607_v3, %s4146_s26 }
 0xa44   :  { %2622 = vrot.lane.b32.xlu0 %v2620_v8, %s4146_s26 }
 0xa48   :  { %2430 = vrot.lane.b32.xlu0 %v2428_v23, %s4146_s26 }
 0xaae   :  { %v2418_v50 = vpop.permute.xlu0 %2417 }
 0xaaf   :  { %v2420_v44 = vmul.f32 %v2418_v50, %v2408_v34 }
 0xab1   :  { %v2422_v61 = vsel %vm2421_vm15, %v2420_v44, 0.0 }
 0xab2   :  { %v2610_v35 = vpop.permute.xlu0 %2609 }
 0xab3   :  { %v2612_v11 = vmul.f32 %v2610_v35, %v2408_v34 }
 0xab5   :  { %2668 = vrot.lane.b32.xlu0 %v2612_v11, %s4143_s4  ;;  %v2614_v53 = vsel %vm2613_vm0, %v2612_v11, 0.0 }
 0xab6   :  { %v2623_v40 = vpop.permute.xlu0 %2622 }
 0xab7   :  { %v2625_v13 = vmul.f32 %v2623_v40, %v2408_v34 }
 0xab9   :  { %2716 = vrot.lane.b32.xlu0 %v2625_v13, %s4144_s12  ;;  %2675 = vrot.lane.b32.xlu1 %v2625_v13, %s4143_s4  ;;  %v2626_v58 = vsel %vm2613_vm0, %v2625_v13, 0.0 }
 0xaba   :  { %v2431_v38 = vpop.permute.xlu0 %2430 }
 0xabb   :  { %v2433_v45 = vmul.f32 %v2431_v38, %v2408_v34 }
 0xabd   :  { %2710 = vrot.lane.b32.xlu1 %v2612_v11, %s4144_s12  ;;  %2484 = vrot.lane.b32.xlu0 %v2433_v45, %s4143_s4  ;;  %v2434_v5 = vsel %vm2421_vm15, %v2433_v45, 0.0 }
 0xac1   :  { %2477 = vrot.lane.b32.xlu1 %v2420_v44, %s4143_s4  ;;  %2757 = vrot.lane.b32.xlu0 %v2625_v13, %s4145_s23 }
 0xac5   :  { %2751 = vrot.lane.b32.xlu1 %v2612_v11, %s4145_s23  ;;  %2525 = vrot.lane.b32.xlu0 %v2433_v45, %s4144_s12 }
 0xac9   :  { %2519 = vrot.lane.b32.xlu1 %v2420_v44, %s4144_s12  ;;  %2566 = vrot.lane.b32.xlu0 %v2433_v45, %s4145_s23 }
 0xacd   :  { %2560 = vrot.lane.b32.xlu1 %v2420_v44, %s4145_s23 }
 0xae8   :  { %2435 = vadd.xlane.f32.xlu0 %v2434_v5 }
 0xaec   :  { %2615 = vadd.xlane.f32.xlu0 %v2614_v53 }
 0xaf0   :  { %2627 = vadd.xlane.f32.xlu0 %v2626_v58 }
 0xaf1   :  { %2423 = vadd.xlane.f32.xlu1 %v2422_v61 }
 0xb27   :  { %v2669_v51 = vpop.permute.xlu0 %2668 }
 0xb28   :  { %v2671_v56 = vsel %vm2613_vm0, %v2669_v51, 0.0 }
 0xb2b   :  { %v2676_v9 = vpop.permute.xlu1 %2675  ;;  %v2717_v16 = vpop.permute.xlu0 %2716 }
 0xb2c   :  { %v2678_v62 = vsel %vm2613_vm0, %v2676_v9, 0.0  ;;  %v2719_v29 = vsel %vm2613_vm0, %v2717_v16, 0.0 }
 0xb2f   :  { %v2711_v18 = vpop.permute.xlu1 %2710  ;;  %v2485_v19 = vpop.permute.xlu0 %2484 }
 0xb30   :  { %v2487_v21 = vsel %vm2421_vm15, %v2485_v19, 0.0  ;;  %v2713_v54 = vsel %vm2613_vm0, %v2711_v18, 0.0 }
 0xb31   :  { %2488 = vadd.xlane.f32.xlu1 %v2487_v21 }
 0xb33   :  { %v2478_v22 = vpop.permute.xlu1 %2477  ;;  %v2758_v4 = vpop.permute.xlu0 %2757 }
 0xb34   :  { %v2480_v59 = vsel %vm2421_vm15, %v2478_v22, 0.0  ;;  %v2760_v6 = vsel %vm2613_vm0, %v2758_v4, 0.0 }
 0xb35   :  { %2481 = vadd.xlane.f32.xlu0 %v2480_v59  ;;  %2714 = vadd.xlane.f32.xlu1 %v2713_v54 }
 0xb37   :  { %v2752_v12 = vpop.permute.xlu1 %2751  ;;  %v2526_v25 = vpop.permute.xlu0 %2525 }
 0xb38   :  { %v2754_v0 = vsel %vm2613_vm0, %v2752_v12, 0.0  ;;  %v2528_v46 = vsel %vm2421_vm15, %v2526_v25, 0.0  ;;  %v4147_v25 = vmov 0  }
 0xb39   :  { %2672 = vadd.xlane.f32.xlu0 %v2671_v56  ;;  %3639 = vset.pattern.permute.xlu1 %v4147_v25 }
 0xb3b   :  { %v2520_v17 = vpop.permute.xlu1 %2519  ;;  %v2567_v32 = vpop.permute.xlu0 %2566 }
 0xb3c   :  { %v2522_v24 = vsel %vm2421_vm15, %v2520_v17, 0.0  ;;  %v2569_v20 = vsel %vm2421_vm15, %v2567_v32, 0.0 }
 0xb3d   :  { %2679 = vadd.xlane.f32.xlu0 %v2678_v62 }
 0xb3f   :  { %v2561_v26 = vpop.permute.xlu1 %2560 }
 0xb40   :  { %v2563_v27 = vsel %vm2421_vm15, %v2561_v26, 0.0 }
 0xb41   :  { %2720 = vadd.xlane.f32.xlu0 %v2719_v29 }
 0xb45   :  { %2755 = vadd.xlane.f32.xlu0 %v2754_v0 }
 0xb49   :  { %2761 = vadd.xlane.f32.xlu0 %v2760_v6 }
 0xb4d   :  { %2523 = vadd.xlane.f32.xlu0 %v2522_v24 }
 0xb51   :  { %2529 = vadd.xlane.f32.xlu0 %v2528_v46  ;;  %v4148_v46 = vmov 1  }
 0xb52   :  { %3644 = vset.pattern.permute.xlu0 %v4148_v46 }
 0xb55   :  { %2564 = vadd.xlane.f32.xlu0 %v2563_v27 }
 0xb71   :  { %v2436_v30 = vpop.xlane.xlu0 %2435 }
 0xb75   :  { %v2616_v31 = vpop.xlane.xlu0 %2615 }
 0xb79   :  { %v2628_v28 = vpop.xlane.xlu0 %2627 }
 0xb7a   :  { %v2424_v47 = vpop.xlane.xlu1 %2423  ;;  %v2629_v33 = vsel %vm2437_vm4, %v2616_v31, %v2628_v28 }
 0xb7b   :  { %v2438_v36 = vsel %vm2437_vm4, %v2424_v47, %v2436_v30  ;;  %v2631_v60 = vsel %vm2630_vm6, %v2629_v33, -inf }
 0xb7c   :  { %v2440_v37 = vsel %vm2439_vm5, %v2438_v36, -inf }
 0xb7d   :  { %2441 = vmax.xlane.f32.xlu1 %v2440_v37 }
 0xb81   :  { %2632 = vmax.xlane.f32.xlu1 %v2631_v60 }
 0xbba   :  { %v2489_v49 = vpop.xlane.xlu1 %2488 }
 0xbbe   :  { %v2482_v42 = vpop.xlane.xlu0 %2481  ;;  %v2715_v34 = vpop.xlane.xlu1 %2714 }
 0xbbf   :  { %v2490_v43 = vsel %vm2437_vm4, %v2482_v42, %v2489_v49 }
 0xbc0   :  { %v2491_v55 = vsel %vm2439_vm5, %v2490_v43, -inf }
 0xbc1   :  { %2492 = vmax.xlane.f32.xlu0 %v2491_v55 }
 0xbc2   :  { %v2673_v15 = vpop.xlane.xlu0 %2672 }
 0xbc5   :  { %2570 = vadd.xlane.f32.xlu0 %v2569_v20 }
 0xbc6   :  { %v2680_v57 = vpop.xlane.xlu0 %2679 }
 0xbc7   :  { %v2681_v52 = vsel %vm2437_vm4, %v2673_v15, %v2680_v57 }
 0xbc8   :  { %v2682_v63 = vsel %vm2630_vm6, %v2681_v52, -inf }
 0xbc9   :  { %2683 = vmax.xlane.f32.xlu1 %v2682_v63 }
 0xbca   :  { %v2721_v1 = vpop.xlane.xlu0 %2720 }
 0xbcb   :  { %v4888_v3 = vsel %vm2437_vm4, %v2715_v34, %v2721_v1 }
 0xbcc   :  { %v2723_v8 = vsel %vm2630_vm6, %v4888_v3, -inf }
 0xbcd   :  { %2724 = vmax.xlane.f32.xlu1 %v2723_v8 }
 0xbce   :  { %v2756_v23 = vpop.xlane.xlu0 %2755 }
 0xbd2   :  { %v2762_v50 = vpop.xlane.xlu0 %2761 }
 0xbd3   :  { %v2763_v35 = vsel %vm2437_vm4, %v2756_v23, %v2762_v50 }
 0xbd4   :  { %v2764_v11 = vsel %vm2630_vm6, %v2763_v35, -inf }
 0xbd5   :  { %2765 = vmax.xlane.f32.xlu1 %v2764_v11 }
 0xbd6   :  { %v2524_v40 = vpop.xlane.xlu0 %2523 }
 0xbda   :  { %v2530_v13 = vpop.xlane.xlu0 %2529 }
 0xbdb   :  { %v2531_v38 = vsel %vm2437_vm4, %v2524_v40, %v2530_v13 }
 0xbdc   :  { %v2532_v45 = vsel %vm2439_vm5, %v2531_v38, -inf }
 0xbdd   :  { %2533 = vmax.xlane.f32.xlu1 %v2532_v45 }
 0xbde   :  { %v2565_v58 = vpop.xlane.xlu0 %2564 }
 0xc06   :  { %v2442_v44 = vpop.xlane.xlu1 %2441 }
 0xc07   :  { %v2443_v5 = vsub.f32 %v2438_v36, %v2442_v44 }
 0xc09   :  { %v2444_v53 = vmul.f32 1.442695, %v2443_v5 }
 0xc0a   :  { %v2633_v22 = vpop.xlane.xlu1 %2632 }
 0xc0b   :  { %3741 = vpow2.f32 %v2444_v53  ;;  %v2634_v0 = vsub.f32 %v2629_v33, %v2633_v22 }
 0xc0d   :  { %v2635_v17 = vmul.f32 1.442695, %v2634_v0 }
 0xc18   :  { %v3742_v21 = vpop.eup %3741 }
 0xc19   :  { %v2446_v59 = vsel %vm2439_vm5, %v3742_v21, 0.0 }
 0xc4a   :  { %v2493_v61 = vpop.xlane.xlu0 %2492 }
 0xc4b   :  { %v2494_v51 = vsub.f32 %v2490_v43, %v2493_v61 }
 0xc4d   :  { %v2495_v9 = vmul.f32 1.442695, %v2494_v51 }
 0xc4e   :  { %v2571_v16 = vpop.xlane.xlu0 %2570 }
 0xc4f   :  { %3743 = vpow2.f32 %v2495_v9  ;;  %v2572_v18 = vsel %vm2437_vm4, %v2565_v58, %v2571_v16 }
 0xc50   :  { %v2573_v19 = vsel %vm2439_vm5, %v2572_v18, -inf }
 0xc51   :  { %2574 = vmax.xlane.f32.xlu1 %v2573_v19 }
 0xc52   :  { %v2684_v54 = vpop.xlane.xlu1 %2683 }
 0xc53   :  { %v2685_v31 = vsub.f32 %v2681_v52, %v2684_v54 }
 0xc55   :  { %2447 = vadd.xlane.f32.xlu1 %v2446_v59  ;;  %v2686_v36 = vmul.f32 1.442695, %v2685_v31  ;;  %v2335_v59 = vrot.slane %v4832_v48, %v4846_v10  ;;  %v2803_v48 = vld [vmem:[#allocation23 + $0x20] sm:$0xff] }
 0xc56   :  { %v2725_v29 = vpop.xlane.xlu1 %2724 }
 0xc57   :  { %v2726_v37 = vsub.f32 %v4888_v3, %v2725_v29 }
 0xc59   :  { %v2727_v49 = vmul.f32 1.442695, %v2726_v37  ;;  %v2890_v37 = vld [vmem:[#allocation25 + $0x18] sm:$0xff] }
 0xc5c   :  { %v3744_v56 = vpop.eup %3743 }
 0xc5d   :  { %v2497_v62 = vsel %vm2439_vm5, %v3744_v56, 0.0 }
 0xc5e   :  { %2498 = vadd.xlane.f32.xlu0 %v2497_v62  ;;  %v2766_v12 = vpop.xlane.xlu1 %2765  ;;  %v2409_v62 = vpop.f32.mrf.mxu0 }
 0xc5f   :  { %v2767_v42 = vsub.f32 %v2763_v35, %v2766_v12  ;;  %v2805_v12 = vld [vmem:[#allocation23 + $0x30] sm:$0xff] }
 0xc61   :  { %v2768_v43 = vmul.f32 1.442695, %v2767_v42 }
 0xc66   :  { %v2534_v4 = vpop.xlane.xlu1 %2533 }
 0xc67   :  { %v2535_v6 = vsub.f32 %v2531_v38, %v2534_v4  ;;  %v2410_v4 = vadd.f32 %v2409_v62, %v2335_v59 }
 0xc69   :  { %v2536_v24 = vmul.f32 1.442695, %v2535_v6 }
 0xc6b   :  { %3745 = vpow2.f32 %v2536_v24  ;;  %v4917_v24 = vrot.slane %v2410_v4, %v2606_v2  ;;  %v2800_v2 = vld [vmem:[#allocation23 + $0x8] sm:$0xff] }
 0xc6c   :  { %3747 = vpow2.f32 %v2635_v17  ;;  %v2804_v17 = vld [vmem:[#allocation23 + $0x28] sm:$0xff] }
 0xc78   :  { %v3746_v26 = vpop.eup %3745 }
 0xc79   :  { %v2538_v27 = vsel %vm2439_vm5, %v3746_v26, 0.0  ;;  %v3748_v32 = vpop.eup %3747 }
 0xc7a   :  { %2539 = vadd.xlane.f32.xlu1 %v2538_v27  ;;  %v2637_v30 = vsel %vm2630_vm6, %v3748_v32, 0.0 }
 0xc7e   :  { %2638 = vadd.xlane.f32.xlu1 %v2637_v30  ;;  %v2801_v30 = vld [vmem:[#allocation23 + $0x10] sm:$0xff] }
 0xcda   :  { %v2575_v28 = vpop.xlane.xlu1 %2574 }
 0xcdb   :  { %v2576_v47 = vsub.f32 %v2572_v18, %v2575_v28  ;;  %v2893_v28 = vld [vmem:[#allocation25 + $0x30] sm:$0xff] }
 0xcdd   :  { %v2577_v33 = vmul.f32 1.442695, %v2576_v47  ;;  %v2892_v47 = vld [vmem:[#allocation25 + $0x28] sm:$0xff] }
 0xcde   :  { %v2448_v60 = vpop.xlane.xlu1 %2447 }
 0xcdf   :  { %3749 = vpow2.f32 %v2577_v33  ;;  %v2889_v33 = vld [vmem:[#allocation25 + $0x10] sm:$0xff] }
 0xce0   :  { %3751 = vrcp.f32 %v2448_v60 }
 0xce1   :  { %3753 = vpow2.f32 %v2686_v36  ;;  %v2891_v36 = vld [vmem:[#allocation25 + $0x20] sm:$0xff] }
 0xce2   :  { %3755 = vpow2.f32 %v2727_v49 }
 0xce3   :  { %3757 = vpow2.f32 %v2768_v43 }
 0xce7   :  { %v2499_v23 = vpop.xlane.xlu0 %2498 }
 0xce8   :  { %3759 = vrcp.f32 %v2499_v23 }
 0xcec   :  { %v3750_v55 = vpop.eup %3749 }
 0xced   :  { %v3752_v15 = vpop.eup %3751  ;;  %v2579_v20 = vsel %vm2439_vm5, %v3750_v55, 0.0 }
 0xcee   :  { %v3754_v57 = vpop.eup %3753  ;;  %2580 = vadd.xlane.f32.xlu0 %v2579_v20  ;;  %v2450_v52 = vmul.f32 %v3752_v15, %v3742_v21  ;;  %v2459_v20 = vrot.slane %v2410_v4, %v4424_v41 }
 0xcef   :  { %v2688_v63 = vsel %vm2630_vm6, %v3754_v57, 0.0  ;;  %v3756_v34 = vpop.eup %3755 }
 0xcf0   :  { %2453 = vperm.xlu1 %3639, %v2450_v52   ;;  %v2729_v1 = vsel %vm2630_vm6, %v3756_v34, 0.0  ;;  %v3758_v3 = vpop.eup %3757 }
 0xcf1   :  { %v2770_v8 = vsel %vm2630_vm6, %v3758_v3, 0.0 }
 0xcf2   :  { %2689 = vadd.xlane.f32.xlu0 %v2688_v63 }
 0xcf4   :  { %3640 = vset.pattern.permute.xlu1 %v4148_v46 }
 0xcf5   :  { %2462 = vperm.xlu1 %3640, %v2450_v52   ;;  %v3760_v11 = vpop.eup %3759 }
 0xcf6   :  { %2730 = vadd.xlane.f32.xlu0 %v2729_v1  ;;  %v2501_v40 = vmul.f32 %v3760_v11, %v3744_v56  ;;  %v2806_v56 = vld [vmem:[#allocation23 + $0x38] sm:$0xff] }
 0xcf7   :  { %3535 = vmatpush3.msra.mxu1 %v2806_v56 }
 0xcf8   :  { %3536 = vmatprep.subr.mxu1 %v4141_v14 }
 0xcf9   :  { %3641 = vset.pattern.permute.xlu1 %v4147_v25  ;;  %3537 = vmatpush3.msra.mxu1 %v2805_v12 }
 0xcfa   :  { %2771 = vadd.xlane.f32.xlu0 %v2770_v8  ;;  %3538 = vmatprep.subr.mxu1 %v4141_v14 }
 0xcfb   :  { %3539 = vmatpush3.msra.mxu1 %v2804_v17 }
 0xcfc   :  { %3540 = vmatprep.subr.mxu1 %v4141_v14 }
 0xcfd   :  { %3541 = vmatpush3.msra.mxu1 %v2803_v48 }
 0xcfe   :  { %3542 = vmatprep.subr.mxu1 %v4141_v14 }
 0xd03   :  { %v2540_v50 = vpop.xlane.xlu1 %2539 }
 0xd04   :  { %3761 = vrcp.f32 %v2540_v50 }
 0xd07   :  { %v2639_v35 = vpop.xlane.xlu1 %2638 }
 0xd08   :  { %3763 = vrcp.f32 %v2639_v35 }
 0xd10   :  { %2509 = vperm.xlu0 %3644, %v2501_v40  }
 0xd11   :  { %v3762_v13 = vpop.eup %3761 }
 0xd12   :  { %v2542_v38 = vmul.f32 %v3762_v13, %v3746_v26 }
 0xd14   :  { %2550 = vperm.xlu0 %3644, %v2542_v38  }
 0xd15   :  { %v3764_v45 = vpop.eup %3763 }
 0xd16   :  { %v2641_v44 = vmul.f32 %v3764_v45, %v3748_v32 }
 0xd18   :  { %2644 = vperm.xlu1 %3641, %v2641_v44  }
 0xd1c   :  { %3642 = vset.pattern.permute.xlu1 %v4148_v46  ;;  %v2802_v46 = vld [vmem:[#allocation23 + $0x18] sm:$0xff] }
 0xd1d   :  { %2653 = vperm.xlu1 %3642, %v2641_v44   ;;  %3543 = vmatpush3.msra.mxu1 %v2802_v46 }
 0xd1e   :  { %3544 = vmatprep.subr.mxu1 %v4141_v14 }
 0xd1f   :  { %3545 = vmatpush3.msra.mxu1 %v2801_v30 }
 0xd20   :  { %3546 = vmatprep.subr.mxu1 %v4141_v14 }
 0xd21   :  { %3643 = vset.pattern.permute.xlu1 %v4147_v25  ;;  %v4921_v25 = vrot.slane %v2410_v4, %v2619_v7  ;;  %3547 = vmatpush3.msra.mxu1 %v2800_v2  ;;  %v2894_v7 = vld [vmem:[#allocation25 + $0x38] sm:$0xff] }
 0xd22   :  { %2504 = vperm.xlu1 %3643, %v2501_v40   ;;  %3548 = vmatprep.subr.mxu1 %v4141_v14 }
 0xd23   :  { %3554 = vmatpush3.msra.mxu0 %v2894_v7  ;;  %3549 = vmatpush3.msra.mxu1 %v2799_v39 }
 0xd24   :  { %3555 = vmatprep.subr.mxu0 %v4141_v14  ;;  %3572 = vmatprep.subr.mxu1 %v4141_v14 }
 0xd25   :  { %3556 = vmatpush3.msra.mxu0 %v2893_v28 }
 0xd26   :  { %2545 = vperm.xlu1 %3643, %v2542_v38   ;;  %3557 = vmatprep.subr.mxu0 %v4141_v14 }
 0xd27   :  { %3558 = vmatpush3.msra.mxu0 %v2892_v47 }
 0xd28   :  { %3559 = vmatprep.subr.mxu0 %v4141_v14 }
 0xd29   :  { %3560 = vmatpush3.msra.mxu0 %v2891_v36 }
 0xd2a   :  { %3561 = vmatprep.subr.mxu0 %v4141_v14 }
 0xd2b   :  { %3562 = vmatpush3.msra.mxu0 %v2890_v37 }
 0xd2c   :  { %3563 = vmatprep.subr.mxu0 %v4141_v14 }
 0xd2d   :  { %3564 = vmatpush3.msra.mxu0 %v2889_v33 }
 0xd2e   :  { %3565 = vmatprep.subr.mxu0 %v4141_v14 }
 0xd6b   :  { %v4907_v18 = vpop.permute.xlu1 %2453 }
 0xd6c   :  { %v2460_v13 = vmul.f32 %v2459_v20, %v4907_v18 }
 0xd70   :  { %v4911_v54 = vpop.permute.xlu1 %2462 }
 0xd77   :  { %v2581_v5 = vpop.xlane.xlu0 %2580 }
 0xd78   :  { %3765 = vrcp.f32 %v2581_v5 }
 0xd7b   :  { %v2690_v53 = vpop.xlane.xlu0 %2689 }
 0xd7c   :  { %3767 = vrcp.f32 %v2690_v53 }
 0xd7f   :  { %v2731_v58 = vpop.xlane.xlu0 %2730 }
 0xd80   :  { %3769 = vrcp.f32 %v2731_v58 }
 0xd83   :  { %v2772_v61 = vpop.xlane.xlu0 %2771 }
 0xd84   :  { %3771 = vrcp.f32 %v2772_v61 }
 0xd85   :  { %v3766_v51 = vpop.eup %3765 }
 0xd86   :  { %v2583_v9 = vmul.f32 %v3766_v51, %v3750_v55 }
 0xd88   :  { %2591 = vperm.xlu0 %3644, %v2583_v9   ;;  %2586 = vperm.xlu1 %3643, %v2583_v9  }
 0xd89   :  { %v3768_v16 = vpop.eup %3767 }
 0xd8a   :  { %v2692_v19 = vmul.f32 %v3768_v16, %v3754_v57  ;;  %v2468_v57 = vrot.slane %v2410_v4, %v4846_v10 }
 0xd8b   :  { %v2510_v60 = vpop.permute.xlu0 %2509 }
 0xd8c   :  { %2700 = vperm.xlu0 %3644, %v2692_v19   ;;  %2695 = vperm.xlu1 %3643, %v2692_v19   ;;  %v2469_v52 = vmul.f32 %v2468_v57, %v4911_v54  ;;  %v2512_v35 = vmul.f32 %v2510_v60, %v2468_v57 }
 0xd8d   :  { %v3770_v21 = vpop.eup %3769 }
 0xd8e   :  { %v2733_v22 = vmul.f32 %v3770_v21, %v3756_v34  ;;  %v2470_v10 = vadd.f32 %v2469_v52, %v2460_v13  ;;  %v2887_v52 = vld [vmem:[#allocation25] sm:$0xff] }
 0xd8f   :  { %v2551_v42 = vpop.permute.xlu0 %2550 }
 0xd90   :  { %2741 = vperm.xlu0 %3644, %v2733_v22   ;;  %2736 = vperm.xlu1 %3643, %v2733_v22   ;;  %v2553_v38 = vmul.f32 %v2551_v42, %v2468_v57  ;;  %v2472_v59 = vrot.slane %v2470_v10, 1 }
 0xd91   :  { %v3772_v29 = vpop.eup %3771 }
 0xd92   :  { %v2774_v0 = vmul.f32 %v3772_v29, %v3758_v3 }
 0xd93   :  { %v2645_v6 = vpop.permute.xlu1 %2644 }
 0xd94   :  { %2782 = vperm.xlu0 %3644, %v2774_v0   ;;  %2777 = vperm.xlu1 %3643, %v2774_v0   ;;  %v2651_v27 = vmul.f32 %v4917_v24, %v2645_v6 }
 0xd98   :  { %v2654_v26 = vpop.permute.xlu1 %2653 }
 0xd99   :  { %v2660_v32 = vmul.f32 %v4921_v25, %v2654_v26 }
 0xd9b   :  { %v2661_v31 = vadd.f32 %v2660_v32, %v2651_v27  ;;  %v2474_v32 = vadd.f32 %v2472_v59, %v2470_v10 }
 0xd9d   :  { %v2505_v49 = vpop.permute.xlu1 %2504  ;;  %v2663_v34 = vrot.slane %v2661_v31, 1  ;;  %v2475_v47 = vmul.f32 0.5, %v2474_v32 }
 0xd9e   :  { %v2507_v63 = vmul.f32 %v2505_v49, %v2459_v20 }
 0xd9f   :  { %v2665_v44 = vadd.f32 %v2663_v34, %v2661_v31 }
 0xda0   :  { %v2513_v41 = vadd.f32 %v2512_v35, %v2507_v63  ;;  %v3165_v63 = vld [vmem:[%s5001_s10] ss:$0 sm:$0xff] }
 0xda1   :  { %v2546_v43 = vpop.permute.xlu1 %2545  ;;  %v2666_v54 = vmul.f32 0.5, %v2665_v44 }
 0xda2   :  { %v2548_v1 = vmul.f32 %v2546_v43, %v2459_v20  ;;  %v2515_v19 = vrot.slane %v2513_v41, 1  ;;  %v2977_v43 = vld [vmem:[%s4999_s17 + $0x8] sm:$0x3] }
 0xda4   :  { %v2554_v5 = vadd.f32 %v2553_v38, %v2548_v1  ;;  %v2517_v17 = vadd.f32 %v2515_v19, %v2513_v41 }
 0xda6   :  { %v2556_v18 = vrot.slane %v2554_v5, 1  ;;  %v2518_v39 = vmul.f32 0.5, %v2517_v17 }
 0xda8   :  { %v2558_v27 = vadd.f32 %v2556_v18, %v2554_v5  ;;  %v2601_v37 = vsel %vm676_vm3, %v2475_v47, %v2518_v39  ;;  %v3173_v5 = vld [vmem:[#allocation2] ss:$0 sm:$0xff] }
 0xe03   :  { %v2587_v55 = vpop.permute.xlu1 %2586  ;;  %v2592_v15 = vpop.permute.xlu0 %2591 }
 0xe04   :  { %v2589_v3 = vmul.f32 %v2587_v55, %v2459_v20  ;;  %v2594_v8 = vmul.f32 %v2592_v15, %v2468_v57  ;;  %v2976_v15 = vld [vmem:[%s4999_s17] sm:$0xff]  ;;  %v2888_v57 = vld [vmem:[#allocation25 + $0x8] sm:$0xff] }
 0xe05   :  { %v2975_v20 = vld [vmem:[%s5000_s3] sm:$0x3]  ;;  %3566 = vmatpush3.msra.mxu0 %v2888_v57 }
 0xe06   :  { %v2595_v53 = vadd.f32 %v2594_v8, %v2589_v3  ;;  %3567 = vmatprep.subr.mxu0 %v4141_v14 }
 0xe07   :  { %v2696_v23 = vpop.permute.xlu1 %2695  ;;  %v2701_v50 = vpop.permute.xlu0 %2700  ;;  %3568 = vmatpush3.msra.mxu0 %v2887_v52 }
 0xe08   :  { %v2698_v11 = vmul.f32 %v2696_v23, %v4917_v24  ;;  %v2703_v40 = vmul.f32 %v2701_v50, %v4921_v25  ;;  %v2597_v56 = vrot.slane %v2595_v53, 1  ;;  %v3169_v50 = vld [vmem:[%s4307_s13] ss:$0 sm:$0xff] }
 0xe0a   :  { %v2704_v45 = vadd.f32 %v2703_v40, %v2698_v11  ;;  %v2599_v30 = vadd.f32 %v2597_v56, %v2595_v53  ;;  %v3167_v11 = vld [vmem:[%s5002_s11] ss:$0 sm:$0xff] }
 0xe0b   :  { %v2737_v58 = vpop.permute.xlu1 %2736  ;;  %v2742_v61 = vpop.permute.xlu0 %2741 }
 0xe0c   :  { %v2706_v51 = vrot.slane %v2704_v45, 1  ;;  %v2739_v9 = vmul.f32 %v2737_v58, %v4917_v24  ;;  %v2744_v16 = vmul.f32 %v2742_v61, %v4921_v25 }
 0xe0e   :  { %v2708_v21 = vadd.f32 %v2706_v51, %v2704_v45  ;;  %v2745_v22 = vadd.f32 %v2744_v16, %v2739_v9 }
 0xe0f   :  { %v2778_v62 = vpop.permute.xlu1 %2777  ;;  %v2783_v29 = vpop.permute.xlu0 %2782 }
 0xe10   :  { %v2709_v12 = vmul.f32 0.5, %v2708_v21  ;;  %v2747_v0 = vrot.slane %v2745_v22, 1  ;;  %v2780_v4 = vmul.f32 %v2778_v62, %v4917_v24  ;;  %v2785_v6 = vmul.f32 %v2783_v29, %v4921_v25 }
 0xe11   :  { %v2559_v24 = vmul.f32 0.5, %v2558_v27  ;;  %v2600_v25 = vmul.f32 0.5, %v2599_v30 }
 0xe12   :  { %v2792_v48 = vsel %vm676_vm3, %v2666_v54, %v2709_v12  ;;  %v2749_v46 = vadd.f32 %v2747_v0, %v2745_v22  ;;  %v2786_v26 = vadd.f32 %v2785_v6, %v2780_v4  ;;  %vm2985_vm3 = vcmask 80896  }
 0xe13   :  { %v2602_v60 = vsel %vm878_vm9, %v2601_v37, %v2559_v24 }
 0xe14   :  { %v2750_v31 = vmul.f32 0.5, %v2749_v46  ;;  %v2788_v2 = vrot.slane %v2786_v26, 1  ;;  %v2603_v42 = vsel %vm880_vm10, %v2602_v60, %v2600_v25 }
 0xe16   :  { %v2793_v7 = vsel %vm878_vm9, %v2792_v48, %v2750_v31  ;;  %v2790_v28 = vadd.f32 %v2788_v2, %v2786_v26 }
 0xe18   :  { %v2791_v36 = vmul.f32 0.5, %v2790_v28 }
 0xe1a   :  { %v2794_v33 = vsel %vm880_vm10, %v2793_v7, %v2791_v36 }
 0xe1b   :  { %v2796_v49 = vrot.slane %v2794_v33, 1 }
 0xe1d   :  { %v2798_v55 = vsel %vm1163_vm11, %v2603_v42, %v2796_v49 }
 0xe1e   :  { %3551 = vmatmul.mubr.msk.f32.vlgmr.msra.gmra.mxu1 %vm499_vm2, %v2798_v55 }
 0xe1f   :  { %3573 = vmatpush3.msk.msra.mxu1 %vm2306_vm13, %v2977_v43  ;;  %3576 = vmatprep.mubr.msk.f32.mxu1 %vm4142_vm1, %v4141_v14  ;;  %vm3072_vm1 = vcmask 517120  }
 0xe20   :  { %3574 = vmatprep.subr.mxu1 %v4141_v14  ;;  %v3172_v14 = vld [vmem:[%s4312_s29] ss:$0 sm:$0xff] }
 0xe21   :  { %3575 = vmatpush3.msra.mxu1 %v2976_v15 }
 0xe22   :  { %3577 = vmatmul.mubr.msk.f32.vlgmr.msra.gmra.mxu1 %vm2985_vm3, %v2975_v20 }
 0xede   :  { %v2883_v34 = vpop.f32.mrf.mxu1 }
 0xedf   :  { %v2884_v1 = vadd.f32 %v3165_v63, %v2883_v34 }
 0xee0   :  { %v3552_v3 = vpop.f32.mrf.mxu1 }
 0xee1   :  { %3570 = vmatmul.mubr.msk.f32.vlgmr.msra.gmra.mxu0 %vm499_vm2, %v2884_v1 }
 0xee2   :  { %v3058_v8 = vpop.f32.mrf.mxu1 }
 0xee3   :  { %v3059_v35 = vadd.f32 %v3169_v50, %v3058_v8 }
 0xee4   :  { %v3578_v23 = vpop.f32.mrf.mxu1 }
 0xee5   :  { %v3062_v40 = vmax.f32 %v3059_v35, 0.0 }
 0xfa1   :  { %v2971_v13 = vpop.f32.mrf.mxu0 }
 0xfa2   :  { %v2972_v38 = vadd.f32 %v3167_v11, %v2971_v13 }
 0xfa3   :  { %v3571_v41 = vpop.f32.mrf.mxu0 }
 0xfa4   :  { %v3063_v45 = vmul.f32 %v3062_v40, %v2972_v38 }
 0xfa6   :  { %v3071_v10 = vmul.f32 %v3172_v14, %v3063_v45 }
 0xfa8   :  { %v3073_v44 = vsel %vm3072_vm1, %v3071_v10, 0.0 }
 0xfa9   :  { %3074 = vadd.xlane.f32.xlu1 %v3073_v44 }
0x1032   :  { %v3075_v53 = vpop.xlane.xlu1 %3074 }
0x1033   :  { %v3083_v58 = vadd.f32 %v3173_v5, %v3075_v53 }
0x1035   :  { %3085 = vst.msk [vmem:[%s4320_s21] sm:$0x3] %vm3084_vm7, %v3083_v58 }
0x1036   :  { %3090 = vsyncpa [#allocation4], 1 }
0x1037   :  { %3091 = vsyncpa [#allocation6], 1 }
0x1038   :  { %3092 = vsyncpa [#allocation9], 1 }
0x1039   :  { %3093 = vsyncpa [#allocation12], 1 }
0x103a   :  { %3094 = vsyncpa [#allocation15], 1 }
0x103b   :  { %3095 = vsyncpa [#allocation18], 1 }
0x103c   :  { %3096 = vsyncpa [#allocation21], 1 }
0x103d   :  { %3097 = vsyncpa [#allocation24], 1 }

</bundles_post_ra>
